<compile_context>
chip_gen: v7x
topology: tpu7x:2x2x1
jax: 0.10.0
libtpu: 0.0.40
codegen_flags: <defaults>
</compile_context>

<pallas_src>
import functools

import jax
import jax.numpy as jnp
from jax.experimental import pallas as pl
from jax.experimental.pallas import tpu as pltpu


_SQRT1_2 = 0.7071067811865476


def _gelu_exact(x):
    # PyTorch nn.GELU() default ('none'): 0.5*x*(1+erf(x/sqrt(2))).
    # erf via Abramowitz & Stegun 7.1.26 (max abs err ~1.5e-7); exp runs on the EUP slot.
    z = jnp.abs(x) * _SQRT1_2
    t = 1.0 / (1.0 + 0.3275911 * z)
    poly = t * (0.254829592 + t * (-0.284496736 + t * (1.421413741
                + t * (-1.453152027 + t * 1.061405429))))
    erf = 1.0 - poly * jnp.exp(-z * z)
    erf = jnp.where(x >= 0.0, erf, -erf)
    return 0.5 * x * (1.0 + erf)


def _unet_up1_kernel(xd_ref, mtc_ref, wb_ref, sh_ref, o_ref, t0, t1, *,
                     Ho, NI, LP, B_blk):
    """Whole UnetUp1 forward for a block of B_blk images, entirely in VMEM.

    xd_ref : (B_blk, Ho+1, KDp)  pre-interleaved ConvTranspose LHS rows (see wrapper)
    mtc_ref: (KDp, LP)           combined ConvTranspose matrix (bias folded into K)
    wb_ref : (4, 3, LP, LP)      banded conv weights (BN scale folded), [layer, dh]
    sh_ref : (4, LP)             per-layer folded BN shift + bias (lane-padded to LP)
    o_ref  : (B_blk, Ho, NI)     output block (channels-fastest; reshaped outside)
    t0, t1 : (R, LP)             activation ping-pong scratch, R = 1 + B_blk*(Ho+1)
    """
    f32 = jnp.float32
    R = 1 + B_blk * (Ho + 1)

    # Only the pad rows that are never rewritten below need zeroing; the interiors
    # (and the remaining pad rows) are fully overwritten every grid step.
    zrow = jnp.zeros((1, LP), f32)
    t0[0:1, :] = zrow
    t1[0:1, :] = zrow
    t1[R - 1:R, :] = zrow

    # ---- ConvTranspose2d(Cin, C, 3, stride=2) ----
    # One matmul per image produces the Ho output rows already in interleaved
    # (even/odd) row order plus one trailing zero pad row; stored with a single
    # contiguous full-width store.
    mtc = mtc_ref[...]
    for b in range(B_blk):
        blk = jnp.dot(xd_ref[b], mtc, preferred_element_type=f32)   # (Ho+1, LP)
        base = 1 + b * (Ho + 1)
        t0[base:base + Ho + 1, :] = blk

    # Rows of the conv accumulator that sit on inter-image pad rows (only exist
    # when B_blk > 1); they are forced to zero before being stored into pad rows.
    if B_blk > 1:
        rid = jax.lax.broadcasted_iota(jnp.int32, (R - 2, LP), 0)
        keep = None
        for b in range(B_blk - 1):
            m = rid != ((b + 1) * (Ho + 1) - 1)
            keep = m if keep is None else (keep & m)

    # ---- 4 x (Conv3x3 pad=1 -> folded BN shift -> GELU), ping-pong t0 <-> t1 ----
    bufs = (t0, t1)
    for l in range(4):
        tin = bufs[l % 2]
        acc = jnp.dot(tin[0:R - 2, :], wb_ref[l, 0], preferred_element_type=f32)
        acc = acc + jnp.dot(tin[1:R - 1, :], wb_ref[l, 1], preferred_element_type=f32)
        acc = acc + jnp.dot(tin[2:R, :], wb_ref[l, 2], preferred_element_type=f32)
        y = _gelu_exact(acc + sh_ref[l])
        if l < 3:
            if B_blk > 1:
                y = jnp.where(keep, y, 0.0)
            bufs[(l + 1) % 2][1:R - 1, :] = y          # single full-width store
        else:
            for b in range(B_blk):
                o_ref[b, :, :] = y[b * (Ho + 1):b * (Ho + 1) + Ho,
                                   0:NI].astype(o_ref.dtype)


# ---------------------------------------------------------------------------
# Wrapper-side weight / layout preparation (cheap XLA ops on tiny data).
# ---------------------------------------------------------------------------
def _deconv_combined_matrix(wt, bt, w_in, wo, kdp, lp):
    """ConvTranspose2d(k=3, s=2) as one (KDp, LP) matrix.

    wt: (Cin, Cout, 3, 3) PyTorch layout; bt: (Cout,).
    K rows: [0,WC)   = kh=0 tap applied to x[r]      (even output rows),
            [WC,2WC) = kh=2 tap applied to x[r-1]    (even output rows),
            [2WC,3WC)= kh=1 tap applied to x[r]      (odd output rows),
            row 3WC  = bias (LHS carries a 0/1 indicator lane), rest zero.
    Column band: out col ow receives input col iw via kw = ow - 2*iw in [0,2].
    """
    cin, cout = wt.shape[0], wt.shape[1]
    wc = w_in * cin
    ni = wo * cout
    iw = jnp.arange(w_in)[:, None]
    ow = jnp.arange(wo)[None, :]
    kw = ow - 2 * iw
    valid = ((kw >= 0) & (kw <= 2)).astype(jnp.float32)
    kw_c = jnp.clip(kw, 0, 2)
    w_kh = jnp.transpose(wt, (2, 3, 0, 1))                        # (kh, kw, ci, co)

    def band(kh):
        sel = w_kh[kh][kw_c] * valid[:, :, None, None]            # (w_in, wo, ci, co)
        return jnp.transpose(sel, (0, 2, 1, 3)).reshape(wc, ni)

    core = jnp.concatenate(
        [band(0), band(2), band(1), jnp.tile(bt, wo)[None, :]], axis=0)  # (3*wc+1, ni)
    full = jnp.zeros((kdp, lp), jnp.float32)
    return full.at[:3 * wc + 1, :ni].set(core)


def _conv_band_matrices(w, wo, lp):
    """3x3 pad-1 conv as 3 banded (LP, LP) matrices over interior-only lanes.

    w: (3, 3, Cin, Cout) [dh, dw, ci, co] (BN scale folded).
    B[dh][iw*Cin+ci, ow*Cout+co] = w[dh, iw-ow+1, ci, co] when 0 <= iw-ow+1 <= 2.
    Width-pad pixels are zero, so their taps are simply dropped (zero rows).
    """
    cin, cout = w.shape[2], w.shape[3]
    iw = jnp.arange(wo)[:, None]
    ow = jnp.arange(wo)[None, :]
    dw = iw - ow + 1
    valid = ((dw >= 0) & (dw <= 2)).astype(jnp.float32)
    dw_c = jnp.clip(dw, 0, 2)
    wsel = w[:, dw_c, :, :] * valid[None, :, :, None, None]       # (3, wo, wo, ci, co)
    band = jnp.transpose(wsel, (0, 1, 3, 2, 4)).reshape(3, wo * cin, wo * cout)
    full = jnp.zeros((3, lp, lp), jnp.float32)
    return full.at[:, :wo * cin, :wo * cout].set(band)


def _pick_batch_block(n):
    # Fuse images into one grid step to raise matmul M, but keep >= 2 grid steps on
    # the "parallel" axis so both TensorCores get work on v7x.
    for cand in (8, 4, 2):
        if n % cand == 0 and n // cand >= 2:
            return cand
    return 1


def init_params(key, in_channels, out_channels):
    def normal(k, shape, scale=0.1):
        return scale * jax.random.normal(k, shape, jnp.float32)

    ks = iter(jax.random.split(key, 32))
    p = {}
    # nn.ConvTranspose2d(in_channels, out_channels, 3, 2): weight (Cin, Cout, 3, 3)
    p["wt"] = normal(next(ks), (in_channels, out_channels, 3, 3))
    p["bt"] = normal(next(ks), (out_channels,))
    # Two ResidualConvBlock(out, out) (is_res=False), each two (Conv2d + BN + GELU).
    for blk in ("rb1", "rb2"):
        for conv in ("c1", "c2"):
            pre = f"{blk}_{conv}"
            p[f"{pre}_w"] = normal(next(ks), (out_channels, out_channels, 3, 3))
            p[f"{pre}_b"] = normal(next(ks), (out_channels,))
            p[f"{pre}_gamma"] = 1.0 + normal(next(ks), (out_channels,))
            p[f"{pre}_beta"] = normal(next(ks), (out_channels,))
            p[f"{pre}_mean"] = normal(next(ks), (out_channels,))
            p[f"{pre}_var"] = 1.0 + jnp.abs(normal(next(ks), (out_channels,)))
    return p


def unet_up1_forward(x, skip, params):
    """x, skip: NHWC float32. Returns NHWC output of UnetUp1 (inference-mode BN)."""
    eps = 1e-5
    f32 = jnp.float32
    n, h, w, cx = x.shape
    cin = cx + skip.shape[-1]
    cout = params["bt"].shape[0]
    ho, wo = 2 * h + 1, 2 * w + 1
    wc = w * cin
    ni = wo * cout
    lp = ((ni + 127) // 128) * 128                 # lane-padded activation width
    kd = 3 * wc + 1                                # deconv K: kh0|kh2|kh1 taps + bias lane
    kdp = ((kd + 127) // 128) * 128
    b_blk = _pick_batch_block(n)
    assert n % b_blk == 0

    # --- pre-interleaved ConvTranspose LHS (layout plumbing only) ---
    xc = jnp.concatenate([x, skip], axis=-1).astype(f32)
    xr = xc.reshape(n, h, wc)
    zr = jnp.zeros((n, 1, wc), f32)
    row_r = jnp.concatenate([xr, zr], axis=1)      # row k holds x[k]   (0 for k=H)
    row_rm1 = jnp.concatenate([zr, xr], axis=1)    # row k holds x[k-1] (0 for k=0)
    zeros_wc = jnp.zeros((n, h + 1, wc), f32)
    even_rows = jnp.concatenate(
        [row_r, row_rm1, zeros_wc, jnp.ones((n, h + 1, 1), f32)], axis=-1)
    odd_bias = jnp.concatenate(
        [jnp.ones((n, h, 1), f32), jnp.zeros((n, 1, 1), f32)], axis=1)
    odd_rows = jnp.concatenate([zeros_wc, zeros_wc, row_r, odd_bias], axis=-1)
    # Interleave even/odd target rows; last (all-zero) row becomes the pad row.
    xd = jnp.stack([even_rows, odd_rows], axis=2).reshape(n, ho + 1, kd)
    xd = jnp.pad(xd, ((0, 0), (0, 0), (0, kdp - kd)))

    mtc = _deconv_combined_matrix(params["wt"].astype(f32),
                                  params["bt"].astype(f32), w, wo, kdp, lp)

    # --- Conv/BN stacks -> banded matrices (BN scale folded) + folded shifts ---
    wbs, shs = [], []
    for blk in ("rb1", "rb2"):
        for conv in ("c1", "c2"):
            pre = f"{blk}_{conv}"
            s = params[f"{pre}_gamma"] * jax.lax.rsqrt(params[f"{pre}_var"] + eps)
            shift = (params[f"{pre}_b"] - params[f"{pre}_mean"]) * s \
                    + params[f"{pre}_beta"]
            # PyTorch (Cout, Cin, kh, kw) -> (kh, kw, Cin, Cout), BN scale folded.
            wmat = jnp.transpose(params[f"{pre}_w"], (2, 3, 1, 0)) \
                   * s[None, None, None, :]
            wbs.append(_conv_band_matrices(wmat.astype(f32), wo, lp))
            shs.append(jnp.pad(jnp.tile(shift.astype(f32), wo), (0, lp - ni)))
    wb = jnp.stack(wbs, axis=0)                     # (4, 3, LP, LP)
    sh = jnp.stack(shs, axis=0)                     # (4, LP)

    kernel = functools.partial(_unet_up1_kernel, Ho=ho, NI=ni, LP=lp, B_blk=b_blk)
    r_rows = 1 + b_blk * (ho + 1)
    out = pl.pallas_call(
        kernel,
        out_shape=jax.ShapeDtypeStruct((n, ho, ni), jnp.float32),
        grid=(n // b_blk,),
        in_specs=[
            pl.BlockSpec((b_blk, ho + 1, kdp), lambda i: (i, 0, 0)),
            pl.BlockSpec((kdp, lp), lambda i: (0, 0)),
            pl.BlockSpec((4, 3, lp, lp), lambda i: (0, 0, 0, 0)),
            pl.BlockSpec((4, lp), lambda i: (0, 0)),
        ],
        out_specs=pl.BlockSpec((b_blk, ho, ni), lambda i: (i, 0, 0)),
        scratch_shapes=[
            pltpu.VMEM((r_rows, lp), jnp.float32),
            pltpu.VMEM((r_rows, lp), jnp.float32),
        ],
        compiler_params=pltpu.CompilerParams(
            dimension_semantics=("parallel",)),
    )(xd, mtc, wb, sh)
    return out.reshape(n, ho, wo, cout)


# ---------------------------------------------------------------------------
# Pure-XLA reference (dilate + pad lowering of the transposed conv) for checking.
# ---------------------------------------------------------------------------
def _conv3x3_valid_ref(xp, wmat):
    n, hp, wp, _ = xp.shape
    ho, wo = hp - 2, wp - 2
    out = jnp.zeros((n, ho, wo, wmat.shape[-1]), jnp.float32)
    for dh in range(3):
        for dw in range(3):
            out = out + jnp.einsum("nhwc,co->nhwo",
                                   xp[:, dh:dh + ho, dw:dw + wo, :], wmat[dh, dw])
    return out


def unet_up1_reference(x, skip, params):
    eps = 1e-5
    xc = jnp.concatenate([x, skip], axis=-1).astype(jnp.float32)
    n, h, w, cin = xc.shape
    dil = jnp.zeros((n, 2 * h - 1, 2 * w - 1, cin), jnp.float32)
    dil = dil.at[:, ::2, ::2, :].set(xc)
    dil = jnp.pad(dil, ((0, 0), (2, 2), (2, 2), (0, 0)))
    wt = jnp.transpose(params["wt"][:, :, ::-1, ::-1], (2, 3, 0, 1))
    y = _conv3x3_valid_ref(dil, wt) + params["bt"]
    for blk in ("rb1", "rb2"):
        for conv in ("c1", "c2"):
            pre = f"{blk}_{conv}"
            s = params[f"{pre}_gamma"] * jax.lax.rsqrt(params[f"{pre}_var"] + eps)
            shift = (params[f"{pre}_b"] - params[f"{pre}_mean"]) * s \
                    + params[f"{pre}_beta"]
            wmat = jnp.transpose(params[f"{pre}_w"], (2, 3, 1, 0))
            yp = jnp.pad(y, ((0, 0), (1, 1), (1, 1), (0, 0)))
            y = jax.nn.gelu(_conv3x3_valid_ref(yp, wmat) * s + shift,
                            approximate=False)
    return y


if __name__ == "__main__":
    key = jax.random.PRNGKey(0)
    k_x, k_s, k_p = jax.random.split(key, 3)

    N, H, W = 4, 8, 8
    c_x, c_skip = 4, 4                  # concatenated -> in_channels = 8
    in_channels = c_x + c_skip
    out_channels = 8

    x = jax.random.normal(k_x, (N, H, W, c_x), jnp.float32)
    skip = jax.random.normal(k_s, (N, H, W, c_skip), jnp.float32)
    params = init_params(k_p, in_channels, out_channels)

    fwd = jax.jit(unet_up1_forward)
    out = jax.block_until_ready(fwd(x, skip, params))

    assert out.shape == (N, 2 * H + 1, 2 * W + 1, out_channels), out.shape
    assert bool(jnp.all(jnp.isfinite(out)))

    ref = jax.block_until_ready(jax.jit(unet_up1_reference)(x, skip, params))
    err = float(jnp.max(jnp.abs(out - ref)))
    assert err < 2e-3, f"max abs error vs reference = {err}"
    print("KERNEL_OK")
</pallas_src>

<mosaic_0001>
module attributes {stable_mosaic.version = 11 : i64} {
  func.func @_unet_up1_kernel(%arg0: i32, %arg1: memref<2x18x256xf32, #tpu.memory_space<vmem>>, %arg2: memref<256x256xf32, #tpu.memory_space<vmem>>, %arg3: memref<4x3x256x256xf32, #tpu.memory_space<vmem>>, %arg4: memref<4x256xf32, #tpu.memory_space<vmem>>, %arg5: memref<2x17x136xf32, #tpu.memory_space<vmem>>, %arg6: memref<37x256xf32, #tpu.memory_space<vmem>>, %arg7: memref<37x256xf32, #tpu.memory_space<vmem>>) attributes {dimension_semantics = [#tpu.dimension_semantics<parallel>], iteration_bounds = array<i64: 2>, scalar_prefetch = 0 : i64, scratch_operands = 2 : i64, tpu.core_type = #tpu.core_type<tc>, window_params = [{transform_indices = @transform_0, window_bounds = array<i64: 2, 18, 256>}, {pipeline_mode = #tpu.pipeline_mode<synchronous>, transform_indices = @transform_1, window_bounds = array<i64: 256, 256>}, {pipeline_mode = #tpu.pipeline_mode<synchronous>, transform_indices = @transform_2, window_bounds = array<i64: 4, 3, 256, 256>}, {pipeline_mode = #tpu.pipeline_mode<synchronous>, transform_indices = @transform_3, window_bounds = array<i64: 4, 256>}, {transform_indices = @transform_4, window_bounds = array<i64: 2, 17, 136>}]} {
    %cst = arith.constant 0.000000e+00 : f32
    %0 = vector.broadcast %cst : f32 to vector<1x256xf32>
    %c0 = arith.constant 0 : index
    %c0_0 = arith.constant 0 : index
    %1 = vector.load %arg6[%c0, %c0_0] : memref<37x256xf32, #tpu.memory_space<vmem>>, vector<1x256xf32>
    tpu.vector_store %arg6[%c0, %c0_0], %0 {strides = array<i32>} : memref<37x256xf32, #tpu.memory_space<vmem>>, vector<1x256xf32>,
    %c0_1 = arith.constant 0 : index
    %c0_2 = arith.constant 0 : index
    %2 = vector.load %arg7[%c0_1, %c0_2] : memref<37x256xf32, #tpu.memory_space<vmem>>, vector<1x256xf32>
    tpu.vector_store %arg7[%c0_1, %c0_2], %0 {strides = array<i32>} : memref<37x256xf32, #tpu.memory_space<vmem>>, vector<1x256xf32>,
    %c36 = arith.constant 36 : index
    %c0_3 = arith.constant 0 : index
    %3 = vector.load %arg7[%c36, %c0_3] : memref<37x256xf32, #tpu.memory_space<vmem>>, vector<1x256xf32>
    tpu.vector_store %arg7[%c36, %c0_3], %0 {strides = array<i32>} : memref<37x256xf32, #tpu.memory_space<vmem>>, vector<1x256xf32>,
    %c0_4 = arith.constant 0 : index
    %c0_5 = arith.constant 0 : index
    %4 = vector.load %arg2[%c0_4, %c0_5] : memref<256x256xf32, #tpu.memory_space<vmem>>, vector<256x256xf32>
    %c0_6 = arith.constant 0 : index
    %c0_7 = arith.constant 0 : index
    %c0_8 = arith.constant 0 : index
    %5 = vector.load %arg1[%c0_6, %c0_7, %c0_8] : memref<2x18x256xf32, #tpu.memory_space<vmem>>, vector<1x18x256xf32>
    %6 = vector.shape_cast %5 : vector<1x18x256xf32> to vector<18x256xf32>
    %cst_9 = arith.constant dense<0.000000e+00> : vector<18x256xf32>
    %7 = tpu.matmul %6, %4, %cst_9 {dimension_numbers = #tpu.dot_dimension_numbers<[1], [0], [0], [1], [0, 0, 1, 1], [], []>} : vector<18x256xf32>, vector<256x256xf32>, vector<18x256xf32> -> vector<18x256xf32>
    %c1 = arith.constant 1 : index
    %c0_10 = arith.constant 0 : index
    %8 = vector.load %arg6[%c1, %c0_10] : memref<37x256xf32, #tpu.memory_space<vmem>>, vector<18x256xf32>
    tpu.vector_store %arg6[%c1, %c0_10], %7 {strides = array<i32>} : memref<37x256xf32, #tpu.memory_space<vmem>>, vector<18x256xf32>,
    %c1_11 = arith.constant 1 : index
    %c0_12 = arith.constant 0 : index
    %c0_13 = arith.constant 0 : index
    %9 = vector.load %arg1[%c1_11, %c0_12, %c0_13] : memref<2x18x256xf32, #tpu.memory_space<vmem>>, vector<1x18x256xf32>
    %10 = vector.shape_cast %9 : vector<1x18x256xf32> to vector<18x256xf32>
    %cst_14 = arith.constant dense<0.000000e+00> : vector<18x256xf32>
    %11 = tpu.matmul %10, %4, %cst_14 {dimension_numbers = #tpu.dot_dimension_numbers<[1], [0], [0], [1], [0, 0, 1, 1], [], []>} : vector<18x256xf32>, vector<256x256xf32>, vector<18x256xf32> -> vector<18x256xf32>
    %c19 = arith.constant 19 : index
    %c0_15 = arith.constant 0 : index
    %12 = vector.load %arg6[%c19, %c0_15] : memref<37x256xf32, #tpu.memory_space<vmem>>, vector<18x256xf32>
    tpu.vector_store %arg6[%c19, %c0_15], %11 {strides = array<i32>} : memref<37x256xf32, #tpu.memory_space<vmem>>, vector<18x256xf32>,
    %13 = tpu.iota {dimensions = array<i32: 0>} : vector<35x256xi32>
    %c17_i32 = arith.constant 17 : i32
    %14 = vector.broadcast %c17_i32 : i32 to vector<35x256xi32>
    %15 = arith.cmpi ne, %13, %14 : vector<35x256xi32>
    %c0_16 = arith.constant 0 : index
    %c0_17 = arith.constant 0 : index
    %16 = vector.load %arg6[%c0_16, %c0_17] : memref<37x256xf32, #tpu.memory_space<vmem>>, vector<35x256xf32>
    %c0_18 = arith.constant 0 : index
    %c0_19 = arith.constant 0 : index
    %c0_20 = arith.constant 0 : index
    %c0_21 = arith.constant 0 : index
    %17 = vector.load %arg3[%c0_18, %c0_19, %c0_20, %c0_21] : memref<4x3x256x256xf32, #tpu.memory_space<vmem>>, vector<1x1x256x256xf32>
    %18 = vector.shape_cast %17 : vector<1x1x256x256xf32> to vector<256x256xf32>
    %cst_22 = arith.constant dense<0.000000e+00> : vector<35x256xf32>
    %19 = tpu.matmul %16, %18, %cst_22 {dimension_numbers = #tpu.dot_dimension_numbers<[1], [0], [0], [1], [0, 0, 1, 1], [], []>} : vector<35x256xf32>, vector<256x256xf32>, vector<35x256xf32> -> vector<35x256xf32>
    %c1_23 = arith.constant 1 : index
    %c0_24 = arith.constant 0 : index
    %20 = vector.load %arg6[%c1_23, %c0_24] : memref<37x256xf32, #tpu.memory_space<vmem>>, vector<35x256xf32>
    %c0_25 = arith.constant 0 : index
    %c1_26 = arith.constant 1 : index
    %c0_27 = arith.constant 0 : index
    %c0_28 = arith.constant 0 : index
    %21 = vector.load %arg3[%c0_25, %c1_26, %c0_27, %c0_28] : memref<4x3x256x256xf32, #tpu.memory_space<vmem>>, vector<1x1x256x256xf32>
    %22 = vector.shape_cast %21 : vector<1x1x256x256xf32> to vector<256x256xf32>
    %cst_29 = arith.constant dense<0.000000e+00> : vector<35x256xf32>
    %23 = tpu.matmul %20, %22, %cst_29 {dimension_numbers = #tpu.dot_dimension_numbers<[1], [0], [0], [1], [0, 0, 1, 1], [], []>} : vector<35x256xf32>, vector<256x256xf32>, vector<35x256xf32> -> vector<35x256xf32>
    %24 = arith.addf %19, %23 : vector<35x256xf32>
    %c2 = arith.constant 2 : index
    %c0_30 = arith.constant 0 : index
    %25 = vector.load %arg6[%c2, %c0_30] : memref<37x256xf32, #tpu.memory_space<vmem>>, vector<35x256xf32>
    %c0_31 = arith.constant 0 : index
    %c2_32 = arith.constant 2 : index
    %c0_33 = arith.constant 0 : index
    %c0_34 = arith.constant 0 : index
    %26 = vector.load %arg3[%c0_31, %c2_32, %c0_33, %c0_34] : memref<4x3x256x256xf32, #tpu.memory_space<vmem>>, vector<1x1x256x256xf32>
    %27 = vector.shape_cast %26 : vector<1x1x256x256xf32> to vector<256x256xf32>
    %cst_35 = arith.constant dense<0.000000e+00> : vector<35x256xf32>
    %28 = tpu.matmul %25, %27, %cst_35 {dimension_numbers = #tpu.dot_dimension_numbers<[1], [0], [0], [1], [0, 0, 1, 1], [], []>} : vector<35x256xf32>, vector<256x256xf32>, vector<35x256xf32> -> vector<35x256xf32>
    %29 = arith.addf %24, %28 : vector<35x256xf32>
    %c0_36 = arith.constant 0 : index
    %c0_37 = arith.constant 0 : index
    %30 = vector.load %arg4[%c0_36, %c0_37] : memref<4x256xf32, #tpu.memory_space<vmem>>, vector<1x256xf32>
    %31 = vector.shape_cast %30 : vector<1x256xf32> to vector<256xf32>
    %32 = vector.shape_cast %31 : vector<256xf32> to vector<1x256xf32>
    %33 = vector.broadcast %32 : vector<1x256xf32> to vector<35x256xf32>
    %34 = arith.addf %29, %33 : vector<35x256xf32>
    %35 = math.absf %34 : vector<35x256xf32>
    %cst_38 = arith.constant 0.707106769 : f32
    %36 = vector.broadcast %cst_38 : f32 to vector<35x256xf32>
    %37 = arith.mulf %35, %36 : vector<35x256xf32>
    %cst_39 = arith.constant 0.327591091 : f32
    %38 = vector.broadcast %cst_39 : f32 to vector<35x256xf32>
    %39 = arith.mulf %38, %37 : vector<35x256xf32>
    %cst_40 = arith.constant 1.000000e+00 : f32
    %40 = vector.broadcast %cst_40 : f32 to vector<35x256xf32>
    %41 = arith.addf %40, %39 : vector<35x256xf32>
    %cst_41 = arith.constant 1.000000e+00 : f32
    %42 = vector.broadcast %cst_41 : f32 to vector<35x256xf32>
    %43 = arith.divf %42, %41 : vector<35x256xf32>
    %cst_42 = arith.constant 1.06140542 : f32
    %44 = vector.broadcast %cst_42 : f32 to vector<35x256xf32>
    %45 = arith.mulf %43, %44 : vector<35x256xf32>
    %cst_43 = arith.constant -1.45315206 : f32
    %46 = vector.broadcast %cst_43 : f32 to vector<35x256xf32>
    %47 = arith.addf %46, %45 : vector<35x256xf32>
    %48 = arith.mulf %43, %47 : vector<35x256xf32>
    %cst_44 = arith.constant 1.42141378 : f32
    %49 = vector.broadcast %cst_44 : f32 to vector<35x256xf32>
    %50 = arith.addf %49, %48 : vector<35x256xf32>
    %51 = arith.mulf %43, %50 : vector<35x256xf32>
    %cst_45 = arith.constant -0.284496725 : f32
    %52 = vector.broadcast %cst_45 : f32 to vector<35x256xf32>
    %53 = arith.addf %52, %51 : vector<35x256xf32>
    %54 = arith.mulf %43, %53 : vector<35x256xf32>
    %cst_46 = arith.constant 0.254829586 : f32
    %55 = vector.broadcast %cst_46 : f32 to vector<35x256xf32>
    %56 = arith.addf %55, %54 : vector<35x256xf32>
    %57 = arith.mulf %43, %56 : vector<35x256xf32>
    %cst_47 = arith.constant 0.000000e+00 : f32
    %58 = vector.broadcast %cst_47 : f32 to vector<35x256xf32>
    %59 = arith.subf %58, %37 : vector<35x256xf32>
    %60 = arith.mulf %59, %37 : vector<35x256xf32>
    %61 = math.exp %60 : vector<35x256xf32>
    %62 = arith.mulf %57, %61 : vector<35x256xf32>
    %cst_48 = arith.constant 1.000000e+00 : f32
    %63 = vector.broadcast %cst_48 : f32 to vector<35x256xf32>
    %64 = arith.subf %63, %62 : vector<35x256xf32>
    %cst_49 = arith.constant 0.000000e+00 : f32
    %65 = vector.broadcast %cst_49 : f32 to vector<35x256xf32>
    %66 = arith.cmpf oge, %34, %65 : vector<35x256xf32>
    %cst_50 = arith.constant 0.000000e+00 : f32
    %67 = vector.broadcast %cst_50 : f32 to vector<35x256xf32>
    %68 = arith.subf %67, %64 : vector<35x256xf32>
    %69 = arith.select %66, %64, %68 : vector<35x256xi1>, vector<35x256xf32>
    %cst_51 = arith.constant 5.000000e-01 : f32
    %70 = vector.broadcast %cst_51 : f32 to vector<35x256xf32>
    %71 = arith.mulf %70, %34 : vector<35x256xf32>
    %cst_52 = arith.constant 1.000000e+00 : f32
    %72 = vector.broadcast %cst_52 : f32 to vector<35x256xf32>
    %73 = arith.addf %72, %69 : vector<35x256xf32>
    %74 = arith.mulf %71, %73 : vector<35x256xf32>
    %cst_53 = arith.constant 0.000000e+00 : f32
    %75 = vector.broadcast %cst_53 : f32 to vector<35x256xf32>
    %76 = arith.select %15, %74, %75 : vector<35x256xi1>, vector<35x256xf32>
    %c1_54 = arith.constant 1 : index
    %c0_55 = arith.constant 0 : index
    %77 = vector.load %arg7[%c1_54, %c0_55] : memref<37x256xf32, #tpu.memory_space<vmem>>, vector<35x256xf32>
    tpu.vector_store %arg7[%c1_54, %c0_55], %76 {strides = array<i32>} : memref<37x256xf32, #tpu.memory_space<vmem>>, vector<35x256xf32>,
    %c0_56 = arith.constant 0 : index
    %c0_57 = arith.constant 0 : index
    %78 = vector.load %arg7[%c0_56, %c0_57] : memref<37x256xf32, #tpu.memory_space<vmem>>, vector<35x256xf32>
    %c1_58 = arith.constant 1 : index
    %c0_59 = arith.constant 0 : index
    %c0_60 = arith.constant 0 : index
    %c0_61 = arith.constant 0 : index
    %79 = vector.load %arg3[%c1_58, %c0_59, %c0_60, %c0_61] : memref<4x3x256x256xf32, #tpu.memory_space<vmem>>, vector<1x1x256x256xf32>
    %80 = vector.shape_cast %79 : vector<1x1x256x256xf32> to vector<256x256xf32>
    %cst_62 = arith.constant dense<0.000000e+00> : vector<35x256xf32>
    %81 = tpu.matmul %78, %80, %cst_62 {dimension_numbers = #tpu.dot_dimension_numbers<[1], [0], [0], [1], [0, 0, 1, 1], [], []>} : vector<35x256xf32>, vector<256x256xf32>, vector<35x256xf32> -> vector<35x256xf32>
    %c1_63 = arith.constant 1 : index
    %c0_64 = arith.constant 0 : index
    %82 = vector.load %arg7[%c1_63, %c0_64] : memref<37x256xf32, #tpu.memory_space<vmem>>, vector<35x256xf32>
    %c1_65 = arith.constant 1 : index
    %c1_66 = arith.constant 1 : index
    %c0_67 = arith.constant 0 : index
    %c0_68 = arith.constant 0 : index
    %83 = vector.load %arg3[%c1_65, %c1_66, %c0_67, %c0_68] : memref<4x3x256x256xf32, #tpu.memory_space<vmem>>, vector<1x1x256x256xf32>
    %84 = vector.shape_cast %83 : vector<1x1x256x256xf32> to vector<256x256xf32>
    %cst_69 = arith.constant dense<0.000000e+00> : vector<35x256xf32>
    %85 = tpu.matmul %82, %84, %cst_69 {dimension_numbers = #tpu.dot_dimension_numbers<[1], [0], [0], [1], [0, 0, 1, 1], [], []>} : vector<35x256xf32>, vector<256x256xf32>, vector<35x256xf32> -> vector<35x256xf32>
    %86 = arith.addf %81, %85 : vector<35x256xf32>
    %c2_70 = arith.constant 2 : index
    %c0_71 = arith.constant 0 : index
    %87 = vector.load %arg7[%c2_70, %c0_71] : memref<37x256xf32, #tpu.memory_space<vmem>>, vector<35x256xf32>
    %c1_72 = arith.constant 1 : index
    %c2_73 = arith.constant 2 : index
    %c0_74 = arith.constant 0 : index
    %c0_75 = arith.constant 0 : index
    %88 = vector.load %arg3[%c1_72, %c2_73, %c0_74, %c0_75] : memref<4x3x256x256xf32, #tpu.memory_space<vmem>>, vector<1x1x256x256xf32>
    %89 = vector.shape_cast %88 : vector<1x1x256x256xf32> to vector<256x256xf32>
    %cst_76 = arith.constant dense<0.000000e+00> : vector<35x256xf32>
    %90 = tpu.matmul %87, %89, %cst_76 {dimension_numbers = #tpu.dot_dimension_numbers<[1], [0], [0], [1], [0, 0, 1, 1], [], []>} : vector<35x256xf32>, vector<256x256xf32>, vector<35x256xf32> -> vector<35x256xf32>
    %91 = arith.addf %86, %90 : vector<35x256xf32>
    %c1_77 = arith.constant 1 : index
    %c0_78 = arith.constant 0 : index
    %92 = vector.load %arg4[%c1_77, %c0_78] : memref<4x256xf32, #tpu.memory_space<vmem>>, vector<1x256xf32>
    %93 = vector.shape_cast %92 : vector<1x256xf32> to vector<256xf32>
    %94 = vector.shape_cast %93 : vector<256xf32> to vector<1x256xf32>
    %95 = vector.broadcast %94 : vector<1x256xf32> to vector<35x256xf32>
    %96 = arith.addf %91, %95 : vector<35x256xf32>
    %97 = math.absf %96 : vector<35x256xf32>
    %cst_79 = arith.constant 0.707106769 : f32
    %98 = vector.broadcast %cst_79 : f32 to vector<35x256xf32>
    %99 = arith.mulf %97, %98 : vector<35x256xf32>
    %cst_80 = arith.constant 0.327591091 : f32
    %100 = vector.broadcast %cst_80 : f32 to vector<35x256xf32>
    %101 = arith.mulf %100, %99 : vector<35x256xf32>
    %cst_81 = arith.constant 1.000000e+00 : f32
    %102 = vector.broadcast %cst_81 : f32 to vector<35x256xf32>
    %103 = arith.addf %102, %101 : vector<35x256xf32>
    %cst_82 = arith.constant 1.000000e+00 : f32
    %104 = vector.broadcast %cst_82 : f32 to vector<35x256xf32>
    %105 = arith.divf %104, %103 : vector<35x256xf32>
    %cst_83 = arith.constant 1.06140542 : f32
    %106 = vector.broadcast %cst_83 : f32 to vector<35x256xf32>
    %107 = arith.mulf %105, %106 : vector<35x256xf32>
    %cst_84 = arith.constant -1.45315206 : f32
    %108 = vector.broadcast %cst_84 : f32 to vector<35x256xf32>
    %109 = arith.addf %108, %107 : vector<35x256xf32>
    %110 = arith.mulf %105, %109 : vector<35x256xf32>
    %cst_85 = arith.constant 1.42141378 : f32
    %111 = vector.broadcast %cst_85 : f32 to vector<35x256xf32>
    %112 = arith.addf %111, %110 : vector<35x256xf32>
    %113 = arith.mulf %105, %112 : vector<35x256xf32>
    %cst_86 = arith.constant -0.284496725 : f32
    %114 = vector.broadcast %cst_86 : f32 to vector<35x256xf32>
    %115 = arith.addf %114, %113 : vector<35x256xf32>
    %116 = arith.mulf %105, %115 : vector<35x256xf32>
    %cst_87 = arith.constant 0.254829586 : f32
    %117 = vector.broadcast %cst_87 : f32 to vector<35x256xf32>
    %118 = arith.addf %117, %116 : vector<35x256xf32>
    %119 = arith.mulf %105, %118 : vector<35x256xf32>
    %cst_88 = arith.constant 0.000000e+00 : f32
    %120 = vector.broadcast %cst_88 : f32 to vector<35x256xf32>
    %121 = arith.subf %120, %99 : vector<35x256xf32>
    %122 = arith.mulf %121, %99 : vector<35x256xf32>
    %123 = math.exp %122 : vector<35x256xf32>
    %124 = arith.mulf %119, %123 : vector<35x256xf32>
    %cst_89 = arith.constant 1.000000e+00 : f32
    %125 = vector.broadcast %cst_89 : f32 to vector<35x256xf32>
    %126 = arith.subf %125, %124 : vector<35x256xf32>
    %cst_90 = arith.constant 0.000000e+00 : f32
    %127 = vector.broadcast %cst_90 : f32 to vector<35x256xf32>
    %128 = arith.cmpf oge, %96, %127 : vector<35x256xf32>
    %cst_91 = arith.constant 0.000000e+00 : f32
    %129 = vector.broadcast %cst_91 : f32 to vector<35x256xf32>
    %130 = arith.subf %129, %126 : vector<35x256xf32>
    %131 = arith.select %128, %126, %130 : vector<35x256xi1>, vector<35x256xf32>
    %cst_92 = arith.constant 5.000000e-01 : f32
    %132 = vector.broadcast %cst_92 : f32 to vector<35x256xf32>
    %133 = arith.mulf %132, %96 : vector<35x256xf32>
    %cst_93 = arith.constant 1.000000e+00 : f32
    %134 = vector.broadcast %cst_93 : f32 to vector<35x256xf32>
    %135 = arith.addf %134, %131 : vector<35x256xf32>
    %136 = arith.mulf %133, %135 : vector<35x256xf32>
    %cst_94 = arith.constant 0.000000e+00 : f32
    %137 = vector.broadcast %cst_94 : f32 to vector<35x256xf32>
    %138 = arith.select %15, %136, %137 : vector<35x256xi1>, vector<35x256xf32>
    %c1_95 = arith.constant 1 : index
    %c0_96 = arith.constant 0 : index
    %139 = vector.load %arg6[%c1_95, %c0_96] : memref<37x256xf32, #tpu.memory_space<vmem>>, vector<35x256xf32>
    tpu.vector_store %arg6[%c1_95, %c0_96], %138 {strides = array<i32>} : memref<37x256xf32, #tpu.memory_space<vmem>>, vector<35x256xf32>,
    %c0_97 = arith.constant 0 : index
    %c0_98 = arith.constant 0 : index
    %140 = vector.load %arg6[%c0_97, %c0_98] : memref<37x256xf32, #tpu.memory_space<vmem>>, vector<35x256xf32>
    %c2_99 = arith.constant 2 : index
    %c0_100 = arith.constant 0 : index
    %c0_101 = arith.constant 0 : index
    %c0_102 = arith.constant 0 : index
    %141 = vector.load %arg3[%c2_99, %c0_100, %c0_101, %c0_102] : memref<4x3x256x256xf32, #tpu.memory_space<vmem>>, vector<1x1x256x256xf32>
    %142 = vector.shape_cast %141 : vector<1x1x256x256xf32> to vector<256x256xf32>
    %cst_103 = arith.constant dense<0.000000e+00> : vector<35x256xf32>
    %143 = tpu.matmul %140, %142, %cst_103 {dimension_numbers = #tpu.dot_dimension_numbers<[1], [0], [0], [1], [0, 0, 1, 1], [], []>} : vector<35x256xf32>, vector<256x256xf32>, vector<35x256xf32> -> vector<35x256xf32>
    %c1_104 = arith.constant 1 : index
    %c0_105 = arith.constant 0 : index
    %144 = vector.load %arg6[%c1_104, %c0_105] : memref<37x256xf32, #tpu.memory_space<vmem>>, vector<35x256xf32>
    %c2_106 = arith.constant 2 : index
    %c1_107 = arith.constant 1 : index
    %c0_108 = arith.constant 0 : index
    %c0_109 = arith.constant 0 : index
    %145 = vector.load %arg3[%c2_106, %c1_107, %c0_108, %c0_109] : memref<4x3x256x256xf32, #tpu.memory_space<vmem>>, vector<1x1x256x256xf32>
    %146 = vector.shape_cast %145 : vector<1x1x256x256xf32> to vector<256x256xf32>
    %cst_110 = arith.constant dense<0.000000e+00> : vector<35x256xf32>
    %147 = tpu.matmul %144, %146, %cst_110 {dimension_numbers = #tpu.dot_dimension_numbers<[1], [0], [0], [1], [0, 0, 1, 1], [], []>} : vector<35x256xf32>, vector<256x256xf32>, vector<35x256xf32> -> vector<35x256xf32>
    %148 = arith.addf %143, %147 : vector<35x256xf32>
    %c2_111 = arith.constant 2 : index
    %c0_112 = arith.constant 0 : index
    %149 = vector.load %arg6[%c2_111, %c0_112] : memref<37x256xf32, #tpu.memory_space<vmem>>, vector<35x256xf32>
    %c2_113 = arith.constant 2 : index
    %c2_114 = arith.constant 2 : index
    %c0_115 = arith.constant 0 : index
    %c0_116 = arith.constant 0 : index
    %150 = vector.load %arg3[%c2_113, %c2_114, %c0_115, %c0_116] : memref<4x3x256x256xf32, #tpu.memory_space<vmem>>, vector<1x1x256x256xf32>
    %151 = vector.shape_cast %150 : vector<1x1x256x256xf32> to vector<256x256xf32>
    %cst_117 = arith.constant dense<0.000000e+00> : vector<35x256xf32>
    %152 = tpu.matmul %149, %151, %cst_117 {dimension_numbers = #tpu.dot_dimension_numbers<[1], [0], [0], [1], [0, 0, 1, 1], [], []>} : vector<35x256xf32>, vector<256x256xf32>, vector<35x256xf32> -> vector<35x256xf32>
    %153 = arith.addf %148, %152 : vector<35x256xf32>
    %c2_118 = arith.constant 2 : index
    %c0_119 = arith.constant 0 : index
    %154 = vector.load %arg4[%c2_118, %c0_119] : memref<4x256xf32, #tpu.memory_space<vmem>>, vector<1x256xf32>
    %155 = vector.shape_cast %154 : vector<1x256xf32> to vector<256xf32>
    %156 = vector.shape_cast %155 : vector<256xf32> to vector<1x256xf32>
    %157 = vector.broadcast %156 : vector<1x256xf32> to vector<35x256xf32>
    %158 = arith.addf %153, %157 : vector<35x256xf32>
    %159 = math.absf %158 : vector<35x256xf32>
    %cst_120 = arith.constant 0.707106769 : f32
    %160 = vector.broadcast %cst_120 : f32 to vector<35x256xf32>
    %161 = arith.mulf %159, %160 : vector<35x256xf32>
    %cst_121 = arith.constant 0.327591091 : f32
    %162 = vector.broadcast %cst_121 : f32 to vector<35x256xf32>
    %163 = arith.mulf %162, %161 : vector<35x256xf32>
    %cst_122 = arith.constant 1.000000e+00 : f32
    %164 = vector.broadcast %cst_122 : f32 to vector<35x256xf32>
    %165 = arith.addf %164, %163 : vector<35x256xf32>
    %cst_123 = arith.constant 1.000000e+00 : f32
    %166 = vector.broadcast %cst_123 : f32 to vector<35x256xf32>
    %167 = arith.divf %166, %165 : vector<35x256xf32>
    %cst_124 = arith.constant 1.06140542 : f32
    %168 = vector.broadcast %cst_124 : f32 to vector<35x256xf32>
    %169 = arith.mulf %167, %168 : vector<35x256xf32>
    %cst_125 = arith.constant -1.45315206 : f32
    %170 = vector.broadcast %cst_125 : f32 to vector<35x256xf32>
    %171 = arith.addf %170, %169 : vector<35x256xf32>
    %172 = arith.mulf %167, %171 : vector<35x256xf32>
    %cst_126 = arith.constant 1.42141378 : f32
    %173 = vector.broadcast %cst_126 : f32 to vector<35x256xf32>
    %174 = arith.addf %173, %172 : vector<35x256xf32>
    %175 = arith.mulf %167, %174 : vector<35x256xf32>
    %cst_127 = arith.constant -0.284496725 : f32
    %176 = vector.broadcast %cst_127 : f32 to vector<35x256xf32>
    %177 = arith.addf %176, %175 : vector<35x256xf32>
    %178 = arith.mulf %167, %177 : vector<35x256xf32>
    %cst_128 = arith.constant 0.254829586 : f32
    %179 = vector.broadcast %cst_128 : f32 to vector<35x256xf32>
    %180 = arith.addf %179, %178 : vector<35x256xf32>
    %181 = arith.mulf %167, %180 : vector<35x256xf32>
    %cst_129 = arith.constant 0.000000e+00 : f32
    %182 = vector.broadcast %cst_129 : f32 to vector<35x256xf32>
    %183 = arith.subf %182, %161 : vector<35x256xf32>
    %184 = arith.mulf %183, %161 : vector<35x256xf32>
    %185 = math.exp %184 : vector<35x256xf32>
    %186 = arith.mulf %181, %185 : vector<35x256xf32>
    %cst_130 = arith.constant 1.000000e+00 : f32
    %187 = vector.broadcast %cst_130 : f32 to vector<35x256xf32>
    %188 = arith.subf %187, %186 : vector<35x256xf32>
    %cst_131 = arith.constant 0.000000e+00 : f32
    %189 = vector.broadcast %cst_131 : f32 to vector<35x256xf32>
    %190 = arith.cmpf oge, %158, %189 : vector<35x256xf32>
    %cst_132 = arith.constant 0.000000e+00 : f32
    %191 = vector.broadcast %cst_132 : f32 to vector<35x256xf32>
    %192 = arith.subf %191, %188 : vector<35x256xf32>
    %193 = arith.select %190, %188, %192 : vector<35x256xi1>, vector<35x256xf32>
    %cst_133 = arith.constant 5.000000e-01 : f32
    %194 = vector.broadcast %cst_133 : f32 to vector<35x256xf32>
    %195 = arith.mulf %194, %158 : vector<35x256xf32>
    %cst_134 = arith.constant 1.000000e+00 : f32
    %196 = vector.broadcast %cst_134 : f32 to vector<35x256xf32>
    %197 = arith.addf %196, %193 : vector<35x256xf32>
    %198 = arith.mulf %195, %197 : vector<35x256xf32>
    %cst_135 = arith.constant 0.000000e+00 : f32
    %199 = vector.broadcast %cst_135 : f32 to vector<35x256xf32>
    %200 = arith.select %15, %198, %199 : vector<35x256xi1>, vector<35x256xf32>
    %c1_136 = arith.constant 1 : index
    %c0_137 = arith.constant 0 : index
    %201 = vector.load %arg7[%c1_136, %c0_137] : memref<37x256xf32, #tpu.memory_space<vmem>>, vector<35x256xf32>
    tpu.vector_store %arg7[%c1_136, %c0_137], %200 {strides = array<i32>} : memref<37x256xf32, #tpu.memory_space<vmem>>, vector<35x256xf32>,
    %c0_138 = arith.constant 0 : index
    %c0_139 = arith.constant 0 : index
    %202 = vector.load %arg7[%c0_138, %c0_139] : memref<37x256xf32, #tpu.memory_space<vmem>>, vector<35x256xf32>
    %c3 = arith.constant 3 : index
    %c0_140 = arith.constant 0 : index
    %c0_141 = arith.constant 0 : index
    %c0_142 = arith.constant 0 : index
    %203 = vector.load %arg3[%c3, %c0_140, %c0_141, %c0_142] : memref<4x3x256x256xf32, #tpu.memory_space<vmem>>, vector<1x1x256x256xf32>
    %204 = vector.shape_cast %203 : vector<1x1x256x256xf32> to vector<256x256xf32>
    %cst_143 = arith.constant dense<0.000000e+00> : vector<35x256xf32>
    %205 = tpu.matmul %202, %204, %cst_143 {dimension_numbers = #tpu.dot_dimension_numbers<[1], [0], [0], [1], [0, 0, 1, 1], [], []>} : vector<35x256xf32>, vector<256x256xf32>, vector<35x256xf32> -> vector<35x256xf32>
    %c1_144 = arith.constant 1 : index
    %c0_145 = arith.constant 0 : index
    %206 = vector.load %arg7[%c1_144, %c0_145] : memref<37x256xf32, #tpu.memory_space<vmem>>, vector<35x256xf32>
    %c3_146 = arith.constant 3 : index
    %c1_147 = arith.constant 1 : index
    %c0_148 = arith.constant 0 : index
    %c0_149 = arith.constant 0 : index
    %207 = vector.load %arg3[%c3_146, %c1_147, %c0_148, %c0_149] : memref<4x3x256x256xf32, #tpu.memory_space<vmem>>, vector<1x1x256x256xf32>
    %208 = vector.shape_cast %207 : vector<1x1x256x256xf32> to vector<256x256xf32>
    %cst_150 = arith.constant dense<0.000000e+00> : vector<35x256xf32>
    %209 = tpu.matmul %206, %208, %cst_150 {dimension_numbers = #tpu.dot_dimension_numbers<[1], [0], [0], [1], [0, 0, 1, 1], [], []>} : vector<35x256xf32>, vector<256x256xf32>, vector<35x256xf32> -> vector<35x256xf32>
    %210 = arith.addf %205, %209 : vector<35x256xf32>
    %c2_151 = arith.constant 2 : index
    %c0_152 = arith.constant 0 : index
    %211 = vector.load %arg7[%c2_151, %c0_152] : memref<37x256xf32, #tpu.memory_space<vmem>>, vector<35x256xf32>
    %c3_153 = arith.constant 3 : index
    %c2_154 = arith.constant 2 : index
    %c0_155 = arith.constant 0 : index
    %c0_156 = arith.constant 0 : index
    %212 = vector.load %arg3[%c3_153, %c2_154, %c0_155, %c0_156] : memref<4x3x256x256xf32, #tpu.memory_space<vmem>>, vector<1x1x256x256xf32>
    %213 = vector.shape_cast %212 : vector<1x1x256x256xf32> to vector<256x256xf32>
    %cst_157 = arith.constant dense<0.000000e+00> : vector<35x256xf32>
    %214 = tpu.matmul %211, %213, %cst_157 {dimension_numbers = #tpu.dot_dimension_numbers<[1], [0], [0], [1], [0, 0, 1, 1], [], []>} : vector<35x256xf32>, vector<256x256xf32>, vector<35x256xf32> -> vector<35x256xf32>
    %215 = arith.addf %210, %214 : vector<35x256xf32>
    %c3_158 = arith.constant 3 : index
    %c0_159 = arith.constant 0 : index
    %216 = vector.load %arg4[%c3_158, %c0_159] : memref<4x256xf32, #tpu.memory_space<vmem>>, vector<1x256xf32>
    %217 = vector.shape_cast %216 : vector<1x256xf32> to vector<256xf32>
    %218 = vector.shape_cast %217 : vector<256xf32> to vector<1x256xf32>
    %219 = vector.broadcast %218 : vector<1x256xf32> to vector<35x256xf32>
    %220 = arith.addf %215, %219 : vector<35x256xf32>
    %221 = math.absf %220 : vector<35x256xf32>
    %cst_160 = arith.constant 0.707106769 : f32
    %222 = vector.broadcast %cst_160 : f32 to vector<35x256xf32>
    %223 = arith.mulf %221, %222 : vector<35x256xf32>
    %cst_161 = arith.constant 0.327591091 : f32
    %224 = vector.broadcast %cst_161 : f32 to vector<35x256xf32>
    %225 = arith.mulf %224, %223 : vector<35x256xf32>
    %cst_162 = arith.constant 1.000000e+00 : f32
    %226 = vector.broadcast %cst_162 : f32 to vector<35x256xf32>
    %227 = arith.addf %226, %225 : vector<35x256xf32>
    %cst_163 = arith.constant 1.000000e+00 : f32
    %228 = vector.broadcast %cst_163 : f32 to vector<35x256xf32>
    %229 = arith.divf %228, %227 : vector<35x256xf32>
    %cst_164 = arith.constant 1.06140542 : f32
    %230 = vector.broadcast %cst_164 : f32 to vector<35x256xf32>
    %231 = arith.mulf %229, %230 : vector<35x256xf32>
    %cst_165 = arith.constant -1.45315206 : f32
    %232 = vector.broadcast %cst_165 : f32 to vector<35x256xf32>
    %233 = arith.addf %232, %231 : vector<35x256xf32>
    %234 = arith.mulf %229, %233 : vector<35x256xf32>
    %cst_166 = arith.constant 1.42141378 : f32
    %235 = vector.broadcast %cst_166 : f32 to vector<35x256xf32>
    %236 = arith.addf %235, %234 : vector<35x256xf32>
    %237 = arith.mulf %229, %236 : vector<35x256xf32>
    %cst_167 = arith.constant -0.284496725 : f32
    %238 = vector.broadcast %cst_167 : f32 to vector<35x256xf32>
    %239 = arith.addf %238, %237 : vector<35x256xf32>
    %240 = arith.mulf %229, %239 : vector<35x256xf32>
    %cst_168 = arith.constant 0.254829586 : f32
    %241 = vector.broadcast %cst_168 : f32 to vector<35x256xf32>
    %242 = arith.addf %241, %240 : vector<35x256xf32>
    %243 = arith.mulf %229, %242 : vector<35x256xf32>
    %cst_169 = arith.constant 0.000000e+00 : f32
    %244 = vector.broadcast %cst_169 : f32 to vector<35x256xf32>
    %245 = arith.subf %244, %223 : vector<35x256xf32>
    %246 = arith.mulf %245, %223 : vector<35x256xf32>
    %247 = math.exp %246 : vector<35x256xf32>
    %248 = arith.mulf %243, %247 : vector<35x256xf32>
    %cst_170 = arith.constant 1.000000e+00 : f32
    %249 = vector.broadcast %cst_170 : f32 to vector<35x256xf32>
    %250 = arith.subf %249, %248 : vector<35x256xf32>
    %cst_171 = arith.constant 0.000000e+00 : f32
    %251 = vector.broadcast %cst_171 : f32 to vector<35x256xf32>
    %252 = arith.cmpf oge, %220, %251 : vector<35x256xf32>
    %cst_172 = arith.constant 0.000000e+00 : f32
    %253 = vector.broadcast %cst_172 : f32 to vector<35x256xf32>
    %254 = arith.subf %253, %250 : vector<35x256xf32>
    %255 = arith.select %252, %250, %254 : vector<35x256xi1>, vector<35x256xf32>
    %cst_173 = arith.constant 5.000000e-01 : f32
    %256 = vector.broadcast %cst_173 : f32 to vector<35x256xf32>
    %257 = arith.mulf %256, %220 : vector<35x256xf32>
    %cst_174 = arith.constant 1.000000e+00 : f32
    %258 = vector.broadcast %cst_174 : f32 to vector<35x256xf32>
    %259 = arith.addf %258, %255 : vector<35x256xf32>
    %260 = arith.mulf %257, %259 : vector<35x256xf32>
    %261 = vector.extract_strided_slice %260 {offsets = [0, 0], sizes = [17, 136], strides = [1, 1]} : vector<35x256xf32> to vector<17x136xf32>
    %c0_175 = arith.constant 0 : index
    %c0_176 = arith.constant 0 : index
    %c0_177 = arith.constant 0 : index
    %262 = vector.load %arg5[%c0_175, %c0_176, %c0_177] : memref<2x17x136xf32, #tpu.memory_space<vmem>>, vector<1x17x136xf32>
    %263 = vector.shape_cast %262 : vector<1x17x136xf32> to vector<17x136xf32>
    %264 = vector.shape_cast %261 : vector<17x136xf32> to vector<1x17x136xf32>
    tpu.vector_store %arg5[%c0_175, %c0_176, %c0_177], %264 {strides = array<i32>} : memref<2x17x136xf32, #tpu.memory_space<vmem>>, vector<1x17x136xf32>,
    %265 = vector.extract_strided_slice %260 {offsets = [18, 0], sizes = [17, 136], strides = [1, 1]} : vector<35x256xf32> to vector<17x136xf32>
    %c1_178 = arith.constant 1 : index
    %c0_179 = arith.constant 0 : index
    %c0_180 = arith.constant 0 : index
    %266 = vector.load %arg5[%c1_178, %c0_179, %c0_180] : memref<2x17x136xf32, #tpu.memory_space<vmem>>, vector<1x17x136xf32>
    %267 = vector.shape_cast %266 : vector<1x17x136xf32> to vector<17x136xf32>
    %268 = vector.shape_cast %265 : vector<17x136xf32> to vector<1x17x136xf32>
    tpu.vector_store %arg5[%c1_178, %c0_179, %c0_180], %268 {strides = array<i32>} : memref<2x17x136xf32, #tpu.memory_space<vmem>>, vector<1x17x136xf32>,
    return
  }
  func.func @transform_0(%arg0: i32) -> (i32, i32, i32) {
    %c0_i32 = arith.constant 0 : i32
    %c0_i32_0 = arith.constant 0 : i32
    %c0_i32_1 = arith.constant 0 : i32
    return %arg0, %c0_i32, %c0_i32_0 : i32, i32, i32
  }
  func.func @transform_1(%arg0: i32) -> (i32, i32) {
    %c0_i32 = arith.constant 0 : i32
    %c0_i32_0 = arith.constant 0 : i32
    %c0_i32_1 = arith.constant 0 : i32
    return %c0_i32, %c0_i32_0 : i32, i32
  }
  func.func @transform_2(%arg0: i32) -> (i32, i32, i32, i32) {
    %c0_i32 = arith.constant 0 : i32
    %c0_i32_0 = arith.constant 0 : i32
    %c0_i32_1 = arith.constant 0 : i32
    %c0_i32_2 = arith.constant 0 : i32
    %c0_i32_3 = arith.constant 0 : i32
    return %c0_i32, %c0_i32_0, %c0_i32_1, %c0_i32_2 : i32, i32, i32, i32
  }
  func.func @transform_3(%arg0: i32) -> (i32, i32) {
    %c0_i32 = arith.constant 0 : i32
    %c0_i32_0 = arith.constant 0 : i32
    %c0_i32_1 = arith.constant 0 : i32
    return %c0_i32, %c0_i32_0 : i32, i32
  }
  func.func @transform_4(%arg0: i32) -> (i32, i32, i32) {
    %c0_i32 = arith.constant 0 : i32
    %c0_i32_0 = arith.constant 0 : i32
    %c0_i32_1 = arith.constant 0 : i32
    return %arg0, %c0_i32, %c0_i32_0 : i32, i32, i32
  }
}

</mosaic_0001>

<bundles_post_ra>
// kernel: tile.28
= control target key start
LH: loop header
LB: loop body
LE: loop exit
PB: predicated region body
PF: predicated region fallthrough
CT: control target
= control target key end

     0   :  { %s34_s0 = inlined_call_operand.vmem [shape: f32[8], index: 0, kind: input, shape index: {}]   ;;  %s35_s1 = inlined_call_operand.vmem [shape: f32[17,8], index: 1, kind: output, shape index: {}]  }
   0x1   :  { %v4_v0 = vld [vmem:[%s34_s0] ss:$0 sm:$0xff] }
   0x2   :  { %5 = vst [vmem:[%s35_s1] sm:$0xff] %v4_v0  ;;  %10 = vst [vmem:[%s35_s1 + $0x8] sm:$0xff] %v4_v0 }
   0x3   :  { %11 = vst [vmem:[%s35_s1 + $0x10] sm:$0xff] %v4_v0 }

// kernel: tile.29
= control target key start
LH: loop header
LB: loop body
LE: loop exit
PB: predicated region body
PF: predicated region fallthrough
CT: control target
= control target key end

     0   :  { %s138_s10 = smov 120   ;;  %s139_s11 = smov 104   ;;  %vm4_vm0 = vcmask 64512   ;;  %vm10_vm1 = vcmask 1048512   ;;  %vm16_vm2 = vcmask 982912   ;;  %vm22_vm3 = vcmask 917312   ;;  %s217_s0 = inlined_call_operand.vmem [shape: f32[17,8], index: 0, kind: input, shape index: {}]   ;;  %s218_s1 = inlined_call_operand.vmem [shape: f32[1,136], index: 1, kind: output, shape index: {}]  }
   0x1   :  { %v107_v0 = vld [vmem:[%s217_s0 + $0xf] sm:$0x1]   ;;  %v109_v1 = vld [vmem:[%s217_s0 + $0xd] sm:$0x1]   ;;  %v108_v2 = vld [vmem:[%s217_s0 + $0xe] sm:$0x1]  }
   0x2   :  { %8 = vrot.lane.b32.xlu0 %v107_v0, %s138_s10  ;;  %20 = vrot.lane.b32.xlu1 %v109_v1, %s139_s11  ;;  %v110_v3 = vld [vmem:[%s217_s0 + $0xc] sm:$0x1]   ;;  %s140_s16 = smov 112   ;;  %s141_s17 = smov 96   ;;  %v111_v4 = vld [vmem:[%s217_s0 + $0xb] sm:$0x1]  }
   0x3   :  { %v112_v5 = vld [vmem:[%s217_s0 + $0xa] sm:$0x1]   ;;  %s2_s22 = smov 3  ;;  %s142_s25 = smov 88   ;;  %v113_v7 = vld [vmem:[%s217_s0 + $0x9] sm:$0x1]  }
   0x4   :  { %v3_v6 = vld [vmem:[%s217_s0] ss:$16 sm:%s2_s22]   ;;  %s143_s26 = smov 80   ;;  %v114_v8 = vld [vmem:[%s217_s0 + $0x8] sm:$0x1]   ;;  %s144_s2 = smov 72  }
   0x5   :  { %5 = vst.msk [vmem:[#allocation0] ss:$8 sm:$0x3] %vm4_vm0, %v3_v6   ;;  %s145_s3 = smov 64   ;;  %v115_v9 = vld [vmem:[%s217_s0 + $0x7] sm:$0x1]  }
   0x6   :  { %14 = vrot.lane.b32.xlu0 %v108_v2, %s140_s16  ;;  %26 = vrot.lane.b32.xlu1 %v110_v3, %s141_s17  ;;  %v116_v10 = vld [vmem:[%s217_s0 + $0x6] sm:$0x1]   ;;  %s146_s8 = smov 56   ;;  %s147_s9 = smov 48   ;;  %v117_v12 = vld [vmem:[%s217_s0 + $0x5] sm:$0x1]  }
   0x7   :  { %v118_v13 = vld [vmem:[%s217_s0 + $0x4] sm:$0x1]   ;;  %s148_s16 = smov 40   ;;  %s149_s17 = smov 32   ;;  %v119_v14 = vld [vmem:[%s217_s0 + $0x3] sm:$0x1]  }
   0x8   :  { %v120_v15 = vld [vmem:[%s217_s0 + $0x2] sm:$0x1]   ;;  %s150_s22 = smov 24   ;;  %s151_s23 = smov 16   ;;  %v121_v16 = vld [vmem:[%s217_s0 + $0x1] sm:$0x1]  }
   0x9   :  { %s152_s0 = smov 8   ;;  %vm28_vm4 = vcmask 851712   ;;  %vm34_vm5 = vcmask 786112   ;;  %vm40_vm6 = vcmask 720512   ;;  %vm46_vm7 = vcmask 654912  }
   0xa   :  { %32 = vrot.lane.b32.xlu0 %v111_v4, %s142_s25  ;;  %38 = vrot.lane.b32.xlu1 %v112_v5, %s143_s26  ;;  %vm52_vm8 = vcmask 589312   ;;  %vm58_vm9 = vcmask 523712   ;;  %vm64_vm10 = vcmask 458112   ;;  %vm70_vm11 = vcmask 392512  }
   0xb   :  { %vm76_vm12 = vcmask 326912   ;;  %vm82_vm13 = vcmask 261312   ;;  %vm88_vm14 = vcmask 195712   ;;  %vm94_vm15 = vcmask 130112  }
   0xc   :  { %v103_v11 = vld [vmem:[#allocation0 + $0x8] sm:$0x1] }
   0xd   :  { %122 = vst [vmem:[%s218_s1 + $0x1] sm:$0x1] %v103_v11 }
   0xe   :  { %44 = vrot.lane.b32.xlu0 %v113_v7, %s144_s2  ;;  %50 = vrot.lane.b32.xlu1 %v114_v8, %s145_s3 }
  0x12   :  { %56 = vrot.lane.b32.xlu0 %v115_v9, %s146_s8  ;;  %62 = vrot.lane.b32.xlu1 %v116_v10, %s147_s9 }
  0x16   :  { %68 = vrot.lane.b32.xlu0 %v117_v12, %s148_s16  ;;  %74 = vrot.lane.b32.xlu1 %v118_v13, %s149_s17 }
  0x1a   :  { %80 = vrot.lane.b32.xlu0 %v119_v14, %s150_s22  ;;  %86 = vrot.lane.b32.xlu1 %v120_v15, %s151_s23 }
  0x1e   :  { %92 = vrot.lane.b32.xlu0 %v121_v16, %s152_s0 }
  0x74   :  { %v9_v17 = vpop.permute.xlu0 %8   ;;  %v21_v18 = vpop.permute.xlu1 %20  }
  0x75   :  { %11 = vst.msk [vmem:[#allocation0] sm:$0x1] %vm10_vm1, %v9_v17  }
  0x78   :  { %v15_v19 = vpop.permute.xlu0 %14   ;;  %v27_v20 = vpop.permute.xlu1 %26  }
  0x79   :  { %17 = vst.msk [vmem:[#allocation0] sm:$0x1] %vm16_vm2, %v15_v19  }
  0x7a   :  { %23 = vst.msk [vmem:[#allocation0] sm:$0x1] %vm22_vm3, %v21_v18  }
  0x7b   :  { %29 = vst.msk [vmem:[#allocation0] sm:$0x1] %vm28_vm4, %v27_v20  }
  0x7c   :  { %v33_v21 = vpop.permute.xlu0 %32   ;;  %v39_v22 = vpop.permute.xlu1 %38  }
  0x7d   :  { %35 = vst.msk [vmem:[#allocation0] sm:$0x1] %vm34_vm5, %v33_v21  }
  0x7e   :  { %41 = vst.msk [vmem:[#allocation0] sm:$0x1] %vm40_vm6, %v39_v22  }
  0x80   :  { %v45_v23 = vpop.permute.xlu0 %44   ;;  %v51_v24 = vpop.permute.xlu1 %50  }
  0x81   :  { %47 = vst.msk [vmem:[#allocation0] sm:$0x1] %vm46_vm7, %v45_v23  }
  0x82   :  { %53 = vst.msk [vmem:[#allocation0] sm:$0x1] %vm52_vm8, %v51_v24  }
  0x84   :  { %v57_v25 = vpop.permute.xlu0 %56   ;;  %v63_v26 = vpop.permute.xlu1 %62  }
  0x85   :  { %59 = vst.msk [vmem:[#allocation0] sm:$0x1] %vm58_vm9, %v57_v25  }
  0x86   :  { %65 = vst.msk [vmem:[#allocation0] sm:$0x1] %vm64_vm10, %v63_v26  }
  0x88   :  { %v69_v27 = vpop.permute.xlu0 %68   ;;  %v75_v28 = vpop.permute.xlu1 %74  }
  0x89   :  { %71 = vst.msk [vmem:[#allocation0] sm:$0x1] %vm70_vm11, %v69_v27  }
  0x8a   :  { %77 = vst.msk [vmem:[#allocation0] sm:$0x1] %vm76_vm12, %v75_v28  }
  0x8c   :  { %v81_v29 = vpop.permute.xlu0 %80   ;;  %v87_v30 = vpop.permute.xlu1 %86  }
  0x8d   :  { %83 = vst.msk [vmem:[#allocation0] sm:$0x1] %vm82_vm13, %v81_v29  }
  0x8e   :  { %89 = vst.msk [vmem:[#allocation0] sm:$0x1] %vm88_vm14, %v87_v30  }
  0x90   :  { %v93_v31 = vpop.permute.xlu0 %92  }
  0x91   :  { %95 = vst.msk [vmem:[#allocation0] sm:$0x1] %vm94_vm15, %v93_v31  }
  0x98   :  { %v99_v32 = vld [vmem:[#allocation0] sm:$0x1] }
  0x99   :  { %101 = vst [vmem:[%s218_s1] sm:$0x1] %v99_v32 }

// kernel: tile.34
= control target key start
LH: loop header
LB: loop body
LE: loop exit
PB: predicated region body
PF: predicated region fallthrough
CT: control target
= control target key end

     0   :  { %s132_s10 = smov 120   ;;  %s133_s11 = smov 104   ;;  %vm4_vm0 = vcmask 64512   ;;  %vm10_vm1 = vcmask 1048512   ;;  %vm16_vm2 = vcmask 982912   ;;  %vm22_vm3 = vcmask 917312   ;;  %s208_s0 = inlined_call_operand.vmem [shape: f32[17,8], index: 0, kind: input, shape index: {}]   ;;  %s209_s1 = inlined_call_operand.vmem [shape: f32[136], index: 1, kind: output, shape index: {}]  }
   0x1   :  { %v102_v0 = vld [vmem:[%s208_s0 + $0xf] sm:$0x1]   ;;  %v104_v1 = vld [vmem:[%s208_s0 + $0xd] sm:$0x1]   ;;  %v103_v2 = vld [vmem:[%s208_s0 + $0xe] sm:$0x1]  }
   0x2   :  { %8 = vrot.lane.b32.xlu0 %v102_v0, %s132_s10  ;;  %20 = vrot.lane.b32.xlu1 %v104_v1, %s133_s11  ;;  %v105_v3 = vld [vmem:[%s208_s0 + $0xc] sm:$0x1]   ;;  %s134_s16 = smov 112   ;;  %s135_s17 = smov 96   ;;  %v106_v4 = vld [vmem:[%s208_s0 + $0xb] sm:$0x1]  }
   0x3   :  { %v107_v5 = vld [vmem:[%s208_s0 + $0xa] sm:$0x1]   ;;  %s2_s22 = smov 3  ;;  %s136_s25 = smov 88   ;;  %v108_v7 = vld [vmem:[%s208_s0 + $0x9] sm:$0x1]  }
   0x4   :  { %v3_v6 = vld [vmem:[%s208_s0] ss:$16 sm:%s2_s22]   ;;  %s137_s26 = smov 80   ;;  %v109_v8 = vld [vmem:[%s208_s0 + $0x8] sm:$0x1]   ;;  %s138_s2 = smov 72  }
   0x5   :  { %5 = vst.msk [vmem:[#allocation0] sm:$0x3] %vm4_vm0, %v3_v6   ;;  %s139_s3 = smov 64   ;;  %v110_v9 = vld [vmem:[%s208_s0 + $0x7] sm:$0x1]   ;;  %s140_s8 = smov 56  }
   0x6   :  { %14 = vrot.lane.b32.xlu0 %v103_v2, %s134_s16  ;;  %26 = vrot.lane.b32.xlu1 %v105_v3, %s135_s17  ;;  %v111_v10 = vld [vmem:[%s208_s0 + $0x6] sm:$0x1]   ;;  %s141_s9 = smov 48   ;;  %v112_v11 = vld [vmem:[%s208_s0 + $0x5] sm:$0x1]   ;;  %s142_s14 = smov 40  }
   0x7   :  { %v113_v12 = vld [vmem:[%s208_s0 + $0x4] sm:$0x1]   ;;  %s143_s15 = smov 32   ;;  %v114_v13 = vld [vmem:[%s208_s0 + $0x3] sm:$0x1]   ;;  %s144_s20 = smov 24  }
   0x8   :  { %v115_v14 = vld [vmem:[%s208_s0 + $0x2] sm:$0x1]   ;;  %s145_s21 = smov 16   ;;  %v116_v15 = vld [vmem:[%s208_s0 + $0x1] sm:$0x1]   ;;  %s146_s0 = smov 8  }
   0x9   :  { %vm28_vm4 = vcmask 851712   ;;  %vm34_vm5 = vcmask 786112   ;;  %vm40_vm6 = vcmask 720512   ;;  %vm46_vm7 = vcmask 654912  }
   0xa   :  { %32 = vrot.lane.b32.xlu0 %v106_v4, %s136_s25  ;;  %38 = vrot.lane.b32.xlu1 %v107_v5, %s137_s26  ;;  %vm52_vm8 = vcmask 589312   ;;  %vm58_vm9 = vcmask 523712   ;;  %vm64_vm10 = vcmask 458112   ;;  %vm70_vm11 = vcmask 392512  }
   0xb   :  { %vm76_vm12 = vcmask 326912   ;;  %vm82_vm13 = vcmask 261312   ;;  %vm88_vm14 = vcmask 195712   ;;  %vm94_vm15 = vcmask 130112  }
   0xe   :  { %44 = vrot.lane.b32.xlu0 %v108_v7, %s138_s2  ;;  %50 = vrot.lane.b32.xlu1 %v109_v8, %s139_s3 }
  0x12   :  { %56 = vrot.lane.b32.xlu0 %v110_v9, %s140_s8  ;;  %62 = vrot.lane.b32.xlu1 %v111_v10, %s141_s9 }
  0x16   :  { %68 = vrot.lane.b32.xlu0 %v112_v11, %s142_s14  ;;  %74 = vrot.lane.b32.xlu1 %v113_v12, %s143_s15 }
  0x1a   :  { %80 = vrot.lane.b32.xlu0 %v114_v13, %s144_s20  ;;  %86 = vrot.lane.b32.xlu1 %v115_v14, %s145_s21 }
  0x1e   :  { %92 = vrot.lane.b32.xlu0 %v116_v15, %s146_s0 }
  0x74   :  { %v9_v16 = vpop.permute.xlu0 %8   ;;  %v21_v17 = vpop.permute.xlu1 %20  }
  0x75   :  { %11 = vst.msk [vmem:[#allocation0] sm:$0x1] %vm10_vm1, %v9_v16  }
  0x78   :  { %v15_v18 = vpop.permute.xlu0 %14   ;;  %v27_v19 = vpop.permute.xlu1 %26  }
  0x79   :  { %17 = vst.msk [vmem:[#allocation0] sm:$0x1] %vm16_vm2, %v15_v18  }
  0x7a   :  { %23 = vst.msk [vmem:[#allocation0] sm:$0x1] %vm22_vm3, %v21_v17  }
  0x7b   :  { %29 = vst.msk [vmem:[#allocation0] sm:$0x1] %vm28_vm4, %v27_v19  }
  0x7c   :  { %v33_v20 = vpop.permute.xlu0 %32   ;;  %v39_v21 = vpop.permute.xlu1 %38  }
  0x7d   :  { %35 = vst.msk [vmem:[#allocation0] sm:$0x1] %vm34_vm5, %v33_v20  }
  0x7e   :  { %41 = vst.msk [vmem:[#allocation0] sm:$0x1] %vm40_vm6, %v39_v21  }
  0x80   :  { %v45_v22 = vpop.permute.xlu0 %44   ;;  %v51_v23 = vpop.permute.xlu1 %50  }
  0x81   :  { %47 = vst.msk [vmem:[#allocation0] sm:$0x1] %vm46_vm7, %v45_v22  }
  0x82   :  { %53 = vst.msk [vmem:[#allocation0] sm:$0x1] %vm52_vm8, %v51_v23  }
  0x84   :  { %v57_v24 = vpop.permute.xlu0 %56   ;;  %v63_v25 = vpop.permute.xlu1 %62  }
  0x85   :  { %59 = vst.msk [vmem:[#allocation0] sm:$0x1] %vm58_vm9, %v57_v24  }
  0x86   :  { %65 = vst.msk [vmem:[#allocation0] sm:$0x1] %vm64_vm10, %v63_v25  }
  0x88   :  { %v69_v26 = vpop.permute.xlu0 %68   ;;  %v75_v27 = vpop.permute.xlu1 %74  }
  0x89   :  { %71 = vst.msk [vmem:[#allocation0] sm:$0x1] %vm70_vm11, %v69_v26  }
  0x8a   :  { %77 = vst.msk [vmem:[#allocation0] sm:$0x1] %vm76_vm12, %v75_v27  }
  0x8c   :  { %v81_v28 = vpop.permute.xlu0 %80   ;;  %v87_v29 = vpop.permute.xlu1 %86  }
  0x8d   :  { %83 = vst.msk [vmem:[#allocation0] sm:$0x1] %vm82_vm13, %v81_v28  }
  0x8e   :  { %89 = vst.msk [vmem:[#allocation0] sm:$0x1] %vm88_vm14, %v87_v29  }
  0x90   :  { %v93_v30 = vpop.permute.xlu0 %92  }
  0x91   :  { %95 = vst.msk [vmem:[#allocation0] sm:$0x1] %vm94_vm15, %v93_v30  }
  0x98   :  { %v99_v31 = vld [vmem:[#allocation0] sm:$0x3] }
  0x99   :  { %101 = vst [vmem:[%s209_s1] sm:$0x3] %v99_v31 }

// kernel: unet_up1_forward.1
= control target key start
LH: loop header
LB: loop body
LE: loop exit
PB: predicated region body
PF: predicated region fallthrough
CT: control target
= control target key end

     0   :  { %s6192_s15 = smov 0   ;;  %s9782_s0 = inlined_call_operand.vmem [shape: f32[4,18,256], index: 0, kind: input, shape index: {}]   ;;  %s9783_s1 = inlined_call_operand.vmem [shape: f32[256,256], index: 1, kind: input, shape index: {}]   ;;  %s9784_s2 = inlined_call_operand.vmem [shape: f32[4,3,256,256], index: 2, kind: input, shape index: {}]   ;;  %s9785_s3 = inlined_call_operand.vmem [shape: f32[4,256], index: 3, kind: input, shape index: {}]   ;;  %s9786_s4 = inlined_call_operand.vmem [shape: f32[4,17,136], index: 4, kind: output, shape index: {}]  }
   0x1 LB: > { %s4282_s16 = sadd.s32 4294967295, %s6164_s15   ;;  %p4286_p0 = scmp.ge.s32.totalorder %s6164_s15, 1  ;;  %s6164_s15 = sphi %s6192_s15, %s14_s15  }
   0x2   : > { %p164_p1 = scmp.lt.s32.totalorder %s6164_s15, 3 }
   0x4   : > { %p165_p2 = pnand %p4286_p0, %p164_p1 }
   0x5   : > { %v218_v0 = vld [vmem:[%s9783_s1 + $0x8] sm:$0xff] (!%p165_p2)  ;;  %v220_v1 = vld [vmem:[%s9783_s1 + $0x18] sm:$0xff] (!%p165_p2)  ;;  %v217_v2 = vld [vmem:[%s9783_s1] sm:$0xff] (!%p165_p2)  ;;  %s4287_s11 = sshll.u32 (!%p165_p2), %s4282_s16, 1  ;;  %vm376_vm1 = vcmask (!%p165_p2), 1040384   ;;  %vm495_vm2 = vcmask (!%p165_p2), 1042432  }
   0x6   : > { %168 = sbr.rel (%p165_p2) target bundleno = 1967 (0x7af), region = 36  ;;  %v5012_v3 = vpack.c.bf16 (!%p165_p2), %v220_v1, %v218_v0  ;;  %v219_v4 = vld [vmem:[%s9783_s1 + $0x10] sm:$0xff] (!%p165_p2)  ;;  %v222_v5 = vld [vmem:[%s9783_s1 + $0x28] sm:$0xff] (!%p165_p2)  ;;  %v224_v6 = vld [vmem:[%s9783_s1 + $0x38] sm:$0xff] (!%p165_p2)  ;;  %p193_p3 = scmp.lt.s32.totalorder (!%p165_p2), %s4287_s11, 3  ;;  %vm682_vm3 = vcmask (!%p165_p2), 1046528  }
   0x7   : > { %v5014_v7 = vpack.c.bf16 (!%p165_p2), %v219_v4, %v217_v2  ;;  %v5016_v8 = vpack.c.bf16 (!%p165_p2), %v224_v6, %v222_v5  ;;  %v221_v9 = vld [vmem:[%s9783_s1 + $0x20] sm:$0xff] (!%p165_p2)  ;;  %v223_v10 = vld [vmem:[%s9783_s1 + $0x30] sm:$0xff] (!%p165_p2)  ;;  %v226_v11 = vld [vmem:[%s9783_s1 + $0x48] sm:$0xff] (!%p165_p2)  ;;  %vm974_vm4 = vcmask (!%p165_p2), 1045504  }
   0x8   : > { %5013 = vmatprep.subr.bf16.mxu0 (!%p165_p2), %v5012_v3  ;;  %5077 = vmatprep.subr.bf16.mxu1 (!%p165_p2), %v5012_v3  ;;  %v228_v12 = vld [vmem:[%s9783_s1 + $0x58] sm:$0xff] (!%p165_p2)  ;;  %v5018_v13 = vpack.c.bf16 (!%p165_p2), %v223_v10, %v221_v9  ;;  %v225_v15 = vld [vmem:[%s9783_s1 + $0x40] sm:$0xff] (!%p165_p2)  ;;  %v227_v16 = vld [vmem:[%s9783_s1 + $0x50] sm:$0xff] (!%p165_p2) }
   0x9   : > { %5015 = vmatpush1.bf16.msra.mxu0 (!%p165_p2), %v5014_v7  ;;  %5079 = vmatpush1.bf16.msra.mxu1 (!%p165_p2), %v5014_v7  ;;  %v5020_v14 = vpack.c.bf16 (!%p165_p2), %v228_v12, %v226_v11  ;;  %v230_v17 = vld [vmem:[%s9783_s1 + $0x68] sm:$0xff] (!%p165_p2)  ;;  %v232_v18 = vld [vmem:[%s9783_s1 + $0x78] sm:$0xff] (!%p165_p2)  ;;  %v5022_v19 = vpack.c.bf16 (!%p165_p2), %v227_v16, %v225_v15  ;;  %v229_v21 = vld [vmem:[%s9783_s1 + $0x60] sm:$0xff] (!%p165_p2) }
   0xa   : > { %5017 = vmatprep.subr.bf16.mxu0 (!%p165_p2), %v5016_v8  ;;  %5081 = vmatprep.subr.bf16.mxu1 (!%p165_p2), %v5016_v8  ;;  %v5024_v20 = vpack.c.bf16 (!%p165_p2), %v232_v18, %v230_v17  ;;  %v231_v22 = vld [vmem:[%s9783_s1 + $0x70] sm:$0xff] (!%p165_p2)  ;;  %v234_v23 = vld [vmem:[%s9783_s1 + $0x88] sm:$0xff] (!%p165_p2)  ;;  %v236_v24 = vld [vmem:[%s9783_s1 + $0x98] sm:$0xff] (!%p165_p2) }
   0xb   : > { %v5026_v25 = vpack.c.bf16 (!%p165_p2), %v231_v22, %v229_v21  ;;  %v5028_v26 = vpack.c.bf16 (!%p165_p2), %v236_v24, %v234_v23  ;;  %v233_v27 = vld [vmem:[%s9783_s1 + $0x80] sm:$0xff] (!%p165_p2)  ;;  %v235_v28 = vld [vmem:[%s9783_s1 + $0x90] sm:$0xff] (!%p165_p2)  ;;  %v238_v29 = vld [vmem:[%s9783_s1 + $0xa8] sm:$0xff] (!%p165_p2) }
   0xc   : > { %v240_v30 = vld [vmem:[%s9783_s1 + $0xb8] sm:$0xff] (!%p165_p2)  ;;  %v5030_v31 = vpack.c.bf16 (!%p165_p2), %v235_v28, %v233_v27  ;;  %v237_v33 = vld [vmem:[%s9783_s1 + $0xa0] sm:$0xff] (!%p165_p2)  ;;  %v239_v34 = vld [vmem:[%s9783_s1 + $0xb0] sm:$0xff] (!%p165_p2) }
   0xd   : > { %5019 = vmatpush1.bf16.msra.mxu0 %v5018_v13  ;;  %5083 = vmatpush1.bf16.msra.mxu1 %v5018_v13  ;;  %s9788_s11 = smov (!%p193_p3, %s4287_s11), 3  ;;  %v5032_v32 = vpack.c.bf16 %v240_v30, %v238_v29  ;;  %v242_v35 = vld [vmem:[%s9783_s1 + $0xc8] sm:$0xff]  ;;  %v244_v36 = vld [vmem:[%s9783_s1 + $0xd8] sm:$0xff]  ;;  %v5034_v37 = vpack.c.bf16 %v239_v34, %v237_v33  ;;  %v241_v39 = vld [vmem:[%s9783_s1 + $0xc0] sm:$0xff] }
   0xe   : > { %5021 = vmatprep.subr.bf16.mxu0 %v5020_v14  ;;  %5085 = vmatprep.subr.bf16.mxu1 %v5020_v14  ;;  %s5988_s12 = smul.u32 48, %s9788_s11  ;;  %v5036_v38 = vpack.c.bf16 %v244_v36, %v242_v35  ;;  %v243_v40 = vld [vmem:[%s9783_s1 + $0xd0] sm:$0xff]  ;;  %v246_v42 = vld [vmem:[%s9783_s1 + $0xe8] sm:$0xff]  ;;  %v248_v43 = vld [vmem:[%s9783_s1 + $0xf8] sm:$0xff] }
   0xf   : > { %v5038_v45 = vpack.c.bf16 %v243_v40, %v241_v39  ;;  %v5040_v46 = vpack.c.bf16 %v248_v43, %v246_v42  ;;  %v245_v47 = vld [vmem:[%s9783_s1 + $0xe0] sm:$0xff]  ;;  %v247_v48 = vld [vmem:[%s9783_s1 + $0xf0] sm:$0xff]  ;;  %v250_v49 = vld [vmem:[%s9783_s1 + $0x108] sm:$0xff] }
  0x10   : > { %s6286_s24 = scalar_lea.vmem %s9782_s0, %s5988_s12  ;;  %v252_v50 = vld [vmem:[%s9783_s1 + $0x118] sm:$0xff]  ;;  %v5042_v51 = vpack.c.bf16 %v247_v48, %v245_v47  ;;  %v249_v53 = vld [vmem:[%s9783_s1 + $0x100] sm:$0xff]  ;;  %v251_v54 = vld [vmem:[%s9783_s1 + $0x110] sm:$0xff]  ;;  %s9723_s19 = scalar_lea.vmem %s9786_s4, %s5988_s12 }
  0x11   : > { %5023 = vmatpush1.bf16.msra.mxu0 %v5022_v19  ;;  %5087 = vmatpush1.bf16.msra.mxu1 %v5022_v19  ;;  %v282_v41 = vld [vmem:[%s6286_s24 + $0x8] sm:$0xff]  ;;  %v4292_v44 = vld [vmem:[%s6286_s24 + $0x38] sm:$0xff]  ;;  %v5044_v52 = vpack.c.bf16 %v252_v50, %v250_v49  ;;  %v5046_v57 = vpack.c.bf16 %v251_v54, %v249_v53  ;;  %v253_v59 = vld [vmem:[%s9783_s1 + $0x120] sm:$0xff] }
  0x12   : > { %5025 = vmatprep.subr.bf16.mxu0 %v5024_v20  ;;  %5089 = vmatprep.subr.bf16.mxu1 %v5024_v20  ;;  %v254_v55 = vld [vmem:[%s9783_s1 + $0x128] sm:$0xff]  ;;  %v256_v56 = vld [vmem:[%s9783_s1 + $0x138] sm:$0xff]  ;;  %v255_v60 = vld [vmem:[%s9783_s1 + $0x130] sm:$0xff] }
  0x13   : > { %351 = vmatprep.mubr.f32.mxu0 %v282_v41  ;;  %470 = vmatprep.mubr.f32.mxu1 %v4292_v44  ;;  %v5048_v58 = vpack.c.bf16 %v256_v56, %v254_v55  ;;  %v258_v61 = vld [vmem:[%s9783_s1 + $0x148] sm:$0xff]  ;;  %v260_v62 = vld [vmem:[%s9783_s1 + $0x158] sm:$0xff]  ;;  %v5050_v63 = vpack.c.bf16 %v255_v60, %v253_v59  ;;  %v257_v1 = vld [vmem:[%s9783_s1 + $0x140] sm:$0xff] }
  0x14   : > { %v5052_v0 = vpack.c.bf16 %v260_v62, %v258_v61  ;;  %v259_v2 = vld [vmem:[%s9783_s1 + $0x150] sm:$0xff]  ;;  %v262_v3 = vld [vmem:[%s9783_s1 + $0x168] sm:$0xff]  ;;  %v264_v4 = vld [vmem:[%s9783_s1 + $0x178] sm:$0xff] }
  0x15   : > { %5027 = vmatpush1.bf16.msra.mxu0 %v5026_v25  ;;  %5091 = vmatpush1.bf16.msra.mxu1 %v5026_v25  ;;  %v5054_v5 = vpack.c.bf16 %v259_v2, %v257_v1  ;;  %v5056_v6 = vpack.c.bf16 %v264_v4, %v262_v3  ;;  %v261_v7 = vld [vmem:[%s9783_s1 + $0x160] sm:$0xff]  ;;  %v263_v8 = vld [vmem:[%s9783_s1 + $0x170] sm:$0xff]  ;;  %v266_v9 = vld [vmem:[%s9783_s1 + $0x188] sm:$0xff] }
  0x16   : > { %5029 = vmatprep.subr.bf16.mxu0 %v5028_v26  ;;  %5093 = vmatprep.subr.bf16.mxu1 %v5028_v26  ;;  %v268_v10 = vld [vmem:[%s9783_s1 + $0x198] sm:$0xff]  ;;  %v5058_v11 = vpack.c.bf16 %v263_v8, %v261_v7  ;;  %v265_v13 = vld [vmem:[%s9783_s1 + $0x180] sm:$0xff]  ;;  %v267_v14 = vld [vmem:[%s9783_s1 + $0x190] sm:$0xff] }
  0x17   : > { %v5060_v12 = vpack.c.bf16 %v268_v10, %v266_v9  ;;  %v270_v15 = vld [vmem:[%s9783_s1 + $0x1a8] sm:$0xff]  ;;  %v272_v16 = vld [vmem:[%s9783_s1 + $0x1b8] sm:$0xff]  ;;  %v5062_v17 = vpack.c.bf16 %v267_v14, %v265_v13  ;;  %v269_v19 = vld [vmem:[%s9783_s1 + $0x1a0] sm:$0xff] }
  0x18   : > { %v5064_v18 = vpack.c.bf16 %v272_v16, %v270_v15  ;;  %v271_v20 = vld [vmem:[%s9783_s1 + $0x1b0] sm:$0xff]  ;;  %v274_v21 = vld [vmem:[%s9783_s1 + $0x1c8] sm:$0xff]  ;;  %v276_v22 = vld [vmem:[%s9783_s1 + $0x1d8] sm:$0xff] }
  0x19   : > { %5031 = vmatpush1.bf16.msra.mxu0 %v5030_v31  ;;  %5095 = vmatpush1.bf16.msra.mxu1 %v5030_v31  ;;  %v5066_v23 = vpack.c.bf16 %v271_v20, %v269_v19  ;;  %v5068_v24 = vpack.c.bf16 %v276_v22, %v274_v21  ;;  %v273_v25 = vld [vmem:[%s9783_s1 + $0x1c0] sm:$0xff]  ;;  %v275_v26 = vld [vmem:[%s9783_s1 + $0x1d0] sm:$0xff]  ;;  %v278_v27 = vld [vmem:[%s9783_s1 + $0x1e8] sm:$0xff] }
  0x1a   : > { %5033 = vmatprep.subr.bf16.mxu0 %v5032_v32  ;;  %5097 = vmatprep.subr.bf16.mxu1 %v5032_v32  ;;  %v280_v28 = vld [vmem:[%s9783_s1 + $0x1f8] sm:$0xff]  ;;  %v5070_v29 = vpack.c.bf16 %v275_v26, %v273_v25  ;;  %v277_v31 = vld [vmem:[%s9783_s1 + $0x1e0] sm:$0xff]  ;;  %v279_v32 = vld [vmem:[%s9783_s1 + $0x1f0] sm:$0xff] }
  0x1b   : > { %v5072_v30 = vpack.c.bf16 %v280_v28, %v278_v27  ;;  %v4298_v33 = vld [vmem:[%s9784_s2 + $0x208] sm:$0xff]  ;;  %v4300_v34 = vld [vmem:[%s9784_s2 + $0x218] sm:$0xff]  ;;  %v5074_v35 = vpack.c.bf16 %v279_v32, %v277_v31  ;;  %v281_v41 = vld [vmem:[%s6286_s24] sm:$0xff] }
  0x1c   : > { %v5140_v36 = vpack.c.bf16 %v4300_v34, %v4298_v33  ;;  %v4302_v39 = vld [vmem:[%s9784_s2 + $0x228] sm:$0xff]  ;;  %v4304_v40 = vld [vmem:[%s9784_s2 + $0x238] sm:$0xff]  ;;  %v4291_v42 = vld [vmem:[%s6286_s24 + $0x30] sm:$0xff] }
  0x1d   : > { %5035 = vmatpush1.bf16.msra.mxu0 %v5034_v37  ;;  %5099 = vmatpush1.bf16.msra.mxu1 %v5034_v37  ;;  %v4297_v37 = vld [vmem:[%s9784_s2 + $0x200] sm:$0xff]  ;;  %v284_v43 = vld [vmem:[%s6286_s24 + $0x18] sm:$0xff]  ;;  %v4294_v44 = vld [vmem:[%s6286_s24 + $0x48] sm:$0xff] }
  0x1e   : > { %5037 = vmatprep.subr.bf16.mxu0 %v5036_v38  ;;  %5101 = vmatprep.subr.bf16.mxu1 %v5036_v38  ;;  %v4299_v38 = vld [vmem:[%s9784_s2 + $0x210] sm:$0xff]  ;;  %v4301_v47 = vld [vmem:[%s9784_s2 + $0x220] sm:$0xff]  ;;  %v4306_v49 = vld [vmem:[%s9784_s2 + $0x248] sm:$0xff] }
  0x1f   : > { %v4303_v48 = vld [vmem:[%s9784_s2 + $0x230] sm:$0xff]  ;;  %v4308_v50 = vld [vmem:[%s9784_s2 + $0x258] sm:$0xff]  ;;  %v286_v53 = vld [vmem:[%s6286_s24 + $0x28] sm:$0x3] }
  0x20   : > { %v4296_v54 = vld [vmem:[%s6286_s24 + $0x58] sm:$0x3]  ;;  %v5146_v55 = vpack.c.bf16 %v4303_v48, %v4301_v47  ;;  %v5148_v56 = vpack.c.bf16 %v4308_v50, %v4306_v49  ;;  %v4310_v59 = vld [vmem:[%s9784_s2 + $0x268] sm:$0xff]  ;;  %v285_v61 = vld [vmem:[%s6286_s24 + $0x20] sm:$0x3] }
  0x21   : > { %5039 = vmatpush1.bf16.msra.mxu0 %v5038_v45  ;;  %5103 = vmatpush1.bf16.msra.mxu1 %v5038_v45  ;;  %v5142_v45 = vpack.c.bf16 %v4299_v38, %v4297_v37  ;;  %v4312_v60 = vld [vmem:[%s9784_s2 + $0x278] sm:$0xff]  ;;  %v4295_v62 = vld [vmem:[%s6286_s24 + $0x50] sm:$0x3]  ;;  %v4309_v1 = vld [vmem:[%s9784_s2 + $0x260] sm:$0xff] }
  0x22   : > { %5041 = vmatprep.subr.bf16.mxu0 %v5040_v46  ;;  %5105 = vmatprep.subr.bf16.mxu1 %v5040_v46  ;;  %v5144_v46 = vpack.c.bf16 %v4304_v40, %v4302_v39  ;;  %v4311_v2 = vld [vmem:[%s9784_s2 + $0x270] sm:$0xff]  ;;  %v4314_v3 = vld [vmem:[%s9784_s2 + $0x288] sm:$0xff]  ;;  %v4316_v4 = vld [vmem:[%s9784_s2 + $0x298] sm:$0xff] }
  0x23   : > { %v4313_v7 = vld [vmem:[%s9784_s2 + $0x280] sm:$0xff]  ;;  %v4315_v8 = vld [vmem:[%s9784_s2 + $0x290] sm:$0xff]  ;;  %v4318_v9 = vld [vmem:[%s9784_s2 + $0x2a8] sm:$0xff] }
  0x24   : > { %v4320_v10 = vld [vmem:[%s9784_s2 + $0x2b8] sm:$0xff]  ;;  %v4317_v13 = vld [vmem:[%s9784_s2 + $0x2a0] sm:$0xff]  ;;  %v4319_v14 = vld [vmem:[%s9784_s2 + $0x2b0] sm:$0xff] }
  0x25   : > { %5043 = vmatpush1.bf16.msra.mxu0 %v5042_v51  ;;  %5107 = vmatpush1.bf16.msra.mxu1 %v5042_v51  ;;  %v283_v51 = vld [vmem:[%s6286_s24 + $0x10] sm:$0xff]  ;;  %v4322_v15 = vld [vmem:[%s9784_s2 + $0x2c8] sm:$0xff]  ;;  %v4324_v16 = vld [vmem:[%s9784_s2 + $0x2d8] sm:$0xff] }
  0x26   : > { %5045 = vmatprep.subr.bf16.mxu0 %v5044_v52  ;;  %5109 = vmatprep.subr.bf16.mxu1 %v5044_v52  ;;  %v4293_v52 = vld [vmem:[%s6286_s24 + $0x40] sm:$0xff]  ;;  %v4323_v20 = vld [vmem:[%s9784_s2 + $0x2d0] sm:$0xff]  ;;  %v4326_v21 = vld [vmem:[%s9784_s2 + $0x2e8] sm:$0xff] }
  0x27   : > { %v4321_v19 = vld [vmem:[%s9784_s2 + $0x2c0] sm:$0xff]  ;;  %v4328_v22 = vld [vmem:[%s9784_s2 + $0x2f8] sm:$0xff]  ;;  %v4327_v26 = vld [vmem:[%s9784_s2 + $0x2f0] sm:$0xff] }
  0x28   : > { %v4325_v25 = vld [vmem:[%s9784_s2 + $0x2e0] sm:$0xff]  ;;  %v4330_v27 = vld [vmem:[%s9784_s2 + $0x308] sm:$0xff]  ;;  %v4332_v28 = vld [vmem:[%s9784_s2 + $0x318] sm:$0xff] }
  0x29   : > { %5047 = vmatpush1.bf16.msra.mxu0 %v5046_v57  ;;  %5111 = vmatpush1.bf16.msra.mxu1 %v5046_v57  ;;  %v4305_v57 = vld [vmem:[%s9784_s2 + $0x240] sm:$0xff]  ;;  %v4331_v32 = vld [vmem:[%s9784_s2 + $0x310] sm:$0xff]  ;;  %v4334_v33 = vld [vmem:[%s9784_s2 + $0x328] sm:$0xff] }
  0x2a   : > { %5049 = vmatprep.subr.bf16.mxu0 %v5048_v58  ;;  %5113 = vmatprep.subr.bf16.mxu1 %v5048_v58  ;;  %v4307_v58 = vld [vmem:[%s9784_s2 + $0x250] sm:$0xff]  ;;  %v4329_v31 = vld [vmem:[%s9784_s2 + $0x300] sm:$0xff]  ;;  %v4336_v34 = vld [vmem:[%s9784_s2 + $0x338] sm:$0xff] }
  0x2b   : > { %v4333_v37 = vld [vmem:[%s9784_s2 + $0x320] sm:$0xff]  ;;  %v4335_v38 = vld [vmem:[%s9784_s2 + $0x330] sm:$0xff]  ;;  %v4338_v39 = vld [vmem:[%s9784_s2 + $0x348] sm:$0xff] }
  0x2c   : > { %v4340_v40 = vld [vmem:[%s9784_s2 + $0x358] sm:$0xff]  ;;  %v4341_v49 = vld [vmem:[%s9784_s2 + $0x360] sm:$0xff]  ;;  %v4343_v50 = vld [vmem:[%s9784_s2 + $0x370] sm:$0xff] }
  0x2d   : > { %5051 = vmatpush1.bf16.msra.mxu0 %v5050_v63  ;;  %5115 = vmatpush1.bf16.msra.mxu1 %v5050_v63  ;;  %v5150_v63 = vpack.c.bf16 %v4307_v58, %v4305_v57  ;;  %v4344_v47 = vld [vmem:[%s9784_s2 + $0x378] sm:$0xff]  ;;  %v4350_v58 = vld [vmem:[%s9784_s2 + $0x3a8] sm:$0xff] }
  0x2e   : > { %5053 = vmatprep.subr.bf16.mxu0 %v5052_v0  ;;  %5117 = vmatprep.subr.bf16.mxu1 %v5052_v0  ;;  %v5152_v0 = vpack.c.bf16 %v4312_v60, %v4310_v59  ;;  %v4352_v59 = vld [vmem:[%s9784_s2 + $0x3b8] sm:$0xff] }
  0x2f   : > { %v5192_v60 = vpack.c.bf16 %v4352_v59, %v4350_v58 }
  0x31   : > { %5055 = vmatpush1.bf16.msra.mxu0 %v5054_v5  ;;  %5119 = vmatpush1.bf16.msra.mxu1 %v5054_v5  ;;  %v5154_v5 = vpack.c.bf16 %v4311_v2, %v4309_v1  ;;  %v4354_v1 = vld [vmem:[%s9784_s2 + $0x3c8] sm:$0xff]  ;;  %v4356_v2 = vld [vmem:[%s9784_s2 + $0x3d8] sm:$0xff] }
  0x32   : > { %5057 = vmatprep.subr.bf16.mxu0 %v5056_v6  ;;  %5121 = vmatprep.subr.bf16.mxu1 %v5056_v6  ;;  %v5156_v6 = vpack.c.bf16 %v4316_v4, %v4314_v3  ;;  %v5196_v3 = vpack.c.bf16 %v4356_v2, %v4354_v1  ;;  %v4353_v4 = vld [vmem:[%s9784_s2 + $0x3c0] sm:$0xff]  ;;  %v548_v2 = vld [vmem:[%s9784_s2 + $0x48] sm:$0xff] }
  0x35   : > { %5059 = vmatpush1.bf16.msra.mxu0 %v5058_v11  ;;  %5123 = vmatpush1.bf16.msra.mxu1 %v5058_v11  ;;  %v5158_v11 = vpack.c.bf16 %v4315_v8, %v4313_v7  ;;  %v4358_v8 = vld [vmem:[%s9784_s2 + $0x3e8] sm:$0xff] }
  0x36   : > { %5061 = vmatprep.subr.bf16.mxu0 %v5060_v12  ;;  %5125 = vmatprep.subr.bf16.mxu1 %v5060_v12  ;;  %v5160_v12 = vpack.c.bf16 %v4320_v10, %v4318_v9  ;;  %v4360_v9 = vld [vmem:[%s9784_s2 + $0x3f8] sm:$0xff] }
  0x37   : > { %v5200_v10 = vpack.c.bf16 %v4360_v9, %v4358_v8  ;;  %v549_v8 = vld [vmem:[%s9784_s2 + $0x50] sm:$0xff]  ;;  %v552_v9 = vld [vmem:[%s9784_s2 + $0x68] sm:$0xff] }
  0x39   : > { %5063 = vmatpush1.bf16.msra.mxu0 %v5062_v17  ;;  %5127 = vmatpush1.bf16.msra.mxu1 %v5062_v17  ;;  %v5162_v17 = vpack.c.bf16 %v4319_v14, %v4317_v13  ;;  %v540_v14 = vld [vmem:[%s9784_s2 + $0x8] sm:$0xff] }
  0x3a   : > { %5065 = vmatprep.subr.bf16.mxu0 %v5064_v18  ;;  %5129 = vmatprep.subr.bf16.mxu1 %v5064_v18  ;;  %v5164_v18 = vpack.c.bf16 %v4324_v16, %v4322_v15  ;;  %v542_v15 = vld [vmem:[%s9784_s2 + $0x18] sm:$0xff] }
  0x3b   : > { %v5204_v16 = vpack.c.bf16 %v542_v15, %v540_v14 }
  0x3d   : > { %5067 = vmatpush1.bf16.msra.mxu0 %v5066_v23  ;;  %5131 = vmatpush1.bf16.msra.mxu1 %v5066_v23  ;;  %v5166_v23 = vpack.c.bf16 %v4323_v20, %v4321_v19 }
  0x3e   : > { %5069 = vmatprep.subr.bf16.mxu0 %v5068_v24  ;;  %5133 = vmatprep.subr.bf16.mxu1 %v5068_v24  ;;  %v5168_v24 = vpack.c.bf16 %v4328_v22, %v4326_v21 }
  0x41   : > { %5071 = vmatpush1.bf16.msra.mxu0 %v5070_v29  ;;  %5135 = vmatpush1.bf16.msra.mxu1 %v5070_v29  ;;  %v5170_v29 = vpack.c.bf16 %v4327_v26, %v4325_v25 }
  0x42   : > { %5073 = vmatprep.subr.bf16.mxu0 %v5072_v30  ;;  %5137 = vmatprep.subr.bf16.mxu1 %v5072_v30  ;;  %v5172_v30 = vpack.c.bf16 %v4332_v28, %v4330_v27 }
  0x45   : > { %5075 = vmatpush1.bf16.msra.mxu0 %v5074_v35  ;;  %5139 = vmatpush1.bf16.msra.mxu1 %v5074_v35  ;;  %v5174_v35 = vpack.c.bf16 %v4331_v32, %v4329_v31 }
  0x46   : > { %5141 = vmatprep.subr.bf16.mxu0 %v5140_v36  ;;  %v5176_v36 = vpack.c.bf16 %v4336_v34, %v4334_v33 }
  0x48   : > { %352 = vmatmul.mubr.f32.vlgmr.msra.gmra.mrb[0].mxu0 %v281_v41  ;;  %471 = vmatmul.mubr.f32.vlgmr.msra.gmra.mrb[0].mxu1 %v4291_v42  ;;  %v5178_v41 = vpack.c.bf16 %v4335_v38, %v4333_v37  ;;  %v5180_v42 = vpack.c.bf16 %v4340_v40, %v4338_v39 }
  0x49   : > { %357 = vmatprep.mubr.f32.mxu0 %v284_v43  ;;  %476 = vmatprep.mubr.f32.mxu1 %v4294_v44  ;;  %v4337_v43 = vld [vmem:[%s9784_s2 + $0x340] sm:$0xff]  ;;  %v4339_v44 = vld [vmem:[%s9784_s2 + $0x350] sm:$0xff] }
  0x4a   : > { %5143 = vmatpush1.bf16.msra.mxu0 %v5142_v45  ;;  %v5182_v45 = vpack.c.bf16 %v4339_v44, %v4337_v43 }
  0x4b   : > { %5145 = vmatprep.subr.bf16.mxu0 %v5144_v46  ;;  %v4342_v46 = vld [vmem:[%s9784_s2 + $0x368] sm:$0xff] }
  0x4c   : > { %358 = vmatmul.mubr.f32.gmra.mrb[2].mxu0 %v283_v51  ;;  %477 = vmatmul.mubr.f32.gmra.mrb[2].mxu1 %v4293_v52  ;;  %v5184_v48 = vpack.c.bf16 %v4344_v47, %v4342_v46  ;;  %v5186_v51 = vpack.c.bf16 %v4343_v50, %v4341_v49  ;;  %v4346_v52 = vld [vmem:[%s9784_s2 + $0x388] sm:$0xff]  ;;  %v539_v46 = vld [vmem:[%s9784_s2] sm:$0xff]  ;;  %v541_v47 = vld [vmem:[%s9784_s2 + $0x10] sm:$0xff] }
  0x4d   : > { %363 = vmatprep.mubr.f32.mxu0 %v286_v53  ;;  %482 = vmatprep.mubr.f32.mxu1 %v4296_v54  ;;  %v4348_v53 = vld [vmem:[%s9784_s2 + $0x398] sm:$0xff]  ;;  %v5206_v59 = vpack.c.bf16 %v541_v47, %v539_v46  ;;  %v564_v46 = vld [vmem:[%s9784_s2 + $0xc8] sm:$0xff] }
  0x4e   : > { %5147 = vmatpush1.bf16.msra.mxu0 %v5146_v55  ;;  %v5188_v54 = vpack.c.bf16 %v4348_v53, %v4346_v52  ;;  %v4345_v55 = vld [vmem:[%s9784_s2 + $0x380] sm:$0xff]  ;;  %v544_v52 = vld [vmem:[%s9784_s2 + $0x28] sm:$0xff]  ;;  %v546_v53 = vld [vmem:[%s9784_s2 + $0x38] sm:$0xff] }
  0x4f   : > { %5149 = vmatprep.subr.bf16.mxu0 %v5148_v56  ;;  %v4347_v56 = vld [vmem:[%s9784_s2 + $0x390] sm:$0xff]  ;;  %v566_v47 = vld [vmem:[%s9784_s2 + $0xd8] sm:$0xff] }
  0x50   : > { %364 = vmatmul.mubr.f32.gmra.mrb[4].mxu0 %v285_v61  ;;  %483 = vmatmul.mubr.f32.gmra.mrb[4].mxu1 %v4295_v62  ;;  %v5190_v57 = vpack.c.bf16 %v4347_v56, %v4345_v55  ;;  %v4349_v61 = vld [vmem:[%s9784_s2 + $0x3a0] sm:$0xff]  ;;  %v4351_v62 = vld [vmem:[%s9784_s2 + $0x3b0] sm:$0xff] }
  0x52   : > { %5151 = vmatpush1.bf16.msra.mxu0 %v5150_v63  ;;  %v5194_v63 = vpack.c.bf16 %v4351_v62, %v4349_v61  ;;  %v5208_v61 = vpack.c.bf16 %v546_v53, %v544_v52  ;;  %v543_v62 = vld [vmem:[%s9784_s2 + $0x20] sm:$0xff]  ;;  %v568_v52 = vld [vmem:[%s9784_s2 + $0xe8] sm:$0xff]  ;;  %v570_v53 = vld [vmem:[%s9784_s2 + $0xf8] sm:$0xff] }
  0x53   : > { %5153 = vmatprep.subr.bf16.mxu0 %v5152_v0  ;;  %v206_v0 = vlaneseq }
  0x55   : > { %vm208_vm0 = vcmp.lt.s32.totalorder %v206_v0, 256 }
  0x56   : > { %5155 = vmatpush1.bf16.msra.mxu0 %v5154_v5  ;;  %v4355_v5 = vld [vmem:[%s9784_s2 + $0x3d0] sm:$0xff] }
  0x57   : > { %5157 = vmatprep.subr.bf16.mxu0 %v5156_v6  ;;  %v6166_v6 = vmov 0.0   ;;  %v5198_v7 = vpack.c.bf16 %v4355_v5, %v4353_v4 }
  0x58   : > { %210 = vst.msk [vmem:[#allocation2] ss:$8 sm:$0x3] %vm208_vm0, %v6166_v6  ;;  %215 = vst.msk [vmem:[#allocation3 + $0x44] ss:$8 sm:$0x3] %vm208_vm0, %v6166_v6 }
  0x59   : > { %212 = vst.msk [vmem:[#allocation3] ss:$8 sm:$0x3] %vm208_vm0, %v6166_v6  ;;  %v547_v6 = vld [vmem:[%s9784_s2 + $0x40] sm:$0xff] }
  0x5a   : > { %5159 = vmatpush1.bf16.msra.mxu0 %v5158_v11  ;;  %v4357_v11 = vld [vmem:[%s9784_s2 + $0x3e0] sm:$0xff] }
  0x5b   : > { %5161 = vmatprep.subr.bf16.mxu0 %v5160_v12  ;;  %v4359_v12 = vld [vmem:[%s9784_s2 + $0x3f0] sm:$0xff] }
  0x5c   : > { %v5202_v13 = vpack.c.bf16 %v4359_v12, %v4357_v11 }
  0x5e   : > { %5163 = vmatpush1.bf16.msra.mxu0 %v5162_v17 }
  0x5f   : > { %5165 = vmatprep.subr.bf16.mxu0 %v5164_v18 }
  0x62   : > { %5167 = vmatpush1.bf16.msra.mxu0 %v5166_v23 }
  0x63   : > { %5169 = vmatprep.subr.bf16.mxu0 %v5168_v24 }
  0x66   : > { %5171 = vmatpush1.bf16.msra.mxu0 %v5170_v29 }
  0x67   : > { %5173 = vmatprep.subr.bf16.mxu0 %v5172_v30 }
  0x6a   : > { %5175 = vmatpush1.bf16.msra.mxu0 %v5174_v35 }
  0x6b   : > { %5177 = vmatprep.subr.bf16.mxu0 %v5176_v36 }
  0x6e   : > { %5179 = vmatpush1.bf16.msra.mxu0 %v5178_v41 }
  0x6f   : > { %5181 = vmatprep.subr.bf16.mxu0 %v5180_v42 }
  0x72   : > { %5183 = vmatpush1.bf16.msra.mxu0 %v5182_v45 }
  0x73   : > { %5185 = vmatprep.subr.bf16.mxu0 %v5184_v48 }
  0x76   : > { %5187 = vmatpush1.bf16.msra.mxu0 %v5186_v51 }
  0x77   : > { %5189 = vmatprep.subr.bf16.mxu0 %v5188_v54 }
  0x7a   : > { %5191 = vmatpush1.bf16.msra.mxu0 %v5190_v57 }
  0x7b   : > { %5193 = vmatprep.subr.bf16.mxu0 %v5192_v60 }
  0x7e   : > { %5195 = vmatpush1.bf16.msra.mxu0 %v5194_v63  ;;  %v545_v63 = vld [vmem:[%s9784_s2 + $0x30] sm:$0xff] }
  0x7f   : > { %5197 = vmatprep.subr.bf16.mxu0 %v5196_v3  ;;  %v550_v3 = vld [vmem:[%s9784_s2 + $0x58] sm:$0xff]  ;;  %v5210_v4 = vpack.c.bf16 %v545_v63, %v543_v62  ;;  %v571_v63 = vld [vmem:[%s9784_s2 + $0x100] sm:$0xff] }
  0x80   : > { %v5212_v5 = vpack.c.bf16 %v550_v3, %v548_v2  ;;  %v576_v2 = vld [vmem:[%s9784_s2 + $0x128] sm:$0xff]  ;;  %v578_v3 = vld [vmem:[%s9784_s2 + $0x138] sm:$0xff] }
  0x82   : > { %5199 = vmatpush1.bf16.msra.mxu0 %v5198_v7 }
  0x83   : > { %5201 = vmatprep.subr.bf16.mxu0 %v5200_v10 }
  0x86   : > { %5203 = vmatpush1.bf16.msra.mxu0 %v5202_v13  ;;  %v554_v13 = vld [vmem:[%s9784_s2 + $0x78] sm:$0xff] }
  0x87   : > { %5205 = vmatprep.subr.bf16.mxu0 %v5204_v16  ;;  %v5214_v16 = vpack.c.bf16 %v549_v8, %v547_v6  ;;  %v575_v6 = vld [vmem:[%s9784_s2 + $0x120] sm:$0xff]  ;;  %v577_v8 = vld [vmem:[%s9784_s2 + $0x130] sm:$0xff] }
 0x11b   : > { %v353_v17 = vpop.f32.mrb[0].mxu0  ;;  %v472_v18 = vpop.f32.mrb[0].mxu1 }
 0x11c   : > { %v377_v19 = vrot.slane %v353_v17, 7  ;;  %v355_v20 = vpop.f32.mrb[1].mxu0  ;;  %v496_v21 = vrot.slane %v472_v18, 5  ;;  %v474_v22 = vpop.f32.mrb[1].mxu1 }
 0x11d   : > { %v378_v23 = vrot.slane %v355_v20, 7  ;;  %v497_v24 = vrot.slane %v474_v22, 5  ;;  %v553_v22 = vld [vmem:[%s9784_s2 + $0x70] sm:$0xff] }
 0x11e   : > { %393 = vst [vmem:[#allocation2] sm:$0xfe] %v377_v19  ;;  %512 = vst [vmem:[#allocation2 + $0x20] sm:$0xf8] %v496_v21 }
 0x11f   : > { %394 = vst [vmem:[#allocation2 + $0x8] sm:$0xfe] %v378_v23  ;;  %v359_v25 = vpop.f32.mrb[2].mxu0  ;;  %513 = vst [vmem:[#allocation2 + $0x28] sm:$0xf8] %v497_v24  ;;  %v478_v26 = vpop.f32.mrb[2].mxu1 }
 0x120   : > { %v379_v27 = vrot.slane %v359_v25, 7  ;;  %v361_v28 = vpop.f32.mrb[3].mxu0  ;;  %v498_v29 = vrot.slane %v478_v26, 5  ;;  %v480_v30 = vpop.f32.mrb[3].mxu1  ;;  %v556_v25 = vld [vmem:[%s9784_s2 + $0x88] sm:$0xff]  ;;  %v558_v26 = vld [vmem:[%s9784_s2 + $0x98] sm:$0xff] }
 0x121   : > { %v381_v31 = vrot.slane %v361_v28, 7  ;;  %v500_v32 = vrot.slane %v480_v30, 5 }
 0x122   : > { %v6614_v33 = vsel %vm376_vm1, %v377_v19, %v379_v27  ;;  %v6617_v34 = vsel %vm495_vm2, %v496_v21, %v498_v29  ;;  %v5216_v19 = vpack.c.bf16 %v554_v13, %v552_v9  ;;  %v551_v21 = vld [vmem:[%s9784_s2 + $0x60] sm:$0xff]  ;;  %v580_v9 = vld [vmem:[%s9784_s2 + $0x148] sm:$0xff] }
 0x123   : > { %v6620_v35 = vsel %vm376_vm1, %v378_v23, %v381_v31  ;;  %v365_v36 = vpop.f32.mrb[4].mxu0  ;;  %v6623_v37 = vsel %vm495_vm2, %v497_v24, %v500_v32  ;;  %v484_v38 = vpop.f32.mrb[4].mxu1  ;;  %v684_v58 = vrot.slane %v6614_v33, 1  ;;  %v693_v24 = vrot.slane %v6617_v34, 1 }
 0x124   : > { %v383_v39 = vrot.slane %v365_v36, 7  ;;  %v367_v40 = vpop.f32.mrb[5].mxu0  ;;  %v502_v41 = vrot.slane %v484_v38, 5  ;;  %v486_v42 = vpop.f32.mrb[5].mxu1  ;;  %v687_v57 = vrot.slane %v6620_v35, 1  ;;  %v695_v15 = vrot.slane %v6623_v37, 1 }
 0x125   : > { %v385_v43 = vrot.slane %v367_v40, 7  ;;  %v504_v44 = vrot.slane %v486_v42, 5  ;;  %v603_v45 = vld [vmem:[#allocation2] sm:$0xfe]  ;;  %v557_v36 = vld [vmem:[%s9784_s2 + $0x90] sm:$0xff]  ;;  %v562_v40 = vld [vmem:[%s9784_s2 + $0xb8] sm:$0xff] }
 0x126   : > { %v384_v48 = vsel %vm376_vm1, %v379_v27, %v383_v39  ;;  %v503_v49 = vsel %vm495_vm2, %v498_v29, %v502_v41  ;;  %v604_v50 = vld [vmem:[#allocation2 + $0x8] sm:$0xfe]  ;;  %v683_v51 = vrot.slane %v603_v45, 1  ;;  %v5218_v29 = vpack.c.bf16 %v553_v22, %v551_v21  ;;  %v561_v45 = vld [vmem:[%s9784_s2 + $0xb0] sm:$0xff] }
 0x127   : > { %397 = vst [vmem:[#allocation2 + $0x20] sm:$0x7] %v384_v48  ;;  %v386_v54 = vsel %vm376_vm1, %v381_v31, %v385_v43  ;;  %516 = vst [vmem:[#allocation2 + $0x40] sm:$0x1f] %v503_v49  ;;  %v505_v55 = vsel %vm495_vm2, %v500_v32, %v504_v44  ;;  %v686_v56 = vrot.slane %v604_v50, 1  ;;  %v5220_v31 = vpack.c.bf16 %v558_v26, %v556_v25  ;;  %v555_v32 = vld [vmem:[%s9784_s2 + $0x80] sm:$0xff] }
 0x128   : > { %398 = vst [vmem:[#allocation2 + $0x28] sm:$0x7] %v386_v54  ;;  %517 = vst [vmem:[#allocation2 + $0x48] sm:$0x1f] %v505_v55  ;;  %v685_v1 = vsel %vm682_vm3, %v683_v51, %v684_v58  ;;  %v560_v39 = vld [vmem:[%s9784_s2 + $0xa8] sm:$0xff]  ;;  %v5222_v42 = vpack.c.bf16 %v557_v36, %v555_v32  ;;  %v559_v44 = vld [vmem:[%s9784_s2 + $0xa0] sm:$0xff]  ;;  %v5228_v49 = vpack.c.bf16 %v566_v47, %v564_v46 }
 0x129   : > { %v688_v60 = vsel %vm682_vm3, %v686_v56, %v687_v57  ;;  %v5224_v43 = vpack.c.bf16 %v562_v40, %v560_v39  ;;  %v5226_v48 = vpack.c.bf16 %v561_v45, %v559_v44  ;;  %v563_v50 = vld [vmem:[%s9784_s2 + $0xc0] sm:$0xff]  ;;  %v565_v51 = vld [vmem:[%s9784_s2 + $0xd0] sm:$0xff]  ;;  %v530_v54 = vld [vmem:[#allocation2 + $0x8] sm:$0xff]  ;;  %v5232_v56 = vpack.c.bf16 %v570_v53, %v568_v52 }
 0x12a   : > { %775 = vmatprep.mubr.f32.mxu0 %v688_v60  ;;  %v5230_v55 = vpack.c.bf16 %v565_v51, %v563_v50  ;;  %v574_v60 = vld [vmem:[%s9784_s2 + $0x118] sm:$0xff]  ;;  %v585_v21 = vld [vmem:[%s9784_s2 + $0x170] sm:$0xff]  ;;  %v588_v22 = vld [vmem:[%s9784_s2 + $0x188] sm:$0xff] }
 0x12b   : > { %776 = vmatmul.mubr.f32.vlgmr.msra.gmra.mrb[6].mxu0 %v685_v1  ;;  %v573_v1 = vld [vmem:[%s9784_s2 + $0x110] sm:$0xff]  ;;  %v587_v26 = vld [vmem:[%s9784_s2 + $0x180] sm:$0xff]  ;;  %v598_v39 = vld [vmem:[%s9784_s2 + $0x1d8] sm:$0xff] }
 0x12c   : > { %5207 = vmatpush1.bf16.msra.mxu0 %v5206_v59  ;;  %v572_v59 = vld [vmem:[%s9784_s2 + $0x108] sm:$0xff]  ;;  %v591_v32 = vld [vmem:[%s9784_s2 + $0x1a0] sm:$0xff]  ;;  %v593_v36 = vld [vmem:[%s9784_s2 + $0x1b0] sm:$0xff] }
 0x12d   : > { %5209 = vmatprep.subr.bf16.mxu0 %v5208_v61  ;;  %v5236_v62 = vpack.c.bf16 %v574_v60, %v572_v59  ;;  %v5258_v40 = vpack.c.bf16 %v593_v36, %v591_v32  ;;  %v600_v44 = vld [vmem:[%s9784_s2 + $0x1e8] sm:$0xff]  ;;  %v602_v45 = vld [vmem:[%s9784_s2 + $0x1f8] sm:$0xff]  ;;  %v4365_v60 = vld [vmem:[%s9784_s2 + $0x420] sm:$0xff] }
 0x12e   : > { %v6660_v7 = vld [vmem:[#allocation2 + $0x20] sm:$0xff]  ;;  %v5264_v47 = vpack.c.bf16 %v602_v45, %v600_v44  ;;  %v4362_v50 = vld [vmem:[%s9784_s2 + $0x408] sm:$0xff]  ;;  %v4364_v51 = vld [vmem:[%s9784_s2 + $0x418] sm:$0xff] }
 0x12f   : > { %v6668_v10 = vld [vmem:[#allocation2 + $0x28] sm:$0xff]  ;;  %v689_v11 = vrot.slane %v6660_v7, 1  ;;  %v605_v20 = vld [vmem:[#allocation2 + $0x40] sm:$0xf]  ;;  %v5268_v53 = vpack.c.bf16 %v4364_v51, %v4362_v50  ;;  %v4388_v32 = vld [vmem:[%s9784_s2 + $0x4d8] sm:$0xff] }
 0x130   : > { %v606_v12 = vld [vmem:[#allocation2 + $0x48] sm:$0xf]  ;;  %v691_v14 = vrot.slane %v6668_v10, 1  ;;  %5211 = vmatpush1.bf16.msra.mxu0 %v5210_v4  ;;  %v697_v28 = vrot.slane %v605_v20, 1  ;;  %v5238_v4 = vpack.c.bf16 %v573_v1, %v571_v63  ;;  %v583_v20 = vld [vmem:[%s9784_s2 + $0x160] sm:$0xff]  ;;  %v4372_v1 = vld [vmem:[%s9784_s2 + $0x458] sm:$0xff] }
 0x131   : > { %5213 = vmatprep.subr.bf16.mxu0 %v5212_v5  ;;  %v699_v18 = vrot.slane %v606_v12, 1  ;;  %v690_v23 = vsel %vm682_vm3, %v684_v58, %v689_v11  ;;  %v694_v38 = vsel %vm682_vm3, %v689_v11, %v693_v24  ;;  %v569_v58 = vld [vmem:[%s9784_s2 + $0xf0] sm:$0xff]  ;;  %v5240_v5 = vpack.c.bf16 %v578_v3, %v576_v2  ;;  %v582_v11 = vld [vmem:[%s9784_s2 + $0x158] sm:$0xff]  ;;  %v4370_v63 = vld [vmem:[%s9784_s2 + $0x448] sm:$0xff] }
 0x132   : > { %v692_v17 = vsel %vm682_vm3, %v687_v57, %v691_v14  ;;  %v696_v27 = vsel %vm682_vm3, %v691_v14, %v695_v15  ;;  %v698_v41 = vsel %vm682_vm3, %v693_v24, %v697_v28  ;;  %v567_v57 = vld [vmem:[%s9784_s2 + $0xe0] sm:$0xff]  ;;  %v5242_v12 = vpack.c.bf16 %v577_v8, %v575_v6  ;;  %v4374_v6 = vld [vmem:[%s9784_s2 + $0x468] sm:$0xff]  ;;  %v4376_v8 = vld [vmem:[%s9784_s2 + $0x478] sm:$0xff] }
 0x133   : > { %781 = vmatprep.mubr.f32.mxu0 %v692_v17  ;;  %v700_v30 = vsel %vm682_vm3, %v695_v15, %v699_v18  ;;  %v5234_v61 = vpack.c.bf16 %v569_v58, %v567_v57  ;;  %v5244_v13 = vpack.c.bf16 %v582_v11, %v580_v9  ;;  %v579_v14 = vld [vmem:[%s9784_s2 + $0x140] sm:$0xff]  ;;  %v581_v15 = vld [vmem:[%s9784_s2 + $0x150] sm:$0xff]  ;;  %v586_v17 = vld [vmem:[%s9784_s2 + $0x178] sm:$0xff]  ;;  %v5250_v24 = vpack.c.bf16 %v585_v21, %v583_v20 }
 0x134   : > { %782 = vmatmul.mubr.f32.gmra.mrb[8].mxu0 %v690_v23  ;;  %v590_v23 = vld [vmem:[%s9784_s2 + $0x198] sm:$0xff]  ;;  %v5276_v3 = vpack.c.bf16 %v4372_v1, %v4370_v63  ;;  %v5280_v11 = vpack.c.bf16 %v4376_v8, %v4374_v6  ;;  %v4379_v20 = vld [vmem:[%s9784_s2 + $0x490] sm:$0xff]  ;;  %v4382_v21 = vld [vmem:[%s9784_s2 + $0x4a8] sm:$0xff] }
 0x135   : > { %787 = vmatprep.mubr.f32.mxu0 %v696_v27  ;;  %5215 = vmatpush1.bf16.msra.mxu0 %v5214_v16  ;;  %v584_v16 = vld [vmem:[%s9784_s2 + $0x168] sm:$0xff]  ;;  %v5252_v25 = vpack.c.bf16 %v590_v23, %v588_v22  ;;  %v589_v27 = vld [vmem:[%s9784_s2 + $0x190] sm:$0xff]  ;;  %v4368_v57 = vld [vmem:[%s9784_s2 + $0x438] sm:$0xff] }
 0x136   : > { %5217 = vmatprep.subr.bf16.mxu0 %v5216_v19  ;;  %v5248_v19 = vpack.c.bf16 %v586_v17, %v584_v16  ;;  %v902_v17 = vld [vmem:[#allocation2 + $0x8] sm:$0xfc]  ;;  %v4384_v22 = vld [vmem:[%s9784_s2 + $0x4b8] sm:$0xff]  ;;  %v4401_v1 = vld [vmem:[%s9784_s2 + $0x540] sm:$0xff] }
 0x137   : > { %v538_v23 = vld [vmem:[#allocation2 + $0x48] sm:$0x7]  ;;  %v4405_v8 = vld [vmem:[%s9784_s2 + $0x560] sm:$0xff] }
 0x138   : > { %788 = vmatmul.mubr.f32.gmra.mrb[10].mxu0 %v694_v38  ;;  %v596_v38 = vld [vmem:[%s9784_s2 + $0x1c8] sm:$0xff] }
 0x139   : > { %793 = vmatprep.mubr.f32.mxu0 %v700_v30  ;;  %5219 = vmatpush1.bf16.msra.mxu0 %v5218_v29  ;;  %v594_v29 = vld [vmem:[%s9784_s2 + $0x1b8] sm:$0xff]  ;;  %v5254_v30 = vpack.c.bf16 %v589_v27, %v587_v26  ;;  %v979_v26 = vrot.slane %v6620_v35, 2  ;;  %v5288_v27 = vpack.c.bf16 %v4384_v22, %v4382_v21  ;;  %v4413_v21 = vld [vmem:[%s9784_s2 + $0x5a0] sm:$0xff]  ;;  %v4415_v22 = vld [vmem:[%s9784_s2 + $0x5b0] sm:$0xff] }
 0x13a   : > { %5221 = vmatprep.subr.bf16.mxu0 %v5220_v31 }
 0x13c   : > { %794 = vmatmul.mubr.f32.gmra.mrb[12].mxu0 %v698_v41  ;;  %v5260_v41 = vpack.c.bf16 %v598_v39, %v596_v38 }
 0x13d   : > { %799 = vmatprep.mubr.f32.mxu0 %v699_v18  ;;  %5223 = vmatpush1.bf16.msra.mxu0 %v5222_v42  ;;  %v5246_v18 = vpack.c.bf16 %v581_v15, %v579_v14  ;;  %v595_v42 = vld [vmem:[%s9784_s2 + $0x1c0] sm:$0xff]  ;;  %v4378_v14 = vld [vmem:[%s9784_s2 + $0x488] sm:$0xff]  ;;  %v4380_v15 = vld [vmem:[%s9784_s2 + $0x498] sm:$0xff] }
 0x13e   : > { %5225 = vmatprep.subr.bf16.mxu0 %v5224_v43  ;;  %v597_v43 = vld [vmem:[%s9784_s2 + $0x1d0] sm:$0xff] }
 0x13f   : > { %v5262_v46 = vpack.c.bf16 %v597_v43, %v595_v42  ;;  %v4390_v42 = vld [vmem:[%s9784_s2 + $0x4e8] sm:$0xff]  ;;  %v4392_v43 = vld [vmem:[%s9784_s2 + $0x4f8] sm:$0xff] }
 0x140   : > { %800 = vmatmul.mubr.f32.gmra.mrb[14].mxu0 %v697_v28  ;;  %v592_v28 = vld [vmem:[%s9784_s2 + $0x1a8] sm:$0xff]  ;;  %v5296_v45 = vpack.c.bf16 %v4392_v43, %v4390_v42  ;;  %v983_v43 = vrot.slane %v6668_v10, 2 }
 0x141   : > { %870 = vmatprep.mubr.f32.mxu0 %v530_v54  ;;  %5227 = vmatpush1.bf16.msra.mxu0 %v5226_v48  ;;  %v5256_v31 = vpack.c.bf16 %v594_v29, %v592_v28  ;;  %v599_v48 = vld [vmem:[%s9784_s2 + $0x1e0] sm:$0xff]  ;;  %v4383_v29 = vld [vmem:[%s9784_s2 + $0x4b0] sm:$0xff] }
 0x142   : > { %5229 = vmatprep.subr.bf16.mxu0 %v5228_v49  ;;  %v601_v49 = vld [vmem:[%s9784_s2 + $0x1f0] sm:$0xff]  ;;  %v4361_v54 = vld [vmem:[%s9784_s2 + $0x400] sm:$0xff] }
 0x143   : > { %v5266_v52 = vpack.c.bf16 %v601_v49, %v599_v48  ;;  %v4381_v28 = vld [vmem:[%s9784_s2 + $0x4a0] sm:$0xff]  ;;  %v4394_v48 = vld [vmem:[%s9784_s2 + $0x508] sm:$0xff]  ;;  %v4396_v49 = vld [vmem:[%s9784_s2 + $0x518] sm:$0xff] }
 0x144   : > { %v5290_v38 = vpack.c.bf16 %v4383_v29, %v4381_v28  ;;  %v5300_v51 = vpack.c.bf16 %v4396_v49, %v4394_v48  ;;  %v4417_v28 = vld [vmem:[%s9784_s2 + $0x5c0] sm:$0xff]  ;;  %v4419_v29 = vld [vmem:[%s9784_s2 + $0x5d0] sm:$0xff]  ;;  %v987_v48 = vrot.slane %v6623_v37, 2  ;;  %v904_v49 = vld [vmem:[#allocation2 + $0x48] sm:$0x1f] }
 0x145   : > { %5231 = vmatpush1.bf16.msra.mxu0 %v5230_v55  ;;  %v4363_v55 = vld [vmem:[%s9784_s2 + $0x410] sm:$0xff] }
 0x146   : > { %5233 = vmatprep.subr.bf16.mxu0 %v5232_v56  ;;  %v4366_v56 = vld [vmem:[%s9784_s2 + $0x428] sm:$0xff]  ;;  %v5270_v58 = vpack.c.bf16 %v4363_v55, %v4361_v54  ;;  %v4400_v55 = vld [vmem:[%s9784_s2 + $0x538] sm:$0xff] }
 0x147   : > { %v5272_v59 = vpack.c.bf16 %v4368_v57, %v4366_v56  ;;  %v4398_v54 = vld [vmem:[%s9784_s2 + $0x528] sm:$0xff] }
 0x148   : > { %v5304_v57 = vpack.c.bf16 %v4400_v55, %v4398_v54  ;;  %v4489_v55 = vld [vmem:[%s9784_s2 + $0x800] sm:$0xff] }
 0x149   : > { %5235 = vmatpush1.bf16.msra.mxu0 %v5234_v61  ;;  %v4367_v61 = vld [vmem:[%s9784_s2 + $0x430] sm:$0xff] }
 0x14a   : > { %5237 = vmatprep.subr.bf16.mxu0 %v5236_v62  ;;  %v529_v62 = vld [vmem:[#allocation2] sm:$0xff]  ;;  %v5274_v2 = vpack.c.bf16 %v4367_v61, %v4365_v60  ;;  %v4402_v60 = vld [vmem:[%s9784_s2 + $0x548] sm:$0xff]  ;;  %v4404_v61 = vld [vmem:[%s9784_s2 + $0x558] sm:$0xff] }
 0x14b   : > { %v5308_v63 = vpack.c.bf16 %v4404_v61, %v4402_v60  ;;  %v4493_v61 = vld [vmem:[%s9784_s2 + $0x820] sm:$0xff] }
 0x14d   : > { %5239 = vmatpush1.bf16.msra.mxu0 %v5238_v4  ;;  %v4369_v4 = vld [vmem:[%s9784_s2 + $0x440] sm:$0xff] }
 0x14e   : > { %5241 = vmatprep.subr.bf16.mxu0 %v5240_v5  ;;  %v4371_v5 = vld [vmem:[%s9784_s2 + $0x450] sm:$0xff] }
 0x14f   : > { %v5278_v9 = vpack.c.bf16 %v4371_v5, %v4369_v4  ;;  %v4408_v4 = vld [vmem:[%s9784_s2 + $0x578] sm:$0xff] }
 0x151   : > { %5243 = vmatpush1.bf16.msra.mxu0 %v5242_v12  ;;  %v4373_v12 = vld [vmem:[%s9784_s2 + $0x460] sm:$0xff] }
 0x152   : > { %5245 = vmatprep.subr.bf16.mxu0 %v5244_v13  ;;  %v4375_v13 = vld [vmem:[%s9784_s2 + $0x470] sm:$0xff] }
 0x153   : > { %v5282_v16 = vpack.c.bf16 %v4375_v13, %v4373_v12  ;;  %v4412_v12 = vld [vmem:[%s9784_s2 + $0x598] sm:$0xff] }
 0x155   : > { %5247 = vmatpush1.bf16.msra.mxu0 %v5246_v18  ;;  %v5284_v18 = vpack.c.bf16 %v4380_v15, %v4378_v14  ;;  %v4409_v15 = vld [vmem:[%s9784_s2 + $0x580] sm:$0xff] }
 0x156   : > { %5249 = vmatprep.subr.bf16.mxu0 %v5248_v19  ;;  %v4377_v19 = vld [vmem:[%s9784_s2 + $0x480] sm:$0xff] }
 0x159   : > { %5251 = vmatpush1.bf16.msra.mxu0 %v5250_v24  ;;  %v978_v24 = vrot.slane %v902_v17, 2  ;;  %v4414_v17 = vld [vmem:[%s9784_s2 + $0x5a8] sm:$0xff] }
 0x15a   : > { %5253 = vmatprep.subr.bf16.mxu0 %v5252_v25  ;;  %v5286_v25 = vpack.c.bf16 %v4379_v20, %v4377_v19 }
 0x15b   : > { %v980_v36 = vsel %vm974_vm4, %v978_v24, %v979_v26  ;;  %v4420_v24 = vld [vmem:[%s9784_s2 + $0x5d8] sm:$0xff] }
 0x15d   : > { %5255 = vmatpush1.bf16.msra.mxu0 %v5254_v30  ;;  %v537_v30 = vld [vmem:[#allocation2 + $0x40] sm:$0x7] }
 0x15e   : > { %5257 = vmatprep.subr.bf16.mxu0 %v5256_v31  ;;  %v4386_v31 = vld [vmem:[%s9784_s2 + $0x4c8] sm:$0xff] }
 0x15f   : > { %v5292_v39 = vpack.c.bf16 %v4388_v32, %v4386_v31  ;;  %v4424_v31 = vld [vmem:[%s9784_s2 + $0x5f8] sm:$0xff]  ;;  %v5326_v32 = vpack.c.bf16 %v4419_v29, %v4417_v28  ;;  %v4514_v28 = vld [vmem:[%s9784_s2 + $0x8c8] sm:$0xff] }
 0x160   : > { %v4516_v29 = vld [vmem:[%s9784_s2 + $0x8d8] sm:$0xff] }
 0x161   : > { %5259 = vmatpush1.bf16.msra.mxu0 %v5258_v40  ;;  %v4385_v40 = vld [vmem:[%s9784_s2 + $0x4c0] sm:$0xff] }
 0x162   : > { %5261 = vmatprep.subr.bf16.mxu0 %v5260_v41  ;;  %v4387_v41 = vld [vmem:[%s9784_s2 + $0x4d0] sm:$0xff] }
 0x163   : > { %v5294_v44 = vpack.c.bf16 %v4387_v41, %v4385_v40  ;;  %v901_v40 = vld [vmem:[#allocation2] sm:$0xfc] }
 0x164   : > { %v975_v42 = vrot.slane %v901_v40, 2 }
 0x165   : > { %5263 = vmatpush1.bf16.msra.mxu0 %v5262_v46  ;;  %v4389_v46 = vld [vmem:[%s9784_s2 + $0x4e0] sm:$0xff] }
 0x166   : > { %5265 = vmatprep.subr.bf16.mxu0 %v5264_v47  ;;  %v4391_v47 = vld [vmem:[%s9784_s2 + $0x4f0] sm:$0xff] }
 0x167   : > { %v5298_v50 = vpack.c.bf16 %v4391_v47, %v4389_v46  ;;  %v981_v46 = vrot.slane %v6660_v7, 2  ;;  %v984_v47 = vsel %vm974_vm4, %v979_v26, %v983_v43  ;;  %v4492_v26 = vld [vmem:[%s9784_s2 + $0x818] sm:$0xff] }
 0x169   : > { %5267 = vmatpush1.bf16.msra.mxu0 %v5266_v52  ;;  %v4393_v52 = vld [vmem:[%s9784_s2 + $0x500] sm:$0xff] }
 0x16a   : > { %5269 = vmatprep.subr.bf16.mxu0 %v5268_v53  ;;  %v4395_v53 = vld [vmem:[%s9784_s2 + $0x510] sm:$0xff] }
 0x16b   : > { %v5302_v56 = vpack.c.bf16 %v4395_v53, %v4393_v52  ;;  %v903_v52 = vld [vmem:[#allocation2 + $0x40] sm:$0x1f] }
 0x16c   : > { %871 = vmatmul.mubr.f32.vlgmr.msra.gmra.mrb[6].mxu0 %v529_v62  ;;  %v989_v53 = vrot.slane %v903_v52, 2  ;;  %v4527_v52 = vld [vmem:[%s9784_s2 + $0x930] sm:$0xff] }
 0x16d   : > { %876 = vmatprep.mubr.f32.mxu0 %v6620_v35  ;;  %5271 = vmatpush1.bf16.msra.mxu0 %v5270_v58  ;;  %v4397_v58 = vld [vmem:[%s9784_s2 + $0x520] sm:$0xff] }
 0x16e   : > { %5273 = vmatprep.subr.bf16.mxu0 %v5272_v59  ;;  %v4399_v59 = vld [vmem:[%s9784_s2 + $0x530] sm:$0xff] }
 0x16f   : > { %v5306_v62 = vpack.c.bf16 %v4399_v59, %v4397_v58  ;;  %v4494_v58 = vld [vmem:[%s9784_s2 + $0x828] sm:$0xff]  ;;  %v4496_v59 = vld [vmem:[%s9784_s2 + $0x838] sm:$0xff] }
 0x170   : > { %877 = vmatmul.mubr.f32.gmra.mrb[8].mxu0 %v6614_v33  ;;  %v5336_v60 = vpack.c.bf16 %v4496_v59, %v4494_v58  ;;  %v4533_v58 = vld [vmem:[%s9784_s2 + $0x960] sm:$0xff]  ;;  %v4535_v59 = vld [vmem:[%s9784_s2 + $0x970] sm:$0xff] }
 0x171   : > { %882 = vmatprep.mubr.f32.mxu0 %v6668_v10  ;;  %5275 = vmatpush1.bf16.msra.mxu0 %v5274_v2  ;;  %v4403_v2 = vld [vmem:[%s9784_s2 + $0x550] sm:$0xff]  ;;  %v985_v10 = vrot.slane %v6617_v34, 2 }
 0x172   : > { %5277 = vmatprep.subr.bf16.mxu0 %v5276_v3  ;;  %v4406_v3 = vld [vmem:[%s9784_s2 + $0x568] sm:$0xff]  ;;  %v5310_v5 = vpack.c.bf16 %v4403_v2, %v4401_v1  ;;  %v4500_v2 = vld [vmem:[%s9784_s2 + $0x858] sm:$0xff] }
 0x173   : > { %v5312_v6 = vpack.c.bf16 %v4408_v4, %v4406_v3  ;;  %v4498_v1 = vld [vmem:[%s9784_s2 + $0x848] sm:$0xff]  ;;  %v4497_v4 = vld [vmem:[%s9784_s2 + $0x840] sm:$0xff] }
 0x174   : > { %883 = vmatmul.mubr.f32.gmra.mrb[10].mxu0 %v6660_v7  ;;  %v986_v7 = vsel %vm974_vm4, %v981_v46, %v985_v10  ;;  %v5340_v3 = vpack.c.bf16 %v4500_v2, %v4498_v1  ;;  %v4537_v1 = vld [vmem:[%s9784_s2 + $0x980] sm:$0xff]  ;;  %v4539_v2 = vld [vmem:[%s9784_s2 + $0x990] sm:$0xff] }
 0x175   : > { %888 = vmatprep.mubr.f32.mxu0 %v6623_v37  ;;  %5279 = vmatpush1.bf16.msra.mxu0 %v5278_v9  ;;  %v4407_v9 = vld [vmem:[%s9784_s2 + $0x570] sm:$0xff]  ;;  %v990_v37 = vsel %vm974_vm4, %v985_v10, %v989_v53  ;;  %v4528_v10 = vld [vmem:[%s9784_s2 + $0x938] sm:$0xff] }
 0x176   : > { %5281 = vmatprep.subr.bf16.mxu0 %v5280_v11  ;;  %v4410_v11 = vld [vmem:[%s9784_s2 + $0x588] sm:$0xff]  ;;  %v5314_v13 = vpack.c.bf16 %v4407_v9, %v4405_v8  ;;  %v4504_v9 = vld [vmem:[%s9784_s2 + $0x878] sm:$0xff] }
 0x177   : > { %v5316_v14 = vpack.c.bf16 %v4412_v12, %v4410_v11  ;;  %v4502_v8 = vld [vmem:[%s9784_s2 + $0x868] sm:$0xff]  ;;  %v4501_v12 = vld [vmem:[%s9784_s2 + $0x860] sm:$0xff] }
 0x178   : > { %889 = vmatmul.mubr.f32.gmra.mrb[12].mxu0 %v6617_v34  ;;  %v4490_v34 = vld [vmem:[%s9784_s2 + $0x808] sm:$0xff]  ;;  %v5344_v11 = vpack.c.bf16 %v4504_v9, %v4502_v8  ;;  %v4541_v8 = vld [vmem:[%s9784_s2 + $0x9a0] sm:$0xff]  ;;  %v4543_v9 = vld [vmem:[%s9784_s2 + $0x9b0] sm:$0xff] }
 0x179   : > { %894 = vmatprep.mubr.f32.mxu0 %v538_v23  ;;  %5283 = vmatpush1.bf16.msra.mxu0 %v5282_v16  ;;  %v4411_v16 = vld [vmem:[%s9784_s2 + $0x590] sm:$0xff]  ;;  %v4418_v23 = vld [vmem:[%s9784_s2 + $0x5c8] sm:$0xff]  ;;  %v5332_v54 = vpack.c.bf16 %v4492_v26, %v4490_v34  ;;  %v4529_v34 = vld [vmem:[%s9784_s2 + $0x940] sm:$0xff] }
 0x17a   : > { %5285 = vmatprep.subr.bf16.mxu0 %v5284_v18  ;;  %v4416_v18 = vld [vmem:[%s9784_s2 + $0x5b8] sm:$0xff]  ;;  %v5318_v19 = vpack.c.bf16 %v4411_v16, %v4409_v15  ;;  %v4506_v15 = vld [vmem:[%s9784_s2 + $0x888] sm:$0xff]  ;;  %v4531_v26 = vld [vmem:[%s9784_s2 + $0x950] sm:$0xff] }
 0x17b   : > { %v5320_v20 = vpack.c.bf16 %v4416_v18, %v4414_v17  ;;  %5333 = vmatprep.subr.bf16.mxu1 %v5332_v54  ;;  %v4508_v16 = vld [vmem:[%s9784_s2 + $0x898] sm:$0xff]  ;;  %v4505_v18 = vld [vmem:[%s9784_s2 + $0x880] sm:$0xff]  ;;  %v5374_v54 = vpack.c.bf16 %v4531_v26, %v4529_v34 }
 0x17c   : > { %895 = vmatmul.mubr.f32.gmra.mrb[14].mxu0 %v537_v30  ;;  %v4422_v30 = vld [vmem:[%s9784_s2 + $0x5e8] sm:$0xff]  ;;  %v5348_v17 = vpack.c.bf16 %v4508_v16, %v4506_v15  ;;  %v4545_v15 = vld [vmem:[%s9784_s2 + $0x9c0] sm:$0xff]  ;;  %v4547_v16 = vld [vmem:[%s9784_s2 + $0x9d0] sm:$0xff] }
 0x17d   : > { %5287 = vmatpush1.bf16.msra.mxu0 %v5286_v25  ;;  %1067 = vmatprep.mubr.f32.mxu0 %v980_v36  ;;  %v5322_v25 = vpack.c.bf16 %v4415_v22, %v4413_v21  ;;  %v5328_v36 = vpack.c.bf16 %v4424_v31, %v4422_v30  ;;  %v4510_v21 = vld [vmem:[%s9784_s2 + $0x8a8] sm:$0xff]  ;;  %v4512_v22 = vld [vmem:[%s9784_s2 + $0x8b8] sm:$0xff]  ;;  %v5356_v30 = vpack.c.bf16 %v4516_v29, %v4514_v28  ;;  %v4513_v31 = vld [vmem:[%s9784_s2 + $0x8c0] sm:$0xff]  ;;  %v519_v28 = vshrl.u32 %v206_v0, 7 }
 0x17e   : > { %5289 = vmatprep.subr.bf16.mxu0 %v5288_v27  ;;  %v5324_v27 = vpack.c.bf16 %v4420_v24, %v4418_v23  ;;  %v5352_v23 = vpack.c.bf16 %v4512_v22, %v4510_v21  ;;  %v4509_v24 = vld [vmem:[%s9784_s2 + $0x8a0] sm:$0xff]  ;;  %v4551_v22 = vld [vmem:[%s9784_s2 + $0x9f0] sm:$0xff] }
 0x17f   : > { %v4549_v21 = vld [vmem:[%s9784_s2 + $0x9e0] sm:$0xff]  ;;  %v7248_v29 = vsub.s32 0, %v519_v28 }
 0x181   : > { %5291 = vmatpush1.bf16.msra.mxu0 %v5290_v38  ;;  %v4421_v38 = vld [vmem:[%s9784_s2 + $0x5e0] sm:$0xff] }
 0x182   : > { %5293 = vmatprep.subr.bf16.mxu0 %v5292_v39  ;;  %v4423_v39 = vld [vmem:[%s9784_s2 + $0x5f0] sm:$0xff] }
 0x183   : > { %v5330_v41 = vpack.c.bf16 %v4423_v39, %v4421_v38  ;;  %v4518_v38 = vld [vmem:[%s9784_s2 + $0x8e8] sm:$0xff]  ;;  %v4520_v39 = vld [vmem:[%s9784_s2 + $0x8f8] sm:$0xff] }
 0x184   : > { %v5360_v40 = vpack.c.bf16 %v4520_v39, %v4518_v38 }
 0x185   : > { %5295 = vmatpush1.bf16.msra.mxu0 %v5294_v44  ;;  %v976_v44 = vrot.slane %v6614_v33, 2  ;;  %v988_v33 = vsel %vm974_vm4, %v983_v43, %v987_v48 }
 0x186   : > { %5297 = vmatprep.subr.bf16.mxu0 %v5296_v45 }
 0x187   : > { %v977_v45 = vsel %vm974_vm4, %v975_v42, %v976_v44  ;;  %v4519_v42 = vld [vmem:[%s9784_s2 + $0x8f0] sm:$0xff] }
 0x189   : > { %5299 = vmatpush1.bf16.msra.mxu0 %v5298_v50  ;;  %v982_v50 = vsel %vm974_vm4, %v976_v44, %v981_v46  ;;  %v4522_v44 = vld [vmem:[%s9784_s2 + $0x908] sm:$0xff] }
 0x18a   : > { %5301 = vmatprep.subr.bf16.mxu0 %v5300_v51  ;;  %v991_v51 = vrot.slane %v904_v49, 2 }
 0x18c   : > { %v992_v35 = vsel %vm974_vm4, %v987_v48, %v991_v51  ;;  %v4523_v48 = vld [vmem:[%s9784_s2 + $0x910] sm:$0xff] }
 0x18d   : > { %5303 = vmatpush1.bf16.msra.mxu0 %v5302_v56  ;;  %v4491_v56 = vld [vmem:[%s9784_s2 + $0x810] sm:$0xff] }
 0x18e   : > { %5305 = vmatprep.subr.bf16.mxu0 %v5304_v57  ;;  %v5334_v57 = vpack.c.bf16 %v4491_v56, %v4489_v55  ;;  %v4534_v55 = vld [vmem:[%s9784_s2 + $0x968] sm:$0xff]  ;;  %v4536_v56 = vld [vmem:[%s9784_s2 + $0x978] sm:$0xff] }
 0x190   : > { %5335 = vmatpush1.bf16.msra.mxu1 %v5334_v57  ;;  %v5376_v57 = vpack.c.bf16 %v4536_v56, %v4534_v55 }
 0x191   : > { %5307 = vmatpush1.bf16.msra.mxu0 %v5306_v62  ;;  %v4495_v62 = vld [vmem:[%s9784_s2 + $0x830] sm:$0xff]  ;;  %5337 = vmatprep.subr.bf16.mxu1 %v5336_v60  ;;  %v5378_v60 = vpack.c.bf16 %v4535_v59, %v4533_v58 }
 0x192   : > { %5309 = vmatprep.subr.bf16.mxu0 %v5308_v63  ;;  %v5338_v63 = vpack.c.bf16 %v4495_v62, %v4493_v61  ;;  %v4538_v61 = vld [vmem:[%s9784_s2 + $0x988] sm:$0xff]  ;;  %v4540_v62 = vld [vmem:[%s9784_s2 + $0x998] sm:$0xff] }
 0x194   : > { %5339 = vmatpush1.bf16.msra.mxu1 %v5338_v63  ;;  %v5380_v63 = vpack.c.bf16 %v4540_v62, %v4538_v61 }
 0x195   : > { %5311 = vmatpush1.bf16.msra.mxu0 %v5310_v5  ;;  %v4499_v5 = vld [vmem:[%s9784_s2 + $0x850] sm:$0xff]  ;;  %5341 = vmatprep.subr.bf16.mxu1 %v5340_v3  ;;  %v5382_v3 = vpack.c.bf16 %v4539_v2, %v4537_v1  ;;  %v7286_v2 = vld [vmem:[%s9784_s2 + $0x600] sm:$0xff] }
 0x196   : > { %5313 = vmatprep.subr.bf16.mxu0 %v5312_v6  ;;  %v5342_v6 = vpack.c.bf16 %v4499_v5, %v4497_v4  ;;  %v4542_v4 = vld [vmem:[%s9784_s2 + $0x9a8] sm:$0xff]  ;;  %v4544_v5 = vld [vmem:[%s9784_s2 + $0x9b8] sm:$0xff] }
 0x198   : > { %5343 = vmatpush1.bf16.msra.mxu1 %v5342_v6  ;;  %v5384_v6 = vpack.c.bf16 %v4544_v5, %v4542_v4 }
 0x199   : > { %5315 = vmatpush1.bf16.msra.mxu0 %v5314_v13  ;;  %v4503_v13 = vld [vmem:[%s9784_s2 + $0x870] sm:$0xff]  ;;  %5345 = vmatprep.subr.bf16.mxu1 %v5344_v11  ;;  %v5386_v11 = vpack.c.bf16 %v4543_v9, %v4541_v8  ;;  %v7294_v9 = vadd.s32 16, %v519_v28 }
 0x19a   : > { %5317 = vmatprep.subr.bf16.mxu0 %v5316_v14  ;;  %v5346_v14 = vpack.c.bf16 %v4503_v13, %v4501_v12  ;;  %v4546_v12 = vld [vmem:[%s9784_s2 + $0x9c8] sm:$0xff]  ;;  %v4548_v13 = vld [vmem:[%s9784_s2 + $0x9d8] sm:$0xff] }
 0x19b   : > { %vm526_vm10 = vcmp.ne.s32.totalorder %v7294_v9, 17 }
 0x19c   : > { %5347 = vmatpush1.bf16.msra.mxu1 %v5346_v14  ;;  %v5388_v14 = vpack.c.bf16 %v4548_v13, %v4546_v12 }
 0x19d   : > { %5319 = vmatpush1.bf16.msra.mxu0 %v5318_v19  ;;  %v4507_v19 = vld [vmem:[%s9784_s2 + $0x890] sm:$0xff]  ;;  %5349 = vmatprep.subr.bf16.mxu1 %v5348_v17  ;;  %v5390_v17 = vpack.c.bf16 %v4547_v16, %v4545_v15 }
 0x19e   : > { %5321 = vmatprep.subr.bf16.mxu0 %v5320_v20  ;;  %v5350_v20 = vpack.c.bf16 %v4507_v19, %v4505_v18  ;;  %v4550_v18 = vld [vmem:[%s9784_s2 + $0x9e8] sm:$0xff]  ;;  %v4552_v19 = vld [vmem:[%s9784_s2 + $0x9f8] sm:$0xff] }
 0x1a0   : > { %5351 = vmatpush1.bf16.msra.mxu1 %v5350_v20  ;;  %v5392_v20 = vpack.c.bf16 %v4552_v19, %v4550_v18 }
 0x1a1   : > { %5323 = vmatpush1.bf16.msra.mxu0 %v5322_v25  ;;  %v4511_v25 = vld [vmem:[%s9784_s2 + $0x8b0] sm:$0xff]  ;;  %5353 = vmatprep.subr.bf16.mxu1 %v5352_v23  ;;  %v5394_v23 = vpack.c.bf16 %v4551_v22, %v4549_v21 }
 0x1a2   : > { %5325 = vmatprep.subr.bf16.mxu0 %v5324_v27  ;;  %v5354_v27 = vpack.c.bf16 %v4511_v25, %v4509_v24  ;;  %v4426_v24 = vld [vmem:[%s9784_s2 + $0x608] sm:$0xff]  ;;  %v4428_v25 = vld [vmem:[%s9784_s2 + $0x618] sm:$0xff] }
 0x1a4   : > { %5355 = vmatpush1.bf16.msra.mxu1 %v5354_v27  ;;  %v5396_v27 = vpack.c.bf16 %v4428_v25, %v4426_v24 }
 0x1a5   : > { %5327 = vmatpush1.bf16.msra.mxu0 %v5326_v32  ;;  %v4515_v32 = vld [vmem:[%s9784_s2 + $0x8d0] sm:$0xff]  ;;  %5357 = vmatprep.subr.bf16.mxu1 %v5356_v30  ;;  %v1108_v30 = vld [vmem:[%s9785_s3] ss:$4 sm:$0x3] }
 0x1a6   : > { %5329 = vmatprep.subr.bf16.mxu0 %v5328_v36  ;;  %v5358_v36 = vpack.c.bf16 %v4515_v32, %v4513_v31  ;;  %v7253_v31 = vsub.s32 1, %v519_v28  ;;  %v7256_v32 = vrot.slane %v1108_v30, %v7248_v29 }
 0x1a8   : > { %5359 = vmatpush1.bf16.msra.mxu1 %v5358_v36  ;;  %v7259_v36 = vrot.slane %v1108_v30, %v7253_v31 }
 0x1a9   : > { %5331 = vmatpush1.bf16.msra.mxu0 %v5330_v41  ;;  %v4517_v41 = vld [vmem:[%s9784_s2 + $0x8e0] sm:$0xff]  ;;  %5361 = vmatprep.subr.bf16.mxu1 %v5360_v40 }
 0x1aa   : > { %v5362_v43 = vpack.c.bf16 %v4519_v42, %v4517_v41 }
 0x1ac   : > { %1068 = vmatmul.mubr.f32.vlgmr.msra.gmra.mrb[6].mxu0 %v977_v45  ;;  %5363 = vmatpush1.bf16.msra.mxu1 %v5362_v43  ;;  %v4524_v45 = vld [vmem:[%s9784_s2 + $0x918] sm:$0xff] }
 0x1ad   : > { %1073 = vmatprep.mubr.f32.mxu0 %v984_v47  ;;  %v5364_v46 = vpack.c.bf16 %v4524_v45, %v4522_v44  ;;  %v4521_v47 = vld [vmem:[%s9784_s2 + $0x900] sm:$0xff] }
 0x1ae   : > { %v5366_v49 = vpack.c.bf16 %v4523_v48, %v4521_v47 }
 0x1af   : > { %5365 = vmatprep.subr.bf16.mxu1 %v5364_v46 }
 0x1b0   : > { %1074 = vmatmul.mubr.f32.gmra.mrb[8].mxu0 %v982_v50  ;;  %5367 = vmatpush1.bf16.msra.mxu1 %v5366_v49  ;;  %v4526_v50 = vld [vmem:[%s9784_s2 + $0x928] sm:$0xff] }
 0x1b1   : > { %1079 = vmatprep.mubr.f32.mxu0 %v988_v33  ;;  %v5368_v33 = vpack.c.bf16 %v4528_v10, %v4526_v50 }
 0x1b3   : > { %5369 = vmatprep.subr.bf16.mxu1 %v5368_v33 }
 0x1b4   : > { %1080 = vmatmul.mubr.f32.gmra.mrb[10].mxu0 %v986_v7 }
 0x1b5   : > { %1085 = vmatprep.mubr.f32.mxu0 %v992_v35  ;;  %v4532_v35 = vld [vmem:[%s9784_s2 + $0x958] sm:$0xff] }
 0x1b8   : > { %1086 = vmatmul.mubr.f32.gmra.mrb[12].mxu0 %v990_v37 }
 0x1b9   : > { %1091 = vmatprep.mubr.f32.mxu0 %v991_v51  ;;  %v4525_v51 = vld [vmem:[%s9784_s2 + $0x920] sm:$0xff] }
 0x1ba   : > { %v5370_v7 = vpack.c.bf16 %v4527_v52, %v4525_v51 }
 0x1bc   : > { %1092 = vmatmul.mubr.f32.gmra.mrb[14].mxu0 %v989_v53  ;;  %5371 = vmatpush1.bf16.msra.mxu1 %v5370_v7  ;;  %v4530_v53 = vld [vmem:[%s9784_s2 + $0x948] sm:$0xff] }
 0x1bd   : > { %v5372_v37 = vpack.c.bf16 %v4532_v35, %v4530_v53 }
 0x1bf   : > { %5373 = vmatprep.subr.bf16.mxu1 %v5372_v37 }
 0x1c0   : > { %5375 = vmatpush1.bf16.msra.mxu1 %v5374_v54 }
 0x1c1   : > { %5377 = vmatprep.subr.bf16.mxu1 %v5376_v57 }
 0x1c4   : > { %5379 = vmatpush1.bf16.msra.mxu1 %v5378_v60 }
 0x1c5   : > { %5381 = vmatprep.subr.bf16.mxu1 %v5380_v63 }
 0x1c8   : > { %5383 = vmatpush1.bf16.msra.mxu1 %v5382_v3  ;;  %v7291_v3 = vld [vmem:[%s9784_s2 + $0x610] sm:$0xff] }
 0x1c9   : > { %5385 = vmatprep.subr.bf16.mxu1 %v5384_v6 }
 0x1cc   : > { %5387 = vmatpush1.bf16.msra.mxu1 %v5386_v11 }
 0x1cd   : > { %5389 = vmatprep.subr.bf16.mxu1 %v5388_v14 }
 0x1d0   : > { %5391 = vmatpush1.bf16.msra.mxu1 %v5390_v17  ;;  %v5398_v17 = vpack.c.bf16 %v7291_v3, %v7286_v2 }
 0x1d1   : > { %5393 = vmatprep.subr.bf16.mxu1 %v5392_v20 }
 0x1d4   : > { %5395 = vmatpush1.bf16.msra.mxu1 %v5394_v23 }
 0x1d5   : > { %5397 = vmatprep.subr.bf16.mxu1 %v5396_v27 }
 0x27f   : > { %v1069_v38 = vpop.f32.mrb[6].mxu0 }
 0x280   : > { %v7262_v39 = vadd.f32 %v7256_v32, %v1069_v38  ;;  %v1071_v40 = vpop.f32.mrb[7].mxu0 }
 0x281   : > { %v7265_v0 = vadd.f32 %v7259_v36, %v1071_v40 }
 0x282   : > { %v1130_v41 = vand.u32 2147483647, %v7262_v39  ;;  %v7298_v13 = vmul.f32 0.5, %v7262_v39  ;;  %vm1340_vm5 = vcmp.ge.f32.partialorder %v7262_v39, 0.0 }
 0x283   : > { %v1131_v42 = vand.u32 2147483647, %v7265_v0  ;;  %v1075_v43 = vpop.f32.mrb[8].mxu0  ;;  %v7305_v18 = vmul.f32 0.5, %v7265_v0  ;;  %vm1341_vm6 = vcmp.ge.f32.partialorder %v7265_v0, 0.0 }
 0x284   : > { %v1140_v44 = vmul.f32 0.70710677, %v1130_v41  ;;  %v7270_v45 = vadd.f32 %v7256_v32, %v1075_v43  ;;  %v1077_v46 = vpop.f32.mrb[9].mxu0 }
 0x285   : > { %v1141_v47 = vmul.f32 0.70710677, %v1131_v42  ;;  %v7273_v48 = vadd.f32 %v7259_v36, %v1077_v46 }
 0x286   : > { %v1150_v49 = vmul.f32 0.3275911, %v1140_v44  ;;  %v1280_v50 = vsub.f32 0.0, %v1140_v44  ;;  %v1132_v10 = vand.u32 2147483647, %v7270_v45  ;;  %v7314_v22 = vmul.f32 0.5, %v7270_v45 }
 0x287   : > { %v1151_v33 = vmul.f32 0.3275911, %v1141_v47  ;;  %v1281_v51 = vsub.f32 0.0, %v1141_v47  ;;  %v1133_v52 = vand.u32 2147483647, %v7273_v48  ;;  %v1081_v35 = vpop.f32.mrb[10].mxu0 }
 0x288   : > { %v1160_v7 = vadd.f32 1.0, %v1150_v49  ;;  %v1142_v53 = vmul.f32 0.70710677, %v1132_v10  ;;  %v1083_v26 = vpop.f32.mrb[11].mxu0  ;;  %v1290_v54 = vmul.f32 %v1280_v50, %v1140_v44  ;;  %v7278_v61 = vadd.f32 %v7256_v32, %v1081_v35 }
 0x289   : > { %v1161_v37 = vadd.f32 1.0, %v1151_v33  ;;  %v1143_v34 = vmul.f32 0.70710677, %v1133_v52  ;;  %v1291_v56 = vmul.f32 %v1281_v51, %v1141_v47  ;;  %v7281_v1 = vadd.f32 %v7259_v36, %v1083_v26 }
 0x28a   : > { %5998 = vrcp.f32 %v1160_v7  ;;  %v1152_v55 = vmul.f32 0.3275911, %v1142_v53  ;;  %v1282_v60 = vsub.f32 0.0, %v1142_v53  ;;  %v1300_v4 = vmul.f32 1.442695, %v1290_v54 }
 0x28b   : > { %6000 = vrcp.f32 %v1161_v37  ;;  %v1153_v57 = vmul.f32 0.3275911, %v1143_v34  ;;  %v1087_v58 = vpop.f32.mrb[12].mxu0  ;;  %v1283_v5 = vsub.f32 0.0, %v1143_v34  ;;  %v1134_v6 = vand.u32 2147483647, %v7278_v61 }
 0x28c   : > { %v1162_v59 = vadd.f32 1.0, %v1152_v55  ;;  %v1089_v62 = vpop.f32.mrb[13].mxu0  ;;  %v1302_v8 = vmul.f32 1.442695, %v1291_v56  ;;  %v1135_v11 = vand.u32 2147483647, %v7281_v1  ;;  %v1292_v14 = vmul.f32 %v1282_v60, %v1142_v53 }
 0x28d   : > { %v1163_v63 = vadd.f32 1.0, %v1153_v57  ;;  %v1144_v15 = vmul.f32 0.70710677, %v1134_v6  ;;  %v7308_v20 = vadd.f32 %v7256_v32, %v1087_v58  ;;  %v7311_v21 = vadd.f32 %v7259_v36, %v1089_v62 }
 0x28e   : > { %6002 = vrcp.f32 %v1162_v59  ;;  %v1145_v19 = vmul.f32 0.70710677, %v1135_v11  ;;  %v1293_v23 = vmul.f32 %v1283_v5, %v1143_v34  ;;  %v7317_v25 = vmul.f32 0.5, %v7273_v48 }
 0x28f   : > { %6004 = vrcp.f32 %v1163_v63  ;;  %v1093_v12 = vpop.f32.mrb[14].mxu0  ;;  %v1154_v24 = vmul.f32 0.3275911, %v1144_v15  ;;  %v1136_v28 = vand.u32 2147483647, %v7308_v20  ;;  %v1284_v41 = vsub.f32 0.0, %v1144_v15 }
 0x290   : > { %v7300_v16 = vpop.f32.mrb[15].mxu0  ;;  %6006 = vpow2.f32 %v1300_v4  ;;  %v1155_v27 = vmul.f32 0.3275911, %v1145_v19  ;;  %v1304_v38 = vmul.f32 1.442695, %v1292_v14  ;;  %v1285_v47 = vsub.f32 0.0, %v1145_v19 }
 0x291   : > { %6008 = vpow2.f32 %v1302_v8  ;;  %v1164_v40 = vadd.f32 1.0, %v1154_v24  ;;  %v1137_v42 = vand.u32 2147483647, %v7311_v21  ;;  %v1146_v49 = vmul.f32 0.70710677, %v1136_v28 }
 0x292   : > { %v1165_v46 = vadd.f32 1.0, %v1155_v27  ;;  %v1306_v10 = vmul.f32 1.442695, %v1293_v23  ;;  %v7328_v7 = vadd.f32 %v7256_v32, %v1093_v12  ;;  %v1294_v37 = vmul.f32 %v1284_v41, %v1144_v15 }
 0x293   : > { %6010 = vrcp.f32 %v1164_v40  ;;  %v1147_v33 = vmul.f32 0.70710677, %v1137_v42  ;;  %v1156_v52 = vmul.f32 0.3275911, %v1146_v49  ;;  %v1286_v34 = vsub.f32 0.0, %v1146_v49 }
 0x294   : > { %v7320_v30 = vpop.eup %5998  ;;  %6012 = vrcp.f32 %v1165_v46  ;;  %v1295_v57 = vmul.f32 %v1285_v47, %v1145_v19  ;;  %v1308_v12 = vmul.f32 1.442695, %v1294_v37  ;;  %vm1342_vm7 = vcmp.ge.f32.partialorder %v7270_v45, 0.0 }
 0x295   : > { %v7323_v43 = vpop.eup %6000  ;;  %v1190_v44 = vmul.f32 1.0614054, %v7320_v30  ;;  %v1157_v26 = vmul.f32 0.3275911, %v1147_v33  ;;  %v1166_v58 = vadd.f32 1.0, %v1156_v52  ;;  %v1296_v32 = vmul.f32 %v1286_v34, %v1146_v49 }
 0x296   : > { %v1191_v50 = vmul.f32 1.0614054, %v7323_v43  ;;  %v1287_v5 = vsub.f32 0.0, %v1147_v33  ;;  %v1310_v23 = vmul.f32 1.442695, %v1295_v57  ;;  %vm1343_vm8 = vcmp.ge.f32.partialorder %v7273_v48, 0.0 }
 0x297   : > { %v1200_v51 = vadd.f32 -1.4531521, %v1190_v44  ;;  %v1167_v62 = vadd.f32 1.0, %v1157_v26  ;;  %6014 = vrcp.f32 %v1166_v58  ;;  %v1312_v40 = vmul.f32 1.442695, %v1296_v32 }
 0x298   : > { %v7330_v53 = vpop.eup %6002  ;;  %v1201_v35 = vadd.f32 -1.4531521, %v1191_v50  ;;  %v1297_v24 = vmul.f32 %v1287_v5, %v1147_v33  ;;  %v1138_v50 = vand.u32 2147483647, %v7328_v7  ;;  %vm1344_vm9 = vcmp.ge.f32.partialorder %v7278_v61, 0.0 }
 0x299   : > { %v7332_v54 = vpop.eup %6004  ;;  %v1210_v55 = vmul.f32 %v7320_v30, %v1200_v51  ;;  %v1192_v56 = vmul.f32 1.0614054, %v7330_v53  ;;  %6016 = vrcp.f32 %v1167_v62  ;;  %vm1345_vm11 = vcmp.ge.f32.partialorder %v7281_v1, 0.0 }
 0x29a   : > { %v1211_v59 = vmul.f32 %v7323_v43, %v1201_v35  ;;  %v1193_v60 = vmul.f32 1.0614054, %v7332_v54  ;;  %v6007_v6 = vpop.eup %6006  ;;  %6018 = vpow2.f32 %v1304_v38  ;;  %v1314_v44 = vmul.f32 1.442695, %v1297_v24 }
 0x29b   : > { %v1220_v63 = vadd.f32 1.4214138, %v1210_v55  ;;  %v1202_v4 = vadd.f32 -1.4531521, %v1192_v56  ;;  %v6009_v14 = vpop.eup %6008  ;;  %6020 = vpow2.f32 %v1306_v10  ;;  %v7353_v34 = vmul.f32 0.70710677, %v1138_v50 }
 0x29c   : > { %v1221_v8 = vadd.f32 1.4214138, %v1211_v59  ;;  %v1203_v11 = vadd.f32 -1.4531521, %v1193_v60  ;;  %6022 = vpow2.f32 %v1308_v12  ;;  %vm1346_vm12 = vcmp.ge.f32.partialorder %v7308_v20, 0.0 }
 0x29d   : > { %v1230_v15 = vmul.f32 %v7320_v30, %v1220_v63  ;;  %v1212_v19 = vmul.f32 %v7330_v53, %v1202_v4  ;;  %v7342_v46 = vpop.eup %6010  ;;  %6024 = vpow2.f32 %v1310_v23  ;;  %v7363_v4 = vmul.f32 0.3275911, %v7353_v34 }
 0x29e   : > { %v1231_v27 = vmul.f32 %v7323_v43, %v1221_v8  ;;  %v1213_v28 = vmul.f32 %v7332_v54, %v1203_v11  ;;  %v7345_v51 = vpop.eup %6012  ;;  %v1194_v52 = vmul.f32 1.0614054, %v7342_v46  ;;  %6026 = vpow2.f32 %v1312_v40 }
 0x29f   : > { %v1240_v41 = vadd.f32 -0.28449672, %v1230_v15  ;;  %v1222_v42 = vadd.f32 1.4214138, %v1212_v19  ;;  %v1195_v37 = vmul.f32 1.0614054, %v7345_v51  ;;  %6028 = vpow2.f32 %v1314_v44 }
 0x2a0   : > { %v1241_v47 = vadd.f32 -0.28449672, %v1231_v27  ;;  %v1223_v49 = vadd.f32 1.4214138, %v1213_v28  ;;  %v1204_v56 = vadd.f32 -1.4531521, %v1194_v52 }
 0x2a1   : > { %v1250_v33 = vmul.f32 %v7320_v30, %v1240_v41  ;;  %v1232_v38 = vmul.f32 %v7330_v53, %v1222_v42  ;;  %v1205_v59 = vadd.f32 -1.4531521, %v1195_v37  ;;  %v7356_v60 = vpop.eup %6014  ;;  %vm1347_vm13 = vcmp.ge.f32.partialorder %v7311_v21, 0.0 }
 0x2a2   : > { %v1251_v35 = vmul.f32 %v7323_v43, %v1241_v47  ;;  %v1233_v10 = vmul.f32 %v7332_v54, %v1223_v49  ;;  %v1214_v63 = vmul.f32 %v7342_v46, %v1204_v56  ;;  %v1196_v15 = vmul.f32 1.0614054, %v7356_v60 }
 0x2a3   : > { %v1260_v26 = vadd.f32 0.2548296, %v1250_v33  ;;  %v1242_v55 = vadd.f32 -0.28449672, %v1232_v38  ;;  %v7365_v5 = vpop.eup %6016  ;;  %v1215_v12 = vmul.f32 %v7345_v51, %v1205_v59  ;;  %vm1348_vm14 = vcmp.ge.f32.partialorder %v7328_v7, 0.0 }
 0x2a4   : > { %v1261_v57 = vadd.f32 0.2548296, %v1251_v35  ;;  %v1243_v58 = vadd.f32 -0.28449672, %v1233_v10  ;;  %v1224_v23 = vadd.f32 1.4214138, %v1214_v63  ;;  %v6019_v27 = vpop.eup %6018 }
 0x2a5   : > { %v1270_v32 = vmul.f32 %v7320_v30, %v1260_v26  ;;  %v1252_v62 = vmul.f32 %v7330_v53, %v1242_v55  ;;  %v1197_v24 = vmul.f32 1.0614054, %v7365_v5  ;;  %v1225_v41 = vadd.f32 1.4214138, %v1215_v12  ;;  %v6021_v44 = vpop.eup %6020 }
 0x2a6   : > { %v1271_v8 = vmul.f32 %v7323_v43, %v1261_v57  ;;  %v1253_v11 = vmul.f32 %v7332_v54, %v1243_v58  ;;  %v1206_v42 = vadd.f32 -1.4531521, %v1196_v15  ;;  %v1234_v49 = vmul.f32 %v7342_v46, %v1224_v23  ;;  %v6023_v50 = vpop.eup %6022 }
 0x2a7   : > { %v1320_v30 = vmul.f32 %v6007_v6, %v1270_v32  ;;  %v1262_v19 = vadd.f32 0.2548296, %v1252_v62  ;;  %v1207_v6 = vadd.f32 -1.4531521, %v1197_v24  ;;  %v6025_v35 = vpop.eup %6024 }
 0x2a8   : > { %v1321_v28 = vmul.f32 %v6009_v14, %v1271_v8  ;;  %v1263_v40 = vadd.f32 0.2548296, %v1253_v11  ;;  %v1235_v14 = vmul.f32 %v7345_v51, %v1225_v41  ;;  %v1216_v52 = vmul.f32 %v7356_v60, %v1206_v42  ;;  %v6027_v59 = vpop.eup %6026 }
 0x2a9   : > { %v1330_v43 = vsub.f32 1.0, %v1320_v30  ;;  %v1272_v47 = vmul.f32 %v7330_v53, %v1262_v19  ;;  %v1244_v26 = vadd.f32 -0.28449672, %v1234_v49  ;;  %v1217_v55 = vmul.f32 %v7365_v5, %v1207_v6  ;;  %v7383_v8 = vpop.eup %6028 }
 0x2aa   : > { %v1331_v33 = vsub.f32 1.0, %v1321_v28  ;;  %v1273_v38 = vmul.f32 %v7332_v54, %v1263_v40  ;;  %v1245_v57 = vadd.f32 -0.28449672, %v1235_v14  ;;  %v1226_v58 = vadd.f32 1.4214138, %v1216_v52 }
 0x2ab   : > { %v1350_v10 = vsub.f32 0.0, %v1330_v43  ;;  %v1322_v37 = vmul.f32 %v6019_v27, %v1272_v47  ;;  %v1254_v54 = vmul.f32 %v7342_v46, %v1244_v26  ;;  %v1227_v63 = vadd.f32 1.4214138, %v1217_v55 }
 0x2ac   : > { %v1351_v53 = vsub.f32 0.0, %v1331_v33  ;;  %v1323_v56 = vmul.f32 %v6021_v44, %v1273_v38  ;;  %v1255_v30 = vmul.f32 %v7345_v51, %v1245_v57  ;;  %v1236_v27 = vmul.f32 %v7356_v60, %v1226_v58 }
 0x2ad   : > { %v1360_v32 = vsel %vm1340_vm5, %v1330_v43, %v1350_v10  ;;  %v1332_v62 = vsub.f32 1.0, %v1322_v37  ;;  %v1264_v24 = vadd.f32 0.2548296, %v1254_v54  ;;  %v1237_v41 = vmul.f32 %v7365_v5, %v1227_v63 }
 0x2ae   : > { %v1380_v11 = vadd.f32 1.0, %v1360_v32  ;;  %v1361_v12 = vsel %vm1341_vm6, %v1331_v33, %v1351_v53  ;;  %v1333_v15 = vsub.f32 1.0, %v1323_v56  ;;  %v1265_v40 = vadd.f32 0.2548296, %v1255_v30 }
 0x2af   : > { %v1381_v19 = vadd.f32 1.0, %v1361_v12  ;;  %v1352_v23 = vsub.f32 0.0, %v1332_v62  ;;  %v1274_v44 = vmul.f32 %v7342_v46, %v1264_v24  ;;  %v1246_v43 = vadd.f32 -0.28449672, %v1236_v27 }
 0x2b0   : > { %v1390_v39 = vmul.f32 %v1380_v11, %v7298_v13  ;;  %v1353_v28 = vsub.f32 0.0, %v1333_v15  ;;  %v1275_v13 = vmul.f32 %v7345_v51, %v1265_v40  ;;  %v1247_v46 = vadd.f32 -0.28449672, %v1237_v41 }
 0x2b1   : > { %v1391_v42 = vmul.f32 %v1381_v19, %v7305_v18  ;;  %v1362_v0 = vsel %vm1342_vm7, %v1332_v62, %v1352_v23  ;;  %v1324_v14 = vmul.f32 %v6023_v50, %v1274_v44  ;;  %v1256_v18 = vmul.f32 %v7356_v60, %v1246_v43 }
 0x2b2   : > { %v1420_v47 = vrot.slane %v1390_v39, 7  ;;  %v1382_v49 = vadd.f32 1.0, %v1362_v0  ;;  %v1363_v6 = vsel %vm1343_vm8, %v1333_v15, %v1353_v28  ;;  %v1325_v52 = vmul.f32 %v6025_v35, %v1275_v13 }
 0x2b3   : > { %v1421_v33 = vrot.slane %v1391_v42, 7  ;;  %v1383_v38 = vadd.f32 1.0, %v1363_v6  ;;  %v1168_v10 = vadd.f32 1.0, %v7363_v4  ;;  %v1334_v37 = vsub.f32 1.0, %v1324_v14 }
 0x2b4   : > { %1448 = vst [vmem:[#allocation3] sm:$0xfe] %v1420_v47  ;;  %v1392_v45 = vmul.f32 %v1382_v49, %v7314_v22  ;;  %v1374_v51 = vmul.f32 0.5, %v7278_v61  ;;  %v1266_v26 = vadd.f32 0.2548296, %v1256_v18  ;;  %v1335_v53 = vsub.f32 1.0, %v1325_v52 }
 0x2b5   : > { %1449 = vst [vmem:[#allocation3 + $0x8] sm:$0xfe] %v1421_v33  ;;  %v1393_v48 = vmul.f32 %v1383_v38, %v7317_v25  ;;  %v1257_v50 = vmul.f32 %v7365_v5, %v1247_v46  ;;  %6030 = vrcp.f32 %v1168_v10  ;;  %v1354_v57 = vsub.f32 0.0, %v1334_v37 }
 0x2b6   : > { %v1422_v55 = vrot.slane %v1392_v45, 7  ;;  %v1276_v22 = vmul.f32 %v7356_v60, %v1266_v26  ;;  %v7409_v35 = vadd.f32 %v7259_v36, %v7300_v16  ;;  %v1355_v25 = vsub.f32 0.0, %v1335_v53  ;;  %v4432_v45 = vld [vmem:[%s9784_s2 + $0x638] sm:$0xff] }
 0x2b7   : > { %v1424_v56 = vrot.slane %v1393_v48, 7  ;;  %v1267_v58 = vadd.f32 0.2548296, %v1257_v50  ;;  %v1364_v62 = vsel %vm1344_vm9, %v1334_v37, %v1354_v57  ;;  %v1375_v54 = vmul.f32 0.5, %v7281_v1  ;;  %v4429_v57 = vld [vmem:[%s9784_s2 + $0x620] sm:$0xff] }
 0x2b8   : > { %v7412_v4 = vsel %vm376_vm1, %v1420_v47, %v1422_v55  ;;  %v1326_v60 = vmul.f32 %v6027_v59, %v1276_v22  ;;  %v1384_v63 = vadd.f32 1.0, %v1364_v62  ;;  %v1365_v11 = vsel %vm1345_vm11, %v1335_v53, %v1355_v25 }
 0x2b9   : > { %v7416_v32 = vsel %vm376_vm1, %v1421_v33, %v1424_v56  ;;  %v1277_v36 = vmul.f32 %v7365_v5, %v1267_v58  ;;  %v1288_v16 = vsub.f32 0.0, %v7353_v34  ;;  %v1385_v12 = vadd.f32 1.0, %v1365_v11 }
 0x2ba   : > { %v1336_v15 = vsub.f32 1.0, %v1326_v60  ;;  %v1139_v30 = vand.u32 2147483647, %v7409_v35  ;;  %v1394_v19 = vmul.f32 %v1384_v63, %v1374_v51  ;;  %v1376_v23 = vmul.f32 0.5, %v7308_v20  ;;  %v4430_v20 = vld [vmem:[%s9784_s2 + $0x628] sm:$0xff]  ;;  %v4436_v60 = vld [vmem:[%s9784_s2 + $0x658] sm:$0xff] }
 0x2bb   : > { %v1327_v61 = vmul.f32 %v7383_v8, %v1277_v36  ;;  %v1395_v59 = vmul.f32 %v1385_v12, %v1375_v54  ;;  %v1533_v39 = vld [vmem:[#allocation3] sm:$0xfe]  ;;  %v1298_v41 = vmul.f32 %v1288_v16, %v7353_v34  ;;  %v1616_v42 = vrot.slane %v7416_v32, 1  ;;  %v4434_v54 = vld [vmem:[%s9784_s2 + $0x648] sm:$0xff] }
 0x2bc   : > { %v1534_v1 = vld [vmem:[#allocation3 + $0x8] sm:$0xfe]  ;;  %v1356_v24 = vsub.f32 0.0, %v1336_v15  ;;  %v7428_v27 = vmul.f32 0.70710677, %v1139_v30  ;;  %v1404_v28 = vsel %vm526_vm10, %v1394_v19, 0.0  ;;  %v5400_v50 = vpack.c.bf16 %v4432_v45, %v4430_v20 }
 0x2bd   : > { %v1615_v5 = vrot.slane %v1534_v1, 1  ;;  %v1337_v40 = vsub.f32 1.0, %v1327_v61  ;;  %v1426_v0 = vrot.slane %v1404_v28, 7  ;;  %v1405_v8 = vsel %vm526_vm10, %v1395_v59, 0.0  ;;  %v4433_v19 = vld [vmem:[%s9784_s2 + $0x640] sm:$0xff]  ;;  %v4438_v1 = vld [vmem:[%s9784_s2 + $0x668] sm:$0xff] }
 0x2be   : > { %v1366_v44 = vsel %vm1346_vm12, %v1336_v15, %v1356_v24  ;;  %v1159_v43 = vmul.f32 0.3275911, %v7428_v27  ;;  %v1428_v49 = vrot.slane %v1405_v8, 7  ;;  %v1612_v33 = vrot.slane %v1533_v39, 1  ;;  %v4440_v59 = vld [vmem:[%s9784_s2 + $0x678] sm:$0xff]  ;;  %v4443_v20 = vld [vmem:[%s9784_s2 + $0x690] sm:$0xff] }
 0x2bf   : > { %v7439_v47 = vpop.eup %6030  ;;  %v1386_v6 = vadd.f32 1.0, %v1366_v44  ;;  %v1357_v13 = vsub.f32 0.0, %v1337_v40  ;;  %v7442_v38 = vsel %vm376_vm1, %v1422_v55, %v1426_v0  ;;  %v1617_v18 = vsel %vm682_vm3, %v1615_v5, %v1616_v42 }
 0x2c0   : > { %v1198_v34 = vmul.f32 1.0614054, %v7439_v47  ;;  %v1169_v14 = vadd.f32 1.0, %v1159_v43  ;;  %v7453_v52 = vsel %vm376_vm1, %v1424_v56, %v1428_v49  ;;  %v1377_v48 = vmul.f32 0.5, %v7311_v21  ;;  %1704 = vmatprep.mubr.f32.mxu1 %v1617_v18  ;;  %v4431_v21 = vld [vmem:[%s9784_s2 + $0x630] sm:$0xff]  ;;  %v4441_v18 = vld [vmem:[%s9784_s2 + $0x680] sm:$0xff] }
 0x2c1   : > { %v7455_v46 = vmul.f32 %v1386_v6, %v1376_v23  ;;  %v1367_v10 = vsel %vm1347_vm13, %v1337_v40, %v1357_v13  ;;  %v1613_v26 = vrot.slane %v7412_v4, 1  ;;  %v1316_v53 = vmul.f32 1.442695, %v1298_v41  ;;  %v4435_v23 = vld [vmem:[%s9784_s2 + $0x650] sm:$0xff]  ;;  %v4437_v41 = vld [vmem:[%s9784_s2 + $0x660] sm:$0xff]  ;;  %v4444_v6 = vld [vmem:[%s9784_s2 + $0x698] sm:$0xff] }
 0x2c2   : > { %v1387_v37 = vadd.f32 1.0, %v1367_v10  ;;  %v1208_v51 = vadd.f32 -1.4531521, %v1198_v34  ;;  %6032 = vrcp.f32 %v1169_v14  ;;  %v1620_v56 = vrot.slane %v7453_v52, 1 }
 0x2c3   : > { %v1430_v55 = vrot.slane %v7455_v46, 7  ;;  %v1614_v58 = vsel %vm682_vm3, %v1612_v33, %v1613_v26  ;;  %v1618_v62 = vrot.slane %v7442_v38, 1  ;;  %v5402_v12 = vpack.c.bf16 %v4431_v21, %v4429_v57  ;;  %v4447_v21 = vld [vmem:[%s9784_s2 + $0x6b0] sm:$0xff]  ;;  %v4464_v46 = vld [vmem:[%s9784_s2 + $0x738] sm:$0xff] }
 0x2c4   : > { %v7469_v22 = vmul.f32 %v1387_v37, %v1377_v48  ;;  %v1218_v25 = vmul.f32 %v7439_v47, %v1208_v51  ;;  %1705 = vmatmul.mubr.f32.vlgmr.msra.gmra.mrb[6].mxu1 %v1614_v58  ;;  %v1621_v11 = vsel %vm682_vm3, %v1616_v42, %v1620_v56  ;;  %6034 = vpow2.f32 %v1316_v53  ;;  %v4439_v42 = vld [vmem:[%s9784_s2 + $0x670] sm:$0xff]  ;;  %v4446_v48 = vld [vmem:[%s9784_s2 + $0x6a8] sm:$0xff]  ;;  %v4448_v37 = vld [vmem:[%s9784_s2 + $0x6b8] sm:$0xff] }
 0x2c5   : > { %v7483_v63 = vsel %vm376_vm1, %v1426_v0, %v1430_v55  ;;  %5399 = vmatpush1.bf16.msra.mxu1 %v5398_v17  ;;  %1710 = vmatprep.mubr.f32.mxu1 %v1621_v11  ;;  %v1289_v15 = vsub.f32 0.0, %v7428_v27  ;;  %v5404_v30 = vpack.c.bf16 %v4436_v60, %v4434_v54  ;;  %v1619_v17 = vsel %vm682_vm3, %v1613_v26, %v1618_v62  ;;  %v4450_v58 = vld [vmem:[%s9784_s2 + $0x6c8] sm:$0xff] }
 0x2c6   : > { %v1432_v36 = vrot.slane %v7469_v22, 7  ;;  %v1228_v16 = vadd.f32 1.4214138, %v1218_v25  ;;  %5401 = vmatprep.subr.bf16.mxu1 %v5400_v50  ;;  %v1622_v61 = vrot.slane %v7483_v63, 1  ;;  %v5406_v39 = vpack.c.bf16 %v4435_v23, %v4433_v19  ;;  %v4454_v23 = vld [vmem:[%s9784_s2 + $0x6e8] sm:$0xff]  ;;  %v4475_v22 = vld [vmem:[%s9784_s2 + $0x790] sm:$0xff] }
 0x2c7   : > { %v5408_v40 = vpack.c.bf16 %v4440_v59, %v4438_v1  ;;  %v1299_v44 = vmul.f32 %v1289_v15, %v7428_v27  ;;  %v5410_v34 = vpack.c.bf16 %v4439_v42, %v4437_v41  ;;  %v5414_v50 = vpack.c.bf16 %v4443_v20, %v4441_v18  ;;  %v4449_v15 = vld [vmem:[%s9784_s2 + $0x6c0] sm:$0xff]  ;;  %v4455_v42 = vld [vmem:[%s9784_s2 + $0x6f0] sm:$0xff] }
 0x2c8   : > { %v7500_v2 = vsel %vm376_vm1, %v1428_v49, %v1432_v36  ;;  %v1238_v3 = vmul.f32 %v7439_v47, %v1228_v16  ;;  %1711 = vmatmul.mubr.f32.gmra.mrb[8].mxu1 %v1619_v17  ;;  %v1623_v43 = vsel %vm682_vm3, %v1618_v62, %v1622_v61  ;;  %v4442_v49 = vld [vmem:[%s9784_s2 + $0x688] sm:$0xff]  ;;  %v5416_v57 = vpack.c.bf16 %v4448_v37, %v4446_v48  ;;  %v4452_v62 = vld [vmem:[%s9784_s2 + $0x6d8] sm:$0xff]  ;;  %v4453_v41 = vld [vmem:[%s9784_s2 + $0x6e0] sm:$0xff] }
 0x2c9   : > { %v1624_v24 = vrot.slane %v7500_v2, 1  ;;  %5403 = vmatpush1.bf16.msra.mxu1 %v5402_v12  ;;  %v5412_v27 = vpack.c.bf16 %v4444_v6, %v4442_v49  ;;  %v1318_v10 = vmul.f32 1.442695, %v1299_v44  ;;  %v5420_v12 = vpack.c.bf16 %v4452_v62, %v4450_v58  ;;  %v4463_v48 = vld [vmem:[%s9784_s2 + $0x730] sm:$0xff]  ;;  %v4466_v37 = vld [vmem:[%s9784_s2 + $0x748] sm:$0xff] }
 0x2ca   : > { %v1248_v5 = vadd.f32 -0.28449672, %v1238_v3  ;;  %5405 = vmatprep.subr.bf16.mxu1 %v5404_v30  ;;  %v4451_v30 = vld [vmem:[%s9784_s2 + $0x6d0] sm:$0xff]  ;;  %v4456_v3 = vld [vmem:[%s9784_s2 + $0x6f8] sm:$0xff]  ;;  %v1378_v17 = vmul.f32 0.5, %v7328_v7  ;;  %v4458_v7 = vld [vmem:[%s9784_s2 + $0x708] sm:$0xff]  ;;  %v5426_v6 = vpack.c.bf16 %v4455_v42, %v4453_v41 }
 0x2cb   : > { %v1625_v28 = vsel %vm682_vm3, %v1620_v56, %v1624_v24  ;;  %6036 = vpow2.f32 %v1318_v10  ;;  %v4461_v10 = vld [vmem:[%s9784_s2 + $0x720] sm:$0xff]  ;;  %vm1349_vm15 = vcmp.ge.f32.partialorder %v7409_v35, 0.0  ;;  %v4470_v58 = vld [vmem:[%s9784_s2 + $0x768] sm:$0xff] }
 0x2cc   : > { %v6033_v0 = vpop.eup %6032  ;;  %v1258_v8 = vmul.f32 %v7439_v47, %v1248_v5  ;;  %1716 = vmatprep.mubr.f32.mxu1 %v1625_v28  ;;  %v5422_v5 = vpack.c.bf16 %v4451_v30, %v4449_v15  ;;  %v4474_v15 = vld [vmem:[%s9784_s2 + $0x788] sm:$0xff]  ;;  %v4476_v30 = vld [vmem:[%s9784_s2 + $0x798] sm:$0xff] }
 0x2cd   : > { %v1199_v13 = vmul.f32 1.0614054, %v6033_v0  ;;  %1717 = vmatmul.mubr.f32.gmra.mrb[10].mxu1 %v1623_v43  ;;  %v4482_v42 = vld [vmem:[%s9784_s2 + $0x7c8] sm:$0xff] }
 0x2ce   : > { %v1268_v33 = vadd.f32 0.2548296, %v1258_v8  ;;  %5407 = vmatpush1.bf16.msra.mxu1 %v5406_v39  ;;  %v6035_v51 = vpop.eup %6034  ;;  %v4460_v8 = vld [vmem:[%s9784_s2 + $0x718] sm:$0xff] }
 0x2cf   : > { %v1209_v14 = vadd.f32 -1.4531521, %v1199_v13  ;;  %5409 = vmatprep.subr.bf16.mxu1 %v5408_v40  ;;  %v5424_v40 = vpack.c.bf16 %v4456_v3, %v4454_v23  ;;  %v5444_v23 = vpack.c.bf16 %v4476_v30, %v4474_v15  ;;  %v4473_v3 = vld [vmem:[%s9784_s2 + $0x780] sm:$0xff]  ;;  %v4567_v15 = vld [vmem:[%s9784_s2 + $0xa70] sm:$0xff]  ;;  %v4570_v30 = vld [vmem:[%s9784_s2 + $0xa88] sm:$0xff] }
 0x2d0   : > { %v1278_v45 = vmul.f32 %v7439_v47, %v1268_v33  ;;  %v4445_v47 = vld [vmem:[%s9784_s2 + $0x6a0] sm:$0xff] }
 0x2d1   : > { %v1219_v26 = vmul.f32 %v6033_v0, %v1209_v14  ;;  %v5418_v11 = vpack.c.bf16 %v4447_v21, %v4445_v47  ;;  %v4457_v14 = vld [vmem:[%s9784_s2 + $0x700] sm:$0xff]  ;;  %v4467_v21 = vld [vmem:[%s9784_s2 + $0x750] sm:$0xff] }
 0x2d2   : > { %v1328_v53 = vmul.f32 %v6035_v51, %v1278_v45  ;;  %5411 = vmatpush1.bf16.msra.mxu1 %v5410_v34  ;;  %v5428_v34 = vpack.c.bf16 %v4460_v8, %v4458_v7  ;;  %v4468_v51 = vld [vmem:[%s9784_s2 + $0x758] sm:$0xff]  ;;  %v4465_v47 = vld [vmem:[%s9784_s2 + $0x740] sm:$0xff] }
 0x2d3   : > { %v1229_v56 = vadd.f32 1.4214138, %v1219_v26  ;;  %5413 = vmatprep.subr.bf16.mxu1 %v5412_v27  ;;  %v4459_v27 = vld [vmem:[%s9784_s2 + $0x710] sm:$0xff]  ;;  %v4484_v7 = vld [vmem:[%s9784_s2 + $0x7d8] sm:$0xff] }
 0x2d4   : > { %v1338_v25 = vsub.f32 1.0, %v1328_v53  ;;  %v5430_v18 = vpack.c.bf16 %v4459_v27, %v4457_v14  ;;  %v1379_v53 = vmul.f32 0.5, %v7409_v35  ;;  %v4472_v35 = vld [vmem:[%s9784_s2 + $0x778] sm:$0xff] }
 0x2d5   : > { %v1239_v54 = vmul.f32 %v6033_v0, %v1229_v56  ;;  %v6037_v49 = vpop.eup %6036  ;;  %v5434_v56 = vpack.c.bf16 %v4463_v48, %v4461_v10  ;;  %v4553_v10 = vld [vmem:[%s9784_s2 + $0xa00] sm:$0xff]  ;;  %v4555_v48 = vld [vmem:[%s9784_s2 + $0xa10] sm:$0xff] }
 0x2d6   : > { %v1358_v60 = vsub.f32 0.0, %v1338_v25  ;;  %5415 = vmatpush1.bf16.msra.mxu1 %v5414_v50 }
 0x2d7   : > { %v1249_v16 = vadd.f32 -0.28449672, %v1239_v54  ;;  %5417 = vmatprep.subr.bf16.mxu1 %v5416_v57  ;;  %v5436_v57 = vpack.c.bf16 %v4468_v51, %v4466_v37  ;;  %v5438_v54 = vpack.c.bf16 %v4467_v21, %v4465_v47  ;;  %v4558_v37 = vld [vmem:[%s9784_s2 + $0xa28] sm:$0xff]  ;;  %v4560_v51 = vld [vmem:[%s9784_s2 + $0xa38] sm:$0xff] }
 0x2d8   : > { %v1368_v19 = vsel %vm1348_vm14, %v1338_v25, %v1358_v60  ;;  %v5440_v60 = vpack.c.bf16 %v4472_v35, %v4470_v58  ;;  %v4562_v47 = vld [vmem:[%s9784_s2 + $0xa48] sm:$0xff]  ;;  %v4564_v21 = vld [vmem:[%s9784_s2 + $0xa58] sm:$0xff]  ;;  %v4561_v35 = vld [vmem:[%s9784_s2 + $0xa40] sm:$0xff] }
 0x2d9   : > { %v1388_v1 = vadd.f32 1.0, %v1368_v19  ;;  %v1259_v59 = vmul.f32 %v6033_v0, %v1249_v16  ;;  %v4471_v16 = vld [vmem:[%s9784_s2 + $0x770] sm:$0xff]  ;;  %v5468_v58 = vpack.c.bf16 %v4564_v21, %v4562_v47  ;;  %v4596_v47 = vld [vmem:[%s9784_s2 + $0xb58] sm:$0xff] }
 0x2da   : > { %5419 = vmatpush1.bf16.msra.mxu1 %v5418_v11  ;;  %v4469_v11 = vld [vmem:[%s9784_s2 + $0x760] sm:$0xff] }
 0x2db   : > { %v1398_v39 = vmul.f32 %v1388_v1, %v1378_v17  ;;  %v1269_v28 = vadd.f32 0.2548296, %v1259_v59  ;;  %5421 = vmatprep.subr.bf16.mxu1 %v5420_v12  ;;  %v5442_v19 = vpack.c.bf16 %v4471_v16, %v4469_v11  ;;  %v4480_v17 = vld [vmem:[%s9784_s2 + $0x7b8] sm:$0xff]  ;;  %v5446_v59 = vpack.c.bf16 %v4475_v22, %v4473_v3 }
 0x2dc   : > { %v1831_v3 = vld [vmem:[#allocation3 + $0x8] sm:$0xfc] }
 0x2dd   : > { %v1434_v44 = vrot.slane %v1398_v39, 7  ;;  %v1279_v43 = vmul.f32 %v6033_v0, %v1269_v28  ;;  %v4462_v0 = vld [vmem:[%s9784_s2 + $0x728] sm:$0xff]  ;;  %v4477_v39 = vld [vmem:[%s9784_s2 + $0x7a0] sm:$0xff]  ;;  %v4479_v28 = vld [vmem:[%s9784_s2 + $0x7b0] sm:$0xff] }
 0x2de   : > { %5423 = vmatpush1.bf16.msra.mxu1 %v5422_v5  ;;  %v5432_v45 = vpack.c.bf16 %v4464_v46, %v4462_v0  ;;  %v4485_v0 = vld [vmem:[%s9784_s2 + $0x7e0] sm:$0xff]  ;;  %v4554_v46 = vld [vmem:[%s9784_s2 + $0xa08] sm:$0xff] }
 0x2df   : > { %v1435_v13 = vsel %vm376_vm1, %v1430_v55, %v1434_v44  ;;  %v1329_v33 = vmul.f32 %v6037_v49, %v1279_v43  ;;  %5425 = vmatprep.subr.bf16.mxu1 %v5424_v40  ;;  %v5450_v44 = vpack.c.bf16 %v4479_v28, %v4477_v39  ;;  %v5452_v49 = vpack.c.bf16 %v4484_v7, %v4482_v42  ;;  %v4573_v42 = vld [vmem:[%s9784_s2 + $0xaa0] sm:$0xff]  ;;  %v4575_v7 = vld [vmem:[%s9784_s2 + $0xab0] sm:$0xff] }
 0x2e0   : > { %1456 = vst [vmem:[#allocation3 + $0x40] sm:$0xf] %v1435_v13  ;;  %v4483_v13 = vld [vmem:[%s9784_s2 + $0x7d0] sm:$0xff]  ;;  %v1906_v39 = vrot.slane %v1831_v3, 2  ;;  %v4601_v3 = vld [vmem:[%s9784_s2 + $0xb80] sm:$0xff] }
 0x2e1   : > { %v1339_v55 = vsub.f32 1.0, %v1329_v33 }
 0x2e2   : > { %5427 = vmatpush1.bf16.msra.mxu1 %v5426_v6  ;;  %v4481_v6 = vld [vmem:[%s9784_s2 + $0x7c0] sm:$0xff] }
 0x2e3   : > { %v1359_v20 = vsub.f32 0.0, %v1339_v55  ;;  %5429 = vmatprep.subr.bf16.mxu1 %v5428_v34  ;;  %v4486_v34 = vld [vmem:[%s9784_s2 + $0x7e8] sm:$0xff]  ;;  %v5454_v14 = vpack.c.bf16 %v4483_v13, %v4481_v6  ;;  %v5482_v6 = vpack.c.bf16 %v4575_v7, %v4573_v42 }
 0x2e5   : > { %v1369_v26 = vsel %vm1349_vm15, %v1339_v55, %v1359_v20  ;;  %v4556_v55 = vld [vmem:[%s9784_s2 + $0xa18] sm:$0xff] }
 0x2e6   : > { %v1389_v50 = vadd.f32 1.0, %v1369_v26  ;;  %5431 = vmatpush1.bf16.msra.mxu1 %v5430_v18  ;;  %v1459_v18 = vld [vmem:[#allocation3 + $0x8] sm:$0xff]  ;;  %v5462_v26 = vpack.c.bf16 %v4555_v48, %v4553_v10  ;;  %v4585_v10 = vld [vmem:[%s9784_s2 + $0xb00] sm:$0xff]  ;;  %v4587_v48 = vld [vmem:[%s9784_s2 + $0xb10] sm:$0xff] }
 0x2e7   : > { %5433 = vmatprep.subr.bf16.mxu1 %v5432_v45  ;;  %v1535_v1 = vld [vmem:[#allocation3 + $0x40] sm:$0xf]  ;;  %v5460_v45 = vpack.c.bf16 %v4556_v55, %v4554_v46  ;;  %v4586_v55 = vld [vmem:[%s9784_s2 + $0xb08] sm:$0xff] }
 0x2e8   : > { %v1399_v25 = vmul.f32 %v1389_v50, %v1379_v53  ;;  %v1626_v41 = vrot.slane %v1535_v1, 1  ;;  %v5464_v53 = vpack.c.bf16 %v4560_v51, %v4558_v37  ;;  %v4557_v50 = vld [vmem:[%s9784_s2 + $0xa20] sm:$0xff]  ;;  %v4574_v1 = vld [vmem:[%s9784_s2 + $0xaa8] sm:$0xff]  ;;  %v4583_v46 = vld [vmem:[%s9784_s2 + $0xaf0] sm:$0xff] }
 0x2e9   : > { %v4590_v37 = vld [vmem:[%s9784_s2 + $0xb28] sm:$0xff]  ;;  %v4592_v51 = vld [vmem:[%s9784_s2 + $0xb38] sm:$0xff] }
 0x2ea   : > { %v1436_v62 = vrot.slane %v1399_v25, 7  ;;  %5435 = vmatpush1.bf16.msra.mxu1 %v5434_v56  ;;  %v1627_v33 = vsel %vm682_vm3, %v1622_v61, %v1626_v41  ;;  %v4487_v61 = vld [vmem:[%s9784_s2 + $0x7f0] sm:$0xff] }
 0x2eb   : > { %5437 = vmatprep.subr.bf16.mxu1 %v5436_v57  ;;  %v5458_v20 = vpack.c.bf16 %v4487_v61, %v4485_v0  ;;  %v4559_v56 = vld [vmem:[%s9784_s2 + $0xa30] sm:$0xff]  ;;  %v4581_v61 = vld [vmem:[%s9784_s2 + $0xae0] sm:$0xff] }
 0x2ec   : > { %v1437_v12 = vsel %vm376_vm1, %v1432_v36, %v1436_v62  ;;  %v4478_v36 = vld [vmem:[%s9784_s2 + $0x7a8] sm:$0xff]  ;;  %v1458_v57 = vld [vmem:[#allocation3] sm:$0xff]  ;;  %v5466_v25 = vpack.c.bf16 %v4559_v56, %v4557_v50  ;;  %v4589_v50 = vld [vmem:[%s9784_s2 + $0xb20] sm:$0xff] }
 0x2ed   : > { %1457 = vst [vmem:[#allocation3 + $0x48] sm:$0xf] %v1437_v12  ;;  %v5448_v5 = vpack.c.bf16 %v4480_v17, %v4478_v36  ;;  %v4563_v62 = vld [vmem:[%s9784_s2 + $0xa50] sm:$0xff]  ;;  %v4565_v12 = vld [vmem:[%s9784_s2 + $0xa60] sm:$0xff] }
 0x2ee   : > { %5439 = vmatpush1.bf16.msra.mxu1 %v5438_v54  ;;  %v4566_v54 = vld [vmem:[%s9784_s2 + $0xa68] sm:$0xff]  ;;  %v5470_v11 = vpack.c.bf16 %v4563_v62, %v4561_v35  ;;  %v4569_v36 = vld [vmem:[%s9784_s2 + $0xa80] sm:$0xff]  ;;  %v4571_v17 = vld [vmem:[%s9784_s2 + $0xa90] sm:$0xff] }
 0x2ef   : > { %5441 = vmatprep.subr.bf16.mxu1 %v5440_v60  ;;  %v4568_v60 = vld [vmem:[%s9784_s2 + $0xa78] sm:$0xff]  ;;  %v5478_v28 = vpack.c.bf16 %v4571_v17, %v4569_v36  ;;  %v4591_v56 = vld [vmem:[%s9784_s2 + $0xb30] sm:$0xff]  ;;  %v4598_v62 = vld [vmem:[%s9784_s2 + $0xb68] sm:$0xff] }
 0x2f0   : > { %v5472_v16 = vpack.c.bf16 %v4568_v60, %v4566_v54  ;;  %v5498_v21 = vpack.c.bf16 %v4591_v56, %v4589_v50  ;;  %v4595_v35 = vld [vmem:[%s9784_s2 + $0xb50] sm:$0xff]  ;;  %v4600_v54 = vld [vmem:[%s9784_s2 + $0xb78] sm:$0xff]  ;;  %v4606_v36 = vld [vmem:[%s9784_s2 + $0xba8] sm:$0xff] }
 0x2f1   : > { %v4608_v17 = vld [vmem:[%s9784_s2 + $0xbb8] sm:$0xff]  ;;  %v4684_v50 = vld [vmem:[%s9784_s2 + $0xe10] sm:$0xff] }
 0x2f2   : > { %5443 = vmatpush1.bf16.msra.mxu1 %v5442_v19  ;;  %v4572_v19 = vld [vmem:[%s9784_s2 + $0xa98] sm:$0xff] }
 0x2f3   : > { %5445 = vmatprep.subr.bf16.mxu1 %v5444_v23  ;;  %v5474_v23 = vpack.c.bf16 %v4567_v15, %v4565_v12  ;;  %v5476_v22 = vpack.c.bf16 %v4572_v19, %v4570_v30  ;;  %v4599_v12 = vld [vmem:[%s9784_s2 + $0xb70] sm:$0xff]  ;;  %v4602_v15 = vld [vmem:[%s9784_s2 + $0xb88] sm:$0xff]  ;;  %v4604_v30 = vld [vmem:[%s9784_s2 + $0xb98] sm:$0xff] }
 0x2f4   : > { %v1536_v40 = vld [vmem:[#allocation3 + $0x48] sm:$0xf] }
 0x2f5   : > { %v1628_v8 = vrot.slane %v1536_v40, 1  ;;  %v1907_v40 = vrot.slane %v7416_v32, 2 }
 0x2f6   : > { %5447 = vmatpush1.bf16.msra.mxu1 %v5446_v59  ;;  %v4576_v59 = vld [vmem:[%s9784_s2 + $0xab8] sm:$0xff] }
 0x2f7   : > { %v1629_v43 = vsel %vm682_vm3, %v1624_v24, %v1628_v8  ;;  %5449 = vmatprep.subr.bf16.mxu1 %v5448_v5  ;;  %v4488_v24 = vld [vmem:[%s9784_s2 + $0x7f8] sm:$0xff] }
 0x2f8   : > { %1722 = vmatprep.mubr.f32.mxu1 %v1629_v43  ;;  %v5456_v27 = vpack.c.bf16 %v4488_v24, %v4486_v34  ;;  %v1467_v5 = vld [vmem:[#allocation3 + $0x48] sm:$0x7]  ;;  %v4579_v34 = vld [vmem:[%s9784_s2 + $0xad0] sm:$0xff]  ;;  %v4582_v24 = vld [vmem:[%s9784_s2 + $0xae8] sm:$0xff] }
 0x2f9   : > { %1723 = vmatmul.mubr.f32.gmra.mrb[12].mxu1 %v1627_v33  ;;  %v4580_v43 = vld [vmem:[%s9784_s2 + $0xad8] sm:$0xff]  ;;  %v4577_v33 = vld [vmem:[%s9784_s2 + $0xac0] sm:$0xff] }
 0x2fa   : > { %1728 = vmatprep.mubr.f32.mxu1 %v1628_v8  ;;  %5451 = vmatpush1.bf16.msra.mxu1 %v5450_v44  ;;  %v1466_v8 = vld [vmem:[#allocation3 + $0x40] sm:$0x7]  ;;  %v4578_v44 = vld [vmem:[%s9784_s2 + $0xac8] sm:$0xff] }
 0x2fb   : > { %5453 = vmatprep.subr.bf16.mxu1 %v5452_v49  ;;  %v1908_v49 = vsel %vm974_vm4, %v1906_v39, %v1907_v40  ;;  %v5484_v13 = vpack.c.bf16 %v4580_v43, %v4578_v44  ;;  %v4607_v39 = vld [vmem:[%s9784_s2 + $0xbb0] sm:$0xff]  ;;  %v4614_v43 = vld [vmem:[%s9784_s2 + $0xbe8] sm:$0xff] }
 0x2fc   : > { %v4611_v44 = vld [vmem:[%s9784_s2 + $0xbd0] sm:$0xff] }
 0x2fd   : > { %1729 = vmatmul.mubr.f32.gmra.mrb[14].mxu1 %v1626_v41  ;;  %v5480_v41 = vpack.c.bf16 %v4576_v59, %v4574_v1  ;;  %v5512_v59 = vpack.c.bf16 %v4608_v17, %v4606_v36  ;;  %v4699_v36 = vld [vmem:[%s9784_s2 + $0xe88] sm:$0xff]  ;;  %v4701_v17 = vld [vmem:[%s9784_s2 + $0xe98] sm:$0xff] }
 0x2fe   : > { %1799 = vmatprep.mubr.f32.mxu1 %v1459_v18  ;;  %5455 = vmatpush1.bf16.msra.mxu1 %v5454_v14  ;;  %v4584_v14 = vld [vmem:[%s9784_s2 + $0xaf8] sm:$0xff] }
 0x2ff   : > { %5457 = vmatprep.subr.bf16.mxu1 %v5456_v27  ;;  %v5486_v27 = vpack.c.bf16 %v4579_v34, %v4577_v33  ;;  %v5488_v0 = vpack.c.bf16 %v4584_v14, %v4582_v24  ;;  %v4588_v18 = vld [vmem:[%s9784_s2 + $0xb18] sm:$0xff]  ;;  %v4613_v33 = vld [vmem:[%s9784_s2 + $0xbe0] sm:$0xff]  ;;  %v4615_v34 = vld [vmem:[%s9784_s2 + $0xbf0] sm:$0xff] }
 0x300   : > { %v1830_v24 = vld [vmem:[#allocation3] sm:$0xfc]  ;;  %v5522_v14 = vpack.c.bf16 %v4615_v34, %v4613_v33 }
 0x301   : > { %v4708_v33 = vld [vmem:[%s9784_s2 + $0xed0] sm:$0xff] }
 0x302   : > { %5459 = vmatpush1.bf16.msra.mxu1 %v5458_v20  ;;  %v5490_v20 = vpack.c.bf16 %v4583_v46, %v4581_v61  ;;  %v1904_v61 = vrot.slane %v7412_v4, 2 }
 0x303   : > { %5461 = vmatprep.subr.bf16.mxu1 %v5460_v45  ;;  %v5492_v45 = vpack.c.bf16 %v4588_v18, %v4586_v55  ;;  %v1909_v55 = vrot.slane %v7442_v38, 2 }
 0x305   : > { %1800 = vmatmul.mubr.f32.vlgmr.msra.gmra.mrb[6].mxu1 %v1458_v57  ;;  %v4594_v57 = vld [vmem:[%s9784_s2 + $0xb48] sm:$0xff] }
 0x306   : > { %1805 = vmatprep.mubr.f32.mxu1 %v7416_v32  ;;  %5463 = vmatpush1.bf16.msra.mxu1 %v5462_v26  ;;  %v5494_v26 = vpack.c.bf16 %v4587_v48, %v4585_v10  ;;  %v1910_v10 = vsel %vm974_vm4, %v1904_v61, %v1909_v55 }
 0x307   : > { %5465 = vmatprep.subr.bf16.mxu1 %v5464_v53  ;;  %v5496_v53 = vpack.c.bf16 %v4592_v51, %v4590_v37  ;;  %v1832_v37 = vld [vmem:[#allocation3 + $0x40] sm:$0x1f] }
 0x308   : > { %v1917_v51 = vrot.slane %v1832_v37, 2 }
 0x309   : > { %1806 = vmatmul.mubr.f32.gmra.mrb[8].mxu1 %v7412_v4 }
 0x30a   : > { %1811 = vmatprep.mubr.f32.mxu1 %v7453_v52  ;;  %5467 = vmatpush1.bf16.msra.mxu1 %v5466_v25  ;;  %v5500_v25 = vpack.c.bf16 %v4596_v47, %v4594_v57  ;;  %v4687_v57 = vld [vmem:[%s9784_s2 + $0xe28] sm:$0xff]  ;;  %v4689_v47 = vld [vmem:[%s9784_s2 + $0xe38] sm:$0xff] }
 0x30b   : > { %5469 = vmatprep.subr.bf16.mxu1 %v5468_v58  ;;  %v4593_v58 = vld [vmem:[%s9784_s2 + $0xb40] sm:$0xff] }
 0x30c   : > { %v5502_v60 = vpack.c.bf16 %v4595_v35, %v4593_v58  ;;  %v4688_v58 = vld [vmem:[%s9784_s2 + $0xe30] sm:$0xff] }
 0x30d   : > { %1812 = vmatmul.mubr.f32.gmra.mrb[10].mxu1 %v7442_v38 }
 0x30e   : > { %1817 = vmatprep.mubr.f32.mxu1 %v7500_v2  ;;  %5471 = vmatpush1.bf16.msra.mxu1 %v5470_v11  ;;  %v5504_v11 = vpack.c.bf16 %v4600_v54, %v4598_v62  ;;  %v4691_v62 = vld [vmem:[%s9784_s2 + $0xe48] sm:$0xff]  ;;  %v4693_v54 = vld [vmem:[%s9784_s2 + $0xe58] sm:$0xff] }
 0x30f   : > { %5473 = vmatprep.subr.bf16.mxu1 %v5472_v16  ;;  %v4597_v16 = vld [vmem:[%s9784_s2 + $0xb60] sm:$0xff] }
 0x310   : > { %v5506_v19 = vpack.c.bf16 %v4599_v12, %v4597_v16  ;;  %v4692_v16 = vld [vmem:[%s9784_s2 + $0xe50] sm:$0xff] }
 0x311   : > { %1818 = vmatmul.mubr.f32.gmra.mrb[12].mxu1 %v7483_v63 }
 0x312   : > { %1823 = vmatprep.mubr.f32.mxu1 %v1467_v5  ;;  %5475 = vmatpush1.bf16.msra.mxu1 %v5474_v23  ;;  %v5508_v23 = vpack.c.bf16 %v4604_v30, %v4602_v15  ;;  %v4605_v5 = vld [vmem:[%s9784_s2 + $0xba0] sm:$0xff]  ;;  %v4695_v15 = vld [vmem:[%s9784_s2 + $0xe68] sm:$0xff]  ;;  %v4697_v30 = vld [vmem:[%s9784_s2 + $0xe78] sm:$0xff] }
 0x313   : > { %5477 = vmatprep.subr.bf16.mxu1 %v5476_v22  ;;  %v4603_v22 = vld [vmem:[%s9784_s2 + $0xb90] sm:$0xff]  ;;  %v5514_v42 = vpack.c.bf16 %v4607_v39, %v4605_v5 }
 0x314   : > { %v5510_v1 = vpack.c.bf16 %v4603_v22, %v4601_v3  ;;  %v4696_v3 = vld [vmem:[%s9784_s2 + $0xe70] sm:$0xff] }
 0x315   : > { %1824 = vmatmul.mubr.f32.gmra.mrb[14].mxu1 %v1466_v8  ;;  %v4609_v8 = vld [vmem:[%s9784_s2 + $0xbc0] sm:$0xff]  ;;  %v4700_v5 = vld [vmem:[%s9784_s2 + $0xe90] sm:$0xff] }
 0x316   : > { %5479 = vmatpush1.bf16.msra.mxu1 %v5478_v28  ;;  %1995 = vmatprep.mubr.f32.mxu1 %v1908_v49  ;;  %v4610_v28 = vld [vmem:[%s9784_s2 + $0xbc8] sm:$0xff]  ;;  %v4616_v49 = vld [vmem:[%s9784_s2 + $0xbf8] sm:$0xff] }
 0x317   : > { %5481 = vmatprep.subr.bf16.mxu1 %v5480_v41  ;;  %v4612_v41 = vld [vmem:[%s9784_s2 + $0xbd8] sm:$0xff] }
 0x318   : > { %v5516_v7 = vpack.c.bf16 %v4612_v41, %v4610_v28  ;;  %v4703_v28 = vld [vmem:[%s9784_s2 + $0xea8] sm:$0xff]  ;;  %v4705_v41 = vld [vmem:[%s9784_s2 + $0xeb8] sm:$0xff] }
 0x31a   : > { %5483 = vmatpush1.bf16.msra.mxu1 %v5482_v6  ;;  %v5518_v6 = vpack.c.bf16 %v4611_v44, %v4609_v8  ;;  %v4704_v8 = vld [vmem:[%s9784_s2 + $0xeb0] sm:$0xff] }
 0x31b   : > { %5485 = vmatprep.subr.bf16.mxu1 %v5484_v13  ;;  %v5520_v13 = vpack.c.bf16 %v4616_v49, %v4614_v43  ;;  %v4707_v43 = vld [vmem:[%s9784_s2 + $0xec8] sm:$0xff]  ;;  %v4709_v49 = vld [vmem:[%s9784_s2 + $0xed8] sm:$0xff] }
 0x31e   : > { %5487 = vmatpush1.bf16.msra.mxu1 %v5486_v27  ;;  %v1903_v27 = vrot.slane %v1830_v24, 2  ;;  %v4711_v24 = vld [vmem:[%s9784_s2 + $0xee8] sm:$0xff] }
 0x31f   : > { %5489 = vmatprep.subr.bf16.mxu1 %v5488_v0  ;;  %v1911_v0 = vrot.slane %v7453_v52, 2  ;;  %v1913_v52 = vrot.slane %v7483_v63, 2  ;;  %v4683_v63 = vld [vmem:[%s9784_s2 + $0xe08] sm:$0xff] }
 0x320   : > { %v1905_v46 = vsel %vm974_vm4, %v1903_v27, %v1904_v61  ;;  %v4712_v61 = vld [vmem:[%s9784_s2 + $0xef0] sm:$0xff] }
 0x321   : > { %v1912_v18 = vsel %vm974_vm4, %v1907_v40, %v1911_v0  ;;  %v1914_v38 = vsel %vm974_vm4, %v1909_v55, %v1913_v52  ;;  %v4685_v40 = vld [vmem:[%s9784_s2 + $0xe18] sm:$0xff]  ;;  %v4715_v55 = vld [vmem:[%s9784_s2 + $0xf08] sm:$0xff] }
 0x322   : > { %5491 = vmatpush1.bf16.msra.mxu1 %v5490_v20  ;;  %v1915_v20 = vrot.slane %v7500_v2, 2  ;;  %v1918_v2 = vsel %vm974_vm4, %v1913_v52, %v1917_v51 }
 0x323   : > { %5493 = vmatprep.subr.bf16.mxu1 %v5492_v45  ;;  %v1833_v45 = vld [vmem:[#allocation3 + $0x48] sm:$0x1f] }
 0x324   : > { %v1916_v4 = vsel %vm974_vm4, %v1911_v0, %v1915_v20  ;;  %v1919_v48 = vrot.slane %v1833_v45, 2  ;;  %v4710_v0 = vld [vmem:[%s9784_s2 + $0xee0] sm:$0xff] }
 0x325   : > { %v4714_v45 = vld [vmem:[%s9784_s2 + $0xf00] sm:$0xff] }
 0x326   : > { %5495 = vmatpush1.bf16.msra.mxu1 %v5494_v26  ;;  %v1920_v32 = vsel %vm974_vm4, %v1915_v20, %v1919_v48  ;;  %v5524_v26 = vpack.c.bf16 %v4685_v40, %v4683_v63  ;;  %v4725_v63 = vld [vmem:[%s9784_s2 + $0xf58] sm:$0xff] }
 0x327   : > { %5497 = vmatprep.subr.bf16.mxu1 %v5496_v53  ;;  %v4682_v53 = vld [vmem:[%s9784_s2 + $0xe00] sm:$0xff] }
 0x328   : > { %v5526_v56 = vpack.c.bf16 %v4684_v50, %v4682_v53  ;;  %5525 = vmatprep.subr.bf16.mxu0 %v5524_v26  ;;  %v4722_v26 = vld [vmem:[%s9784_s2 + $0xf40] sm:$0xff]  ;;  %v4724_v53 = vld [vmem:[%s9784_s2 + $0xf50] sm:$0xff] }
 0x329   : > { %v5566_v50 = vpack.c.bf16 %v4724_v53, %v4722_v26 }
 0x32a   : > { %5499 = vmatpush1.bf16.msra.mxu1 %v5498_v21  ;;  %5527 = vmatpush1.bf16.msra.mxu0 %v5526_v56  ;;  %v5528_v21 = vpack.c.bf16 %v4689_v47, %v4687_v57  ;;  %v4727_v56 = vld [vmem:[%s9784_s2 + $0xf68] sm:$0xff]  ;;  %v4729_v57 = vld [vmem:[%s9784_s2 + $0xf78] sm:$0xff] }
 0x32b   : > { %5501 = vmatprep.subr.bf16.mxu1 %v5500_v25  ;;  %v4686_v25 = vld [vmem:[%s9784_s2 + $0xe20] sm:$0xff]  ;;  %v5568_v47 = vpack.c.bf16 %v4729_v57, %v4727_v56 }
 0x32c   : > { %v5530_v35 = vpack.c.bf16 %v4688_v58, %v4686_v25  ;;  %5529 = vmatprep.subr.bf16.mxu0 %v5528_v21  ;;  %v4726_v21 = vld [vmem:[%s9784_s2 + $0xf60] sm:$0xff]  ;;  %v4728_v25 = vld [vmem:[%s9784_s2 + $0xf70] sm:$0xff] }
 0x32d   : > { %v5570_v58 = vpack.c.bf16 %v4728_v25, %v4726_v21 }
 0x32e   : > { %5503 = vmatpush1.bf16.msra.mxu1 %v5502_v60  ;;  %5531 = vmatpush1.bf16.msra.mxu0 %v5530_v35  ;;  %v5532_v60 = vpack.c.bf16 %v4693_v54, %v4691_v62  ;;  %v4731_v35 = vld [vmem:[%s9784_s2 + $0xf88] sm:$0xff]  ;;  %v4733_v62 = vld [vmem:[%s9784_s2 + $0xf98] sm:$0xff] }
 0x32f   : > { %5505 = vmatprep.subr.bf16.mxu1 %v5504_v11  ;;  %v4690_v11 = vld [vmem:[%s9784_s2 + $0xe40] sm:$0xff]  ;;  %v5572_v54 = vpack.c.bf16 %v4733_v62, %v4731_v35 }
 0x330   : > { %v5534_v12 = vpack.c.bf16 %v4692_v16, %v4690_v11  ;;  %5533 = vmatprep.subr.bf16.mxu0 %v5532_v60  ;;  %v4730_v60 = vld [vmem:[%s9784_s2 + $0xf80] sm:$0xff]  ;;  %v4732_v11 = vld [vmem:[%s9784_s2 + $0xf90] sm:$0xff] }
 0x331   : > { %v5574_v16 = vpack.c.bf16 %v4732_v11, %v4730_v60  ;;  %v8135_v11 = vld [vmem:[%s9784_s2 + $0xc00] sm:$0xff] }
 0x332   : > { %5507 = vmatpush1.bf16.msra.mxu1 %v5506_v19  ;;  %5535 = vmatpush1.bf16.msra.mxu0 %v5534_v12  ;;  %v5536_v19 = vpack.c.bf16 %v4697_v30, %v4695_v15  ;;  %v4735_v12 = vld [vmem:[%s9784_s2 + $0xfa8] sm:$0xff]  ;;  %v4737_v15 = vld [vmem:[%s9784_s2 + $0xfb8] sm:$0xff] }
 0x333   : > { %5509 = vmatprep.subr.bf16.mxu1 %v5508_v23  ;;  %v4694_v23 = vld [vmem:[%s9784_s2 + $0xe60] sm:$0xff]  ;;  %v5576_v30 = vpack.c.bf16 %v4737_v15, %v4735_v12 }
 0x334   : > { %v5538_v22 = vpack.c.bf16 %v4696_v3, %v4694_v23  ;;  %5537 = vmatprep.subr.bf16.mxu0 %v5536_v19  ;;  %v4734_v19 = vld [vmem:[%s9784_s2 + $0xfa0] sm:$0xff]  ;;  %v4736_v23 = vld [vmem:[%s9784_s2 + $0xfb0] sm:$0xff] }
 0x335   : > { %v5578_v3 = vpack.c.bf16 %v4736_v23, %v4734_v19 }
 0x336   : > { %5511 = vmatpush1.bf16.msra.mxu1 %v5510_v1  ;;  %5539 = vmatpush1.bf16.msra.mxu0 %v5538_v22  ;;  %v5540_v1 = vpack.c.bf16 %v4701_v17, %v4699_v36  ;;  %v4739_v22 = vld [vmem:[%s9784_s2 + $0xfc8] sm:$0xff]  ;;  %v4741_v36 = vld [vmem:[%s9784_s2 + $0xfd8] sm:$0xff] }
 0x337   : > { %5513 = vmatprep.subr.bf16.mxu1 %v5512_v59  ;;  %v4698_v59 = vld [vmem:[%s9784_s2 + $0xe80] sm:$0xff]  ;;  %v5580_v17 = vpack.c.bf16 %v4741_v36, %v4739_v22 }
 0x338   : > { %v5542_v39 = vpack.c.bf16 %v4700_v5, %v4698_v59  ;;  %5541 = vmatprep.subr.bf16.mxu0 %v5540_v1  ;;  %v4738_v1 = vld [vmem:[%s9784_s2 + $0xfc0] sm:$0xff]  ;;  %v4740_v59 = vld [vmem:[%s9784_s2 + $0xfd0] sm:$0xff] }
 0x339   : > { %v5582_v5 = vpack.c.bf16 %v4740_v59, %v4738_v1 }
 0x33a   : > { %5515 = vmatpush1.bf16.msra.mxu1 %v5514_v42  ;;  %5543 = vmatpush1.bf16.msra.mxu0 %v5542_v39  ;;  %v5544_v42 = vpack.c.bf16 %v4705_v41, %v4703_v28  ;;  %v4743_v39 = vld [vmem:[%s9784_s2 + $0xfe8] sm:$0xff]  ;;  %v4745_v28 = vld [vmem:[%s9784_s2 + $0xff8] sm:$0xff] }
 0x33b   : > { %5517 = vmatprep.subr.bf16.mxu1 %v5516_v7  ;;  %v4702_v7 = vld [vmem:[%s9784_s2 + $0xea0] sm:$0xff]  ;;  %v5584_v41 = vpack.c.bf16 %v4745_v28, %v4743_v39 }
 0x33c   : > { %v5546_v44 = vpack.c.bf16 %v4704_v8, %v4702_v7  ;;  %5545 = vmatprep.subr.bf16.mxu0 %v5544_v42  ;;  %v4742_v42 = vld [vmem:[%s9784_s2 + $0xfe0] sm:$0xff]  ;;  %v4744_v7 = vld [vmem:[%s9784_s2 + $0xff0] sm:$0xff] }
 0x33d   : > { %v5586_v8 = vpack.c.bf16 %v4744_v7, %v4742_v42 }
 0x33e   : > { %5519 = vmatpush1.bf16.msra.mxu1 %v5518_v6  ;;  %5547 = vmatpush1.bf16.msra.mxu0 %v5546_v44  ;;  %v5548_v6 = vpack.c.bf16 %v4709_v49, %v4707_v43  ;;  %v4619_v44 = vld [vmem:[%s9784_s2 + $0xc08] sm:$0xff]  ;;  %v4621_v43 = vld [vmem:[%s9784_s2 + $0xc18] sm:$0xff] }
 0x33f   : > { %5521 = vmatprep.subr.bf16.mxu1 %v5520_v13  ;;  %v4706_v13 = vld [vmem:[%s9784_s2 + $0xec0] sm:$0xff]  ;;  %v5588_v49 = vpack.c.bf16 %v4621_v43, %v4619_v44 }
 0x340   : > { %v5550_v34 = vpack.c.bf16 %v4708_v33, %v4706_v13  ;;  %5549 = vmatprep.subr.bf16.mxu0 %v5548_v6  ;;  %v4617_v6 = vld [vmem:[%s9785_s3 + $0x1] ss:$4 sm:$0x3] }
 0x341   : > { %v8105_v13 = vrot.slane %v4617_v6, %v7248_v29  ;;  %v8108_v33 = vrot.slane %v4617_v6, %v7253_v31 }
 0x342   : > { %5523 = vmatpush1.bf16.msra.mxu1 %v5522_v14  ;;  %5551 = vmatpush1.bf16.msra.mxu0 %v5550_v34  ;;  %v4713_v14 = vld [vmem:[%s9784_s2 + $0xef8] sm:$0xff] }
 0x343   : > { %v5552_v27 = vpack.c.bf16 %v4713_v14, %v4711_v24 }
 0x345   : > { %1996 = vmatmul.mubr.f32.vlgmr.msra.gmra.mrb[6].mxu1 %v1905_v46  ;;  %v5554_v46 = vpack.c.bf16 %v4712_v61, %v4710_v0  ;;  %5553 = vmatprep.subr.bf16.mxu0 %v5552_v27 }
 0x346   : > { %2001 = vmatprep.mubr.f32.mxu1 %v1912_v18  ;;  %v4717_v18 = vld [vmem:[%s9784_s2 + $0xf18] sm:$0xff] }
 0x347   : > { %5555 = vmatpush1.bf16.msra.mxu0 %v5554_v46  ;;  %v5556_v20 = vpack.c.bf16 %v4717_v18, %v4715_v55 }
 0x349   : > { %2002 = vmatmul.mubr.f32.gmra.mrb[8].mxu1 %v1910_v10  ;;  %v4716_v10 = vld [vmem:[%s9784_s2 + $0xf10] sm:$0xff]  ;;  %5557 = vmatprep.subr.bf16.mxu0 %v5556_v20 }
 0x34a   : > { %2007 = vmatprep.mubr.f32.mxu1 %v1916_v4  ;;  %v5558_v52 = vpack.c.bf16 %v4716_v10, %v4714_v45  ;;  %v4719_v4 = vld [vmem:[%s9784_s2 + $0xf28] sm:$0xff] }
 0x34c   : > { %5559 = vmatpush1.bf16.msra.mxu0 %v5558_v52 }
 0x34d   : > { %2008 = vmatmul.mubr.f32.gmra.mrb[10].mxu1 %v1914_v38  ;;  %v4718_v38 = vld [vmem:[%s9784_s2 + $0xf20] sm:$0xff] }
 0x34e   : > { %2013 = vmatprep.mubr.f32.mxu1 %v1920_v32 }
 0x351   : > { %2014 = vmatmul.mubr.f32.gmra.mrb[12].mxu1 %v1918_v2  ;;  %v4723_v2 = vld [vmem:[%s9784_s2 + $0xf48] sm:$0xff] }
 0x352   : > { %2019 = vmatprep.mubr.f32.mxu1 %v1919_v48  ;;  %v4721_v48 = vld [vmem:[%s9784_s2 + $0xf38] sm:$0xff]  ;;  %v5564_v40 = vpack.c.bf16 %v4725_v63, %v4723_v2 }
 0x353   : > { %v5560_v37 = vpack.c.bf16 %v4721_v48, %v4719_v4 }
 0x355   : > { %2020 = vmatmul.mubr.f32.gmra.mrb[14].mxu1 %v1917_v51  ;;  %v4720_v51 = vld [vmem:[%s9784_s2 + $0xf30] sm:$0xff]  ;;  %5561 = vmatprep.subr.bf16.mxu0 %v5560_v37 }
 0x356   : > { %v5562_v32 = vpack.c.bf16 %v4720_v51, %v4718_v38 }
 0x358   : > { %5563 = vmatpush1.bf16.msra.mxu0 %v5562_v32 }
 0x359   : > { %5565 = vmatprep.subr.bf16.mxu0 %v5564_v40 }
 0x35c   : > { %5567 = vmatpush1.bf16.msra.mxu0 %v5566_v50 }
 0x35d   : > { %5569 = vmatprep.subr.bf16.mxu0 %v5568_v47 }
 0x360   : > { %5571 = vmatpush1.bf16.msra.mxu0 %v5570_v58 }
 0x361   : > { %5573 = vmatprep.subr.bf16.mxu0 %v5572_v54 }
 0x364   : > { %5575 = vmatpush1.bf16.msra.mxu0 %v5574_v16  ;;  %v8140_v16 = vld [vmem:[%s9784_s2 + $0xc10] sm:$0xff] }
 0x365   : > { %5577 = vmatprep.subr.bf16.mxu0 %v5576_v30  ;;  %v5590_v59 = vpack.c.bf16 %v8140_v16, %v8135_v11 }
 0x368   : > { %5579 = vmatpush1.bf16.msra.mxu0 %v5578_v3 }
 0x369   : > { %5581 = vmatprep.subr.bf16.mxu0 %v5580_v17 }
 0x36c   : > { %5583 = vmatpush1.bf16.msra.mxu0 %v5582_v5 }
 0x36d   : > { %5585 = vmatprep.subr.bf16.mxu0 %v5584_v41 }
 0x370   : > { %5587 = vmatpush1.bf16.msra.mxu0 %v5586_v8 }
 0x371   : > { %5589 = vmatprep.subr.bf16.mxu0 %v5588_v49 }
 0x418   : > { %v1997_v34 = vpop.f32.mrb[6].mxu1 }
 0x419   : > { %v8111_v24 = vadd.f32 %v8105_v13, %v1997_v34  ;;  %v1999_v14 = vpop.f32.mrb[7].mxu1 }
 0x41a   : > { %v8114_v27 = vadd.f32 %v8108_v33, %v1999_v14 }
 0x41b   : > { %v2059_v0 = vand.u32 2147483647, %v8111_v24  ;;  %v8145_v22 = vmul.f32 0.5, %v8111_v24  ;;  %vm2269_vm0 = vcmp.ge.f32.partialorder %v8111_v24, 0.0 }
 0x41c   : > { %v2060_v61 = vand.u32 2147483647, %v8114_v27  ;;  %v2003_v46 = vpop.f32.mrb[8].mxu1  ;;  %v8152_v5 = vmul.f32 0.5, %v8114_v27  ;;  %vm2270_vm2 = vcmp.ge.f32.partialorder %v8114_v27, 0.0 }
 0x41d   : > { %v2069_v55 = vmul.f32 0.70710677, %v2059_v0  ;;  %v8119_v18 = vadd.f32 %v8105_v13, %v2003_v46  ;;  %v2005_v20 = vpop.f32.mrb[9].mxu1 }
 0x41e   : > { %v2070_v45 = vmul.f32 0.70710677, %v2060_v61  ;;  %v8122_v10 = vadd.f32 %v8108_v33, %v2005_v20 }
 0x41f   : > { %v2079_v52 = vmul.f32 0.3275911, %v2069_v55  ;;  %v2209_v4 = vsub.f32 0.0, %v2069_v55  ;;  %v2061_v48 = vand.u32 2147483647, %v8119_v18  ;;  %v8161_v42 = vmul.f32 0.5, %v8119_v18 }
 0x420   : > { %v2080_v37 = vmul.f32 0.3275911, %v2070_v45  ;;  %v2210_v38 = vsub.f32 0.0, %v2070_v45  ;;  %v2062_v51 = vand.u32 2147483647, %v8122_v10  ;;  %v2009_v63 = vpop.f32.mrb[10].mxu1 }
 0x421   : > { %v2089_v32 = vadd.f32 1.0, %v2079_v52  ;;  %v2071_v2 = vmul.f32 0.70710677, %v2061_v48  ;;  %v2011_v53 = vpop.f32.mrb[11].mxu1  ;;  %v2219_v50 = vmul.f32 %v2209_v4, %v2069_v55  ;;  %v8127_v35 = vadd.f32 %v8105_v13, %v2009_v63 }
 0x422   : > { %v2090_v40 = vadd.f32 1.0, %v2080_v37  ;;  %v2072_v26 = vmul.f32 0.70710677, %v2062_v51  ;;  %v2220_v57 = vmul.f32 %v2210_v38, %v2070_v45  ;;  %v8130_v60 = vadd.f32 %v8108_v33, %v2011_v53 }
 0x423   : > { %6038 = vrcp.f32 %v2089_v32  ;;  %v2081_v56 = vmul.f32 0.3275911, %v2071_v2  ;;  %v2211_v58 = vsub.f32 0.0, %v2071_v2  ;;  %v2229_v12 = vmul.f32 1.442695, %v2219_v50 }
 0x424   : > { %6040 = vrcp.f32 %v2090_v40  ;;  %v2082_v47 = vmul.f32 0.3275911, %v2072_v26  ;;  %v2015_v21 = vpop.f32.mrb[12].mxu1  ;;  %v2212_v15 = vsub.f32 0.0, %v2072_v26  ;;  %v2063_v30 = vand.u32 2147483647, %v8127_v35 }
 0x425   : > { %v2091_v25 = vadd.f32 1.0, %v2081_v56  ;;  %v2017_v62 = vpop.f32.mrb[13].mxu1  ;;  %v2231_v19 = vmul.f32 1.442695, %v2220_v57  ;;  %v2064_v23 = vand.u32 2147483647, %v8130_v60  ;;  %v2221_v36 = vmul.f32 %v2211_v58, %v2071_v2 }
 0x426   : > { %v2092_v54 = vadd.f32 1.0, %v2082_v47  ;;  %v2073_v17 = vmul.f32 0.70710677, %v2063_v30  ;;  %v8155_v28 = vadd.f32 %v8105_v13, %v2015_v21  ;;  %v8158_v41 = vadd.f32 %v8108_v33, %v2017_v62 }
 0x427   : > { %6042 = vrcp.f32 %v2091_v25  ;;  %v2074_v39 = vmul.f32 0.70710677, %v2064_v23  ;;  %v2222_v7 = vmul.f32 %v2212_v15, %v2072_v26  ;;  %v8164_v44 = vmul.f32 0.5, %v8122_v10 }
 0x428   : > { %6044 = vrcp.f32 %v2092_v54  ;;  %v2021_v3 = vpop.f32.mrb[14].mxu1  ;;  %v2083_v8 = vmul.f32 0.3275911, %v2073_v17  ;;  %v2065_v49 = vand.u32 2147483647, %v8155_v28  ;;  %v2213_v0 = vsub.f32 0.0, %v2073_v17 }
 0x429   : > { %v8147_v1 = vpop.f32.mrb[15].mxu1  ;;  %6046 = vpow2.f32 %v2229_v12  ;;  %v2084_v43 = vmul.f32 0.3275911, %v2074_v39  ;;  %v2233_v34 = vmul.f32 1.442695, %v2221_v36  ;;  %v2214_v45 = vsub.f32 0.0, %v2074_v39 }
 0x42a   : > { %6048 = vpow2.f32 %v2231_v19  ;;  %v2093_v14 = vadd.f32 1.0, %v2083_v8  ;;  %v2066_v61 = vand.u32 2147483647, %v8158_v41  ;;  %v2075_v52 = vmul.f32 0.70710677, %v2065_v49 }
 0x42b   : > { %v2094_v20 = vadd.f32 1.0, %v2084_v43  ;;  %v2235_v48 = vmul.f32 1.442695, %v2222_v7  ;;  %v8175_v32 = vadd.f32 %v8105_v13, %v2021_v3  ;;  %v2223_v40 = vmul.f32 %v2213_v0, %v2073_v17 }
 0x42c   : > { %6050 = vrcp.f32 %v2093_v14  ;;  %v2076_v37 = vmul.f32 0.70710677, %v2066_v61  ;;  %v2085_v51 = vmul.f32 0.3275911, %v2075_v52  ;;  %v2215_v26 = vsub.f32 0.0, %v2075_v52 }
 0x42d   : > { %v8167_v6 = vpop.eup %6038  ;;  %6052 = vrcp.f32 %v2094_v20  ;;  %v2224_v47 = vmul.f32 %v2214_v45, %v2074_v39  ;;  %v2237_v3 = vmul.f32 1.442695, %v2223_v40  ;;  %vm2271_vm5 = vcmp.ge.f32.partialorder %v8119_v18, 0.0 }
 0x42e   : > { %v8170_v46 = vpop.eup %6040  ;;  %v2119_v55 = vmul.f32 1.0614054, %v8167_v6  ;;  %v2086_v53 = vmul.f32 0.3275911, %v2076_v37  ;;  %v2095_v21 = vadd.f32 1.0, %v2085_v51  ;;  %v2225_v13 = vmul.f32 %v2215_v26, %v2075_v52 }
 0x42f   : > { %v2120_v4 = vmul.f32 1.0614054, %v8170_v46  ;;  %v2216_v15 = vsub.f32 0.0, %v2076_v37  ;;  %v2239_v7 = vmul.f32 1.442695, %v2224_v47  ;;  %vm2272_vm6 = vcmp.ge.f32.partialorder %v8122_v10, 0.0 }
 0x430   : > { %v2129_v38 = vadd.f32 -1.4531521, %v2119_v55  ;;  %v2096_v62 = vadd.f32 1.0, %v2086_v53  ;;  %6054 = vrcp.f32 %v2095_v21  ;;  %v2241_v14 = vmul.f32 1.442695, %v2225_v13 }
 0x431   : > { %v8177_v2 = vpop.eup %6042  ;;  %v2130_v63 = vadd.f32 -1.4531521, %v2120_v4  ;;  %v2226_v8 = vmul.f32 %v2216_v15, %v2076_v37  ;;  %v2067_v4 = vand.u32 2147483647, %v8175_v32  ;;  %vm2273_vm7 = vcmp.ge.f32.partialorder %v8127_v35, 0.0 }
 0x432   : > { %v8179_v50 = vpop.eup %6044  ;;  %v2139_v56 = vmul.f32 %v8167_v6, %v2129_v38  ;;  %v2121_v57 = vmul.f32 1.0614054, %v8177_v2  ;;  %6056 = vrcp.f32 %v2096_v62  ;;  %v2303_v10 = vmul.f32 0.5, %v8127_v35 }
 0x433   : > { %v2140_v25 = vmul.f32 %v8170_v46, %v2130_v63  ;;  %v2122_v58 = vmul.f32 1.0614054, %v8179_v50  ;;  %v6047_v30 = vpop.eup %6046  ;;  %6058 = vpow2.f32 %v2233_v34  ;;  %v2243_v55 = vmul.f32 1.442695, %v2226_v8 }
 0x434   : > { %v2149_v54 = vadd.f32 1.4214138, %v2139_v56  ;;  %v2131_v12 = vadd.f32 -1.4531521, %v2121_v57  ;;  %v6049_v36 = vpop.eup %6048  ;;  %6060 = vpow2.f32 %v2235_v48  ;;  %v8200_v26 = vmul.f32 0.70710677, %v2067_v4 }
 0x435   : > { %v2150_v19 = vadd.f32 1.4214138, %v2140_v25  ;;  %v2132_v23 = vadd.f32 -1.4531521, %v2122_v58  ;;  %6062 = vpow2.f32 %v2237_v3  ;;  %vm2274_vm8 = vcmp.ge.f32.partialorder %v8130_v60, 0.0 }
 0x436   : > { %v2159_v17 = vmul.f32 %v8167_v6, %v2149_v54  ;;  %v2141_v39 = vmul.f32 %v8177_v2, %v2131_v12  ;;  %v8189_v20 = vpop.eup %6050  ;;  %6064 = vpow2.f32 %v2239_v7  ;;  %v8210_v12 = vmul.f32 0.3275911, %v8200_v26 }
 0x437   : > { %v2160_v43 = vmul.f32 %v8170_v46, %v2150_v19  ;;  %v2142_v49 = vmul.f32 %v8179_v50, %v2132_v23  ;;  %v8192_v38 = vpop.eup %6052  ;;  %v2123_v51 = vmul.f32 1.0614054, %v8189_v20  ;;  %6066 = vpow2.f32 %v2241_v14 }
 0x438   : > { %v2169_v0 = vadd.f32 -0.28449672, %v2159_v17  ;;  %v2151_v61 = vadd.f32 1.4214138, %v2141_v39  ;;  %v2124_v40 = vmul.f32 1.0614054, %v8192_v38  ;;  %6068 = vpow2.f32 %v2243_v55 }
 0x439   : > { %v2170_v45 = vadd.f32 -0.28449672, %v2160_v43  ;;  %v2152_v52 = vadd.f32 1.4214138, %v2142_v49  ;;  %v2133_v57 = vadd.f32 -1.4531521, %v2123_v51 }
 0x43a   : > { %v2179_v37 = vmul.f32 %v8167_v6, %v2169_v0  ;;  %v2161_v34 = vmul.f32 %v8177_v2, %v2151_v61  ;;  %v2134_v25 = vadd.f32 -1.4531521, %v2124_v40  ;;  %v8203_v58 = vpop.eup %6054  ;;  %vm2275_vm9 = vcmp.ge.f32.partialorder %v8155_v28, 0.0 }
 0x43b   : > { %v2180_v63 = vmul.f32 %v8170_v46, %v2170_v45  ;;  %v2162_v48 = vmul.f32 %v8179_v50, %v2152_v52  ;;  %v2143_v54 = vmul.f32 %v8189_v20, %v2133_v57  ;;  %v2125_v17 = vmul.f32 1.0614054, %v8203_v58 }
 0x43c   : > { %v2189_v53 = vadd.f32 0.2548296, %v2179_v37  ;;  %v2171_v56 = vadd.f32 -0.28449672, %v2161_v34  ;;  %v8212_v15 = vpop.eup %6056  ;;  %v2144_v3 = vmul.f32 %v8192_v38, %v2134_v25  ;;  %vm2276_vm11 = vcmp.ge.f32.partialorder %v8158_v41, 0.0 }
 0x43d   : > { %v2190_v47 = vadd.f32 0.2548296, %v2180_v63  ;;  %v2172_v21 = vadd.f32 -0.28449672, %v2162_v48  ;;  %v2153_v7 = vadd.f32 1.4214138, %v2143_v54  ;;  %v6059_v43 = vpop.eup %6058 }
 0x43e   : > { %v2199_v13 = vmul.f32 %v8167_v6, %v2189_v53  ;;  %v2181_v62 = vmul.f32 %v8177_v2, %v2171_v56  ;;  %v2126_v8 = vmul.f32 1.0614054, %v8212_v15  ;;  %v2154_v0 = vadd.f32 1.4214138, %v2144_v3  ;;  %v6061_v55 = vpop.eup %6060 }
 0x43f   : > { %v2200_v19 = vmul.f32 %v8170_v46, %v2190_v47  ;;  %v2182_v23 = vmul.f32 %v8179_v50, %v2172_v21  ;;  %v2135_v61 = vadd.f32 -1.4531521, %v2125_v17  ;;  %v2163_v52 = vmul.f32 %v8189_v20, %v2153_v7  ;;  %v6063_v4 = vpop.eup %6062 }
 0x440   : > { %v2249_v6 = vmul.f32 %v6047_v30, %v2199_v13  ;;  %v2191_v39 = vadd.f32 0.2548296, %v2181_v62  ;;  %v2136_v30 = vadd.f32 -1.4531521, %v2126_v8  ;;  %v6065_v63 = vpop.eup %6064  ;;  %vm2277_vm12 = vcmp.ge.f32.partialorder %v8175_v32, 0.0 }
 0x441   : > { %v2250_v49 = vmul.f32 %v6049_v36, %v2200_v19  ;;  %v2192_v14 = vadd.f32 0.2548296, %v2182_v23  ;;  %v2164_v36 = vmul.f32 %v8192_v38, %v2154_v0  ;;  %v2145_v51 = vmul.f32 %v8203_v58, %v2135_v61  ;;  %v6067_v25 = vpop.eup %6066 }
 0x442   : > { %v2259_v46 = vsub.f32 1.0, %v2249_v6  ;;  %v2201_v45 = vmul.f32 %v8177_v2, %v2191_v39  ;;  %v2173_v53 = vadd.f32 -0.28449672, %v2163_v52  ;;  %v2146_v56 = vmul.f32 %v8212_v15, %v2136_v30  ;;  %v6069_v19 = vpop.eup %6068 }
 0x443   : > { %v2260_v37 = vsub.f32 1.0, %v2250_v49  ;;  %v2202_v34 = vmul.f32 %v8179_v50, %v2192_v14  ;;  %v2174_v47 = vadd.f32 -0.28449672, %v2164_v36  ;;  %v2155_v21 = vadd.f32 1.4214138, %v2145_v51 }
 0x444   : > { %v2279_v48 = vsub.f32 0.0, %v2259_v46  ;;  %v2251_v40 = vmul.f32 %v6059_v43, %v2201_v45  ;;  %v2183_v50 = vmul.f32 %v8189_v20, %v2173_v53  ;;  %v2156_v54 = vadd.f32 1.4214138, %v2146_v56 }
 0x445   : > { %v2280_v2 = vsub.f32 0.0, %v2260_v37  ;;  %v2252_v57 = vmul.f32 %v6061_v55, %v2202_v34  ;;  %v2184_v6 = vmul.f32 %v8192_v38, %v2174_v47  ;;  %v2165_v43 = vmul.f32 %v8203_v58, %v2155_v21 }
 0x446   : > { %v2289_v13 = vsel %vm2269_vm0, %v2259_v46, %v2279_v48  ;;  %v2261_v62 = vsub.f32 1.0, %v2251_v40  ;;  %v2193_v8 = vadd.f32 0.2548296, %v2183_v50  ;;  %v2166_v0 = vmul.f32 %v8212_v15, %v2156_v54 }
 0x447   : > { %v2309_v23 = vadd.f32 1.0, %v2289_v13  ;;  %v2290_v3 = vsel %vm2270_vm2, %v2260_v37, %v2280_v2  ;;  %v2262_v17 = vsub.f32 1.0, %v2252_v57  ;;  %v2194_v14 = vadd.f32 0.2548296, %v2184_v6 }
 0x448   : > { %v2310_v39 = vadd.f32 1.0, %v2290_v3  ;;  %v2281_v7 = vsub.f32 0.0, %v2261_v62  ;;  %v2203_v55 = vmul.f32 %v8189_v20, %v2193_v8  ;;  %v2175_v46 = vadd.f32 -0.28449672, %v2165_v43 }
 0x449   : > { %v2319_v24 = vmul.f32 %v2309_v23, %v8145_v22  ;;  %v2282_v49 = vsub.f32 0.0, %v2262_v17  ;;  %v2204_v22 = vmul.f32 %v8192_v38, %v2194_v14  ;;  %v2176_v48 = vadd.f32 -0.28449672, %v2166_v0 }
 0x44a   : > { %v2320_v61 = vmul.f32 %v2310_v39, %v8152_v5  ;;  %v2291_v27 = vsel %vm2271_vm5, %v2261_v62, %v2281_v7  ;;  %v2253_v36 = vmul.f32 %v6063_v4, %v2203_v55  ;;  %v2185_v51 = vmul.f32 %v8203_v58, %v2175_v46 }
 0x44b   : > { %v2349_v45 = vrot.slane %v2319_v24, 7  ;;  %v2311_v52 = vadd.f32 1.0, %v2291_v27  ;;  %v2292_v30 = vsel %vm2272_vm6, %v2262_v17, %v2282_v49  ;;  %v2254_v18 = vmul.f32 %v6065_v63, %v2204_v22 }
 0x44c   : > { %v2350_v37 = vrot.slane %v2320_v61, 7  ;;  %v2312_v34 = vadd.f32 1.0, %v2292_v30  ;;  %v2097_v20 = vadd.f32 1.0, %v8210_v12  ;;  %v2263_v53 = vsub.f32 1.0, %v2253_v36 }
 0x44d   : > { %2377 = vst [vmem:[#allocation2] sm:$0xfe] %v2349_v45  ;;  %v2321_v5 = vmul.f32 %v2311_v52, %v8161_v42  ;;  %v2195_v56 = vadd.f32 0.2548296, %v2185_v51  ;;  %v2264_v2 = vsub.f32 1.0, %v2254_v18  ;;  %v2186_v4 = vmul.f32 %v8212_v15, %v2176_v48 }
 0x44e   : > { %2378 = vst [vmem:[#allocation2 + $0x8] sm:$0xfe] %v2350_v37  ;;  %v2322_v40 = vmul.f32 %v2312_v34, %v8164_v44  ;;  %6070 = vrcp.f32 %v2097_v20  ;;  %v2283_v47 = vsub.f32 0.0, %v2263_v53  ;;  %v8253_v63 = vadd.f32 %v8108_v33, %v8147_v1 }
 0x44f   : > { %v2351_v38 = vrot.slane %v2321_v5, 7  ;;  %v2205_v42 = vmul.f32 %v8203_v58, %v2195_v56  ;;  %v2284_v44 = vsub.f32 0.0, %v2264_v2  ;;  %v2196_v21 = vadd.f32 0.2548296, %v2186_v4  ;;  %v4625_v5 = vld [vmem:[%s9784_s2 + $0xc38] sm:$0xff] }
 0x450   : > { %v2353_v57 = vrot.slane %v2322_v40, 7  ;;  %v2293_v62 = vsel %vm2273_vm7, %v2263_v53, %v2283_v47  ;;  %v2304_v50 = vmul.f32 0.5, %v8130_v60  ;;  %v2217_v1 = vsub.f32 0.0, %v8200_v26  ;;  %v4622_v47 = vld [vmem:[%s9784_s2 + $0xc20] sm:$0xff] }
 0x451   : > { %v8256_v12 = vsel %vm376_vm1, %v2349_v45, %v2351_v38  ;;  %v2255_v58 = vmul.f32 %v6067_v25, %v2205_v42  ;;  %v2313_v54 = vadd.f32 1.0, %v2293_v62  ;;  %v2294_v23 = vsel %vm2274_vm8, %v2264_v2, %v2284_v44 }
 0x452   : > { %v8260_v13 = vsel %vm376_vm1, %v2350_v37, %v2353_v57  ;;  %v2206_v33 = vmul.f32 %v8212_v15, %v2196_v21  ;;  %v2314_v3 = vadd.f32 1.0, %v2294_v23  ;;  %v2068_v6 = vand.u32 2147483647, %v8253_v63 }
 0x453   : > { %v2265_v17 = vsub.f32 1.0, %v2255_v58  ;;  %v2323_v39 = vmul.f32 %v2313_v54, %v2303_v10  ;;  %v2305_v7 = vmul.f32 0.5, %v8155_v28  ;;  %v2227_v0 = vmul.f32 %v2217_v1, %v8200_v26  ;;  %v4623_v28 = vld [vmem:[%s9784_s2 + $0xc28] sm:$0xff]  ;;  %v4629_v58 = vld [vmem:[%s9784_s2 + $0xc58] sm:$0xff] }
 0x454   : > { %v2256_v35 = vmul.f32 %v6069_v19, %v2206_v33  ;;  %v2324_v25 = vmul.f32 %v2314_v3, %v2304_v50  ;;  %v8271_v43 = vmul.f32 0.70710677, %v2068_v6  ;;  %v2462_v24 = vld [vmem:[#allocation2] sm:$0xfe]  ;;  %v2545_v61 = vrot.slane %v8260_v13, 1  ;;  %v4627_v50 = vld [vmem:[%s9784_s2 + $0xc48] sm:$0xff] }
 0x455   : > { %v2463_v60 = vld [vmem:[#allocation2 + $0x8] sm:$0xfe]  ;;  %v2285_v8 = vsub.f32 0.0, %v2265_v17  ;;  %v2333_v49 = vsel %vm526_vm10, %v2323_v39, 0.0  ;;  %v2541_v37 = vrot.slane %v2462_v24, 1  ;;  %v2306_v40 = vmul.f32 0.5, %v8158_v41 }
 0x456   : > { %v2544_v15 = vrot.slane %v2463_v60, 1  ;;  %v2266_v14 = vsub.f32 1.0, %v2256_v35  ;;  %v2355_v27 = vrot.slane %v2333_v49, 7  ;;  %v2334_v19 = vsel %vm526_vm10, %v2324_v25, 0.0  ;;  %v4624_v41 = vld [vmem:[%s9784_s2 + $0xc30] sm:$0xff]  ;;  %v4626_v39 = vld [vmem:[%s9784_s2 + $0xc40] sm:$0xff] }
 0x457   : > { %v2295_v55 = vsel %vm2275_vm9, %v2265_v17, %v2285_v8  ;;  %v2088_v46 = vmul.f32 0.3275911, %v8271_v43  ;;  %v2357_v52 = vrot.slane %v2334_v19, 7  ;;  %v2542_v56 = vrot.slane %v8256_v12, 1  ;;  %v4631_v60 = vld [vmem:[%s9784_s2 + $0xc68] sm:$0xff]  ;;  %v4633_v25 = vld [vmem:[%s9784_s2 + $0xc78] sm:$0xff] }
 0x458   : > { %v8282_v45 = vpop.eup %6070  ;;  %v2315_v30 = vadd.f32 1.0, %v2295_v55  ;;  %v2286_v22 = vsub.f32 0.0, %v2266_v14  ;;  %v8285_v34 = vsel %vm376_vm1, %v2351_v38, %v2355_v27  ;;  %v2546_v51 = vsel %vm682_vm3, %v2544_v15, %v2545_v61 }
 0x459   : > { %v2127_v26 = vmul.f32 1.0614054, %v8282_v45  ;;  %v2098_v36 = vadd.f32 1.0, %v2088_v46  ;;  %2381 = vst [vmem:[#allocation2 + $0x20] sm:$0xff] %v8285_v34  ;;  %v8297_v18 = vsel %vm376_vm1, %v2353_v57, %v2357_v52  ;;  %2633 = vmatprep.mubr.f32.mxu0 %v2546_v51  ;;  %v2245_v2 = vmul.f32 1.442695, %v2227_v0 }
 0x45a   : > { %v8299_v48 = vmul.f32 %v2315_v30, %v2305_v7  ;;  %v2296_v20 = vsel %vm2276_vm11, %v2266_v14, %v2286_v22  ;;  %2382 = vst [vmem:[#allocation2 + $0x28] sm:$0xff] %v8297_v18  ;;  %v5592_v4 = vpack.c.bf16 %v4625_v5, %v4623_v28  ;;  %v2549_v57 = vrot.slane %v8297_v18, 1  ;;  %v4628_v7 = vld [vmem:[%s9784_s2 + $0xc50] sm:$0xff]  ;;  %v4630_v0 = vld [vmem:[%s9784_s2 + $0xc60] sm:$0xff]  ;;  %v4637_v30 = vld [vmem:[%s9784_s2 + $0xc98] sm:$0xff] }
 0x45b   : > { %v2316_v53 = vadd.f32 1.0, %v2296_v20  ;;  %v2137_v10 = vadd.f32 -1.4531521, %v2127_v26  ;;  %6072 = vrcp.f32 %v2098_v36  ;;  %v2543_v21 = vsel %vm682_vm3, %v2541_v37, %v2542_v56  ;;  %v4634_v51 = vld [vmem:[%s9784_s2 + $0xc80] sm:$0xff]  ;;  %v4636_v28 = vld [vmem:[%s9784_s2 + $0xc90] sm:$0xff] }
 0x45c   : > { %v2359_v38 = vrot.slane %v8299_v48, 7  ;;  %v2547_v62 = vrot.slane %v8285_v34, 1  ;;  %2634 = vmatmul.mubr.f32.vlgmr.msra.gmra.mrb[16].mxu0 %v2543_v21  ;;  %v2550_v23 = vsel %vm682_vm3, %v2545_v61, %v2549_v57  ;;  %v5594_v3 = vpack.c.bf16 %v4624_v41, %v4622_v47  ;;  %v4632_v61 = vld [vmem:[%s9784_s2 + $0xc70] sm:$0xff]  ;;  %v4643_v21 = vld [vmem:[%s9784_s2 + $0xcc8] sm:$0xff]  ;;  %v4657_v48 = vld [vmem:[%s9784_s2 + $0xd38] sm:$0xff] }
 0x45d   : > { %v8314_v42 = vmul.f32 %v2316_v53, %v2306_v40  ;;  %v2147_v44 = vmul.f32 %v8282_v45, %v2137_v10  ;;  %5591 = vmatpush1.bf16.msra.mxu0 %v5590_v59  ;;  %2639 = vmatprep.mubr.f32.mxu0 %v2550_v23  ;;  %6074 = vpow2.f32 %v2245_v2  ;;  %v2218_v17 = vsub.f32 0.0, %v8271_v43  ;;  %v4639_v40 = vld [vmem:[%s9784_s2 + $0xca8] sm:$0xff]  ;;  %v4641_v53 = vld [vmem:[%s9784_s2 + $0xcb8] sm:$0xff]  ;;  %v4640_v41 = vld [vmem:[%s9784_s2 + $0xcb0] sm:$0xff] }
 0x45e   : > { %v8328_v54 = vsel %vm376_vm1, %v2355_v27, %v2359_v38  ;;  %5593 = vmatprep.subr.bf16.mxu0 %v5592_v4  ;;  %v5596_v6 = vpack.c.bf16 %v4629_v58, %v4627_v50  ;;  %v2548_v59 = vsel %vm682_vm3, %v2542_v56, %v2547_v62  ;;  %v5598_v24 = vpack.c.bf16 %v4628_v7, %v4626_v39  ;;  %v4647_v7 = vld [vmem:[%s9784_s2 + $0xce8] sm:$0xff] }
 0x45f   : > { %v2361_v33 = vrot.slane %v8314_v42, 7  ;;  %v2157_v1 = vadd.f32 1.4214138, %v2147_v44  ;;  %v2551_v35 = vrot.slane %v8328_v54, 1  ;;  %v5600_v14 = vpack.c.bf16 %v4633_v25, %v4631_v60  ;;  %v4668_v42 = vld [vmem:[%s9784_s2 + $0xd90] sm:$0xff] }
 0x460   : > { %2640 = vmatmul.mubr.f32.gmra.mrb[18].mxu0 %v2548_v59  ;;  %v2228_v55 = vmul.f32 %v2218_v17, %v8271_v43  ;;  %v5602_v26 = vpack.c.bf16 %v4632_v61, %v4630_v0  ;;  %v5606_v4 = vpack.c.bf16 %v4636_v28, %v4634_v51  ;;  %v5608_v47 = vpack.c.bf16 %v4641_v53, %v4639_v40  ;;  %v4642_v17 = vld [vmem:[%s9784_s2 + $0xcc0] sm:$0xff]  ;;  %v4648_v61 = vld [vmem:[%s9784_s2 + $0xcf0] sm:$0xff]  ;;  %v4659_v53 = vld [vmem:[%s9784_s2 + $0xd48] sm:$0xff] }
 0x461   : > { %v8345_v11 = vsel %vm376_vm1, %v2357_v52, %v2361_v33  ;;  %v2167_v16 = vmul.f32 %v8282_v45, %v2157_v1  ;;  %5595 = vmatpush1.bf16.msra.mxu0 %v5594_v3  ;;  %v2552_v46 = vsel %vm682_vm3, %v2547_v62, %v2551_v35  ;;  %v4635_v52 = vld [vmem:[%s9784_s2 + $0xc88] sm:$0xff]  ;;  %v4645_v62 = vld [vmem:[%s9784_s2 + $0xcd8] sm:$0xff]  ;;  %v2307_v59 = vmul.f32 0.5, %v8175_v32  ;;  %v4646_v0 = vld [vmem:[%s9784_s2 + $0xce0] sm:$0xff] }
 0x462   : > { %v2553_v8 = vrot.slane %v8345_v11, 1  ;;  %5597 = vmatprep.subr.bf16.mxu0 %v5596_v6  ;;  %v5604_v43 = vpack.c.bf16 %v4637_v30, %v4635_v52  ;;  %v2247_v20 = vmul.f32 1.442695, %v2228_v55  ;;  %v5612_v3 = vpack.c.bf16 %v4645_v62, %v4643_v21  ;;  %v4644_v6 = vld [vmem:[%s9784_s2 + $0xcd0] sm:$0xff]  ;;  %v4651_v32 = vld [vmem:[%s9784_s2 + $0xd08] sm:$0xff] }
 0x463   : > { %v2177_v15 = vadd.f32 -0.28449672, %v2167_v16  ;;  %v4649_v16 = vld [vmem:[%s9784_s2 + $0xcf8] sm:$0xff]  ;;  %v5618_v30 = vpack.c.bf16 %v4648_v61, %v4646_v0  ;;  %v4656_v40 = vld [vmem:[%s9784_s2 + $0xd30] sm:$0xff]  ;;  %vm2278_vm13 = vcmp.ge.f32.partialorder %v8253_v63, 0.0  ;;  %v4663_v21 = vld [vmem:[%s9784_s2 + $0xd68] sm:$0xff] }
 0x464   : > { %v2554_v49 = vsel %vm682_vm3, %v2549_v57, %v2553_v8  ;;  %6076 = vpow2.f32 %v2247_v20  ;;  %v4654_v20 = vld [vmem:[%s9784_s2 + $0xd20] sm:$0xff]  ;;  %v4675_v61 = vld [vmem:[%s9784_s2 + $0xdc8] sm:$0xff]  ;;  %vm4188_vm11 = vcmask 64512  }
 0x465   : > { %v6073_v27 = vpop.eup %6072  ;;  %v2187_v19 = vmul.f32 %v8282_v45, %v2177_v15  ;;  %2645 = vmatprep.mubr.f32.mxu0 %v2554_v49  ;;  %5599 = vmatpush1.bf16.msra.mxu0 %v5598_v24  ;;  %v5614_v15 = vpack.c.bf16 %v4644_v6, %v4642_v17  ;;  %v4667_v17 = vld [vmem:[%s9784_s2 + $0xd88] sm:$0xff]  ;;  %v4669_v6 = vld [vmem:[%s9784_s2 + $0xd98] sm:$0xff] }
 0x466   : > { %v2128_v22 = vmul.f32 1.0614054, %v6073_v27  ;;  %2646 = vmatmul.mubr.f32.gmra.mrb[20].mxu0 %v2552_v46  ;;  %5601 = vmatprep.subr.bf16.mxu0 %v5600_v14  ;;  %v5616_v14 = vpack.c.bf16 %v4649_v16, %v4647_v7  ;;  %v5636_v7 = vpack.c.bf16 %v4669_v6, %v4667_v17  ;;  %v4666_v16 = vld [vmem:[%s9784_s2 + $0xd80] sm:$0xff]  ;;  %v4760_v17 = vld [vmem:[%s9784_s2 + $0x1070] sm:$0xff]  ;;  %v4763_v6 = vld [vmem:[%s9784_s2 + $0x1088] sm:$0xff] }
 0x467   : > { %v2197_v37 = vadd.f32 0.2548296, %v2187_v19  ;;  %v6075_v10 = vpop.eup %6074  ;;  %v4653_v19 = vld [vmem:[%s9784_s2 + $0xd18] sm:$0xff] }
 0x468   : > { %v2138_v36 = vadd.f32 -1.4531521, %v2128_v22 }
 0x469   : > { %v2207_v5 = vmul.f32 %v8282_v45, %v2197_v37  ;;  %5603 = vmatpush1.bf16.msra.mxu0 %v5602_v26  ;;  %v4638_v45 = vld [vmem:[%s9784_s2 + $0xca0] sm:$0xff]  ;;  %v5620_v26 = vpack.c.bf16 %v4653_v19, %v4651_v32  ;;  %v4677_v32 = vld [vmem:[%s9784_s2 + $0xdd8] sm:$0xff] }
 0x46a   : > { %v2148_v56 = vmul.f32 %v6073_v27, %v2138_v36  ;;  %5605 = vmatprep.subr.bf16.mxu0 %v5604_v43  ;;  %v5610_v23 = vpack.c.bf16 %v4640_v41, %v4638_v45  ;;  %v4650_v36 = vld [vmem:[%s9784_s2 + $0xd00] sm:$0xff]  ;;  %v4652_v43 = vld [vmem:[%s9784_s2 + $0xd10] sm:$0xff] }
 0x46b   : > { %v2257_v2 = vmul.f32 %v6075_v10, %v2207_v5  ;;  %v5622_v51 = vpack.c.bf16 %v4652_v43, %v4650_v36  ;;  %v4661_v10 = vld [vmem:[%s9784_s2 + $0xd58] sm:$0xff]  ;;  %v4658_v45 = vld [vmem:[%s9784_s2 + $0xd40] sm:$0xff]  ;;  %v4660_v41 = vld [vmem:[%s9784_s2 + $0xd50] sm:$0xff] }
 0x46c   : > { %v2158_v57 = vadd.f32 1.4214138, %v2148_v56 }
 0x46d   : > { %v2267_v44 = vsub.f32 1.0, %v2257_v2  ;;  %5607 = vmatpush1.bf16.msra.mxu0 %v5606_v4  ;;  %v2308_v2 = vmul.f32 0.5, %v8253_v63  ;;  %v4665_v63 = vld [vmem:[%s9784_s2 + $0xd78] sm:$0xff] }
 0x46e   : > { %v2168_v50 = vmul.f32 %v6073_v27, %v2158_v57  ;;  %5609 = vmatprep.subr.bf16.mxu0 %v5608_v47  ;;  %v6077_v52 = vpop.eup %6076  ;;  %v5626_v57 = vpack.c.bf16 %v4656_v40, %v4654_v20  ;;  %v5628_v47 = vpack.c.bf16 %v4661_v10, %v4659_v53  ;;  %v4746_v20 = vld [vmem:[%s9784_s2 + $0x1000] sm:$0xff]  ;;  %v4748_v40 = vld [vmem:[%s9784_s2 + $0x1010] sm:$0xff]  ;;  %v4751_v53 = vld [vmem:[%s9784_s2 + $0x1028] sm:$0xff] }
 0x46f   : > { %v2287_v58 = vsub.f32 0.0, %v2267_v44  ;;  %v4753_v10 = vld [vmem:[%s9784_s2 + $0x1038] sm:$0xff] }
 0x470   : > { %v2178_v1 = vadd.f32 -0.28449672, %v2168_v50  ;;  %v5630_v50 = vpack.c.bf16 %v4660_v41, %v4658_v45  ;;  %v4755_v45 = vld [vmem:[%s9784_s2 + $0x1048] sm:$0xff]  ;;  %v4757_v41 = vld [vmem:[%s9784_s2 + $0x1058] sm:$0xff] }
 0x471   : > { %v2297_v39 = vsel %vm2277_vm12, %v2267_v44, %v2287_v58  ;;  %5611 = vmatpush1.bf16.msra.mxu0 %v5610_v23  ;;  %v5632_v58 = vpack.c.bf16 %v4665_v63, %v4663_v21  ;;  %v4662_v23 = vld [vmem:[%s9784_s2 + $0xd60] sm:$0xff]  ;;  %v5660_v21 = vpack.c.bf16 %v4757_v41, %v4755_v45  ;;  %v4789_v45 = vld [vmem:[%s9784_s2 + $0x1158] sm:$0xff] }
 0x472   : > { %v2317_v60 = vadd.f32 1.0, %v2297_v39  ;;  %v2188_v25 = vmul.f32 %v6073_v27, %v2178_v1  ;;  %5613 = vmatprep.subr.bf16.mxu0 %v5612_v3  ;;  %v4664_v1 = vld [vmem:[%s9784_s2 + $0xd70] sm:$0xff]  ;;  %v4754_v63 = vld [vmem:[%s9784_s2 + $0x1040] sm:$0xff] }
 0x473   : > { %v5634_v39 = vpack.c.bf16 %v4664_v1, %v4662_v23 }
 0x474   : > { %v2327_v24 = vmul.f32 %v2317_v60, %v2307_v59  ;;  %v2198_v49 = vadd.f32 0.2548296, %v2188_v25  ;;  %v4673_v59 = vld [vmem:[%s9784_s2 + $0xdb8] sm:$0xff]  ;;  %v5638_v25 = vpack.c.bf16 %v4668_v42, %v4666_v16  ;;  %v2760_v16 = vld [vmem:[#allocation2 + $0x8] sm:$0xfc] }
 0x475   : > { %5615 = vmatpush1.bf16.msra.mxu0 %v5614_v15 }
 0x476   : > { %v2363_v55 = vrot.slane %v2327_v24, 7  ;;  %v2208_v46 = vmul.f32 %v6073_v27, %v2198_v49  ;;  %5617 = vmatprep.subr.bf16.mxu0 %v5616_v14  ;;  %v4655_v27 = vld [vmem:[%s9784_s2 + $0xd28] sm:$0xff]  ;;  %v4670_v24 = vld [vmem:[%s9784_s2 + $0xda0] sm:$0xff]  ;;  %v4672_v49 = vld [vmem:[%s9784_s2 + $0xdb0] sm:$0xff] }
 0x477   : > { %v5624_v5 = vpack.c.bf16 %v4657_v48, %v4655_v27  ;;  %v4678_v27 = vld [vmem:[%s9784_s2 + $0xde0] sm:$0xff]  ;;  %v4747_v48 = vld [vmem:[%s9784_s2 + $0x1008] sm:$0xff] }
 0x478   : > { %v2364_v22 = vsel %vm376_vm1, %v2359_v38, %v2363_v55  ;;  %v2258_v37 = vmul.f32 %v6077_v52, %v2208_v46  ;;  %v5642_v55 = vpack.c.bf16 %v4672_v49, %v4670_v24  ;;  %v5644_v52 = vpack.c.bf16 %v4677_v32, %v4675_v61  ;;  %v4766_v61 = vld [vmem:[%s9784_s2 + $0x10a0] sm:$0xff]  ;;  %v4768_v32 = vld [vmem:[%s9784_s2 + $0x10b0] sm:$0xff] }
 0x479   : > { %2385 = vst [vmem:[#allocation2 + $0x40] sm:$0xf] %v2364_v22  ;;  %5619 = vmatpush1.bf16.msra.mxu0 %v5618_v30  ;;  %v4674_v30 = vld [vmem:[%s9784_s2 + $0xdc0] sm:$0xff]  ;;  %v4676_v22 = vld [vmem:[%s9784_s2 + $0xdd0] sm:$0xff]  ;;  %v2835_v24 = vrot.slane %v2760_v16, 2 }
 0x47a   : > { %v2268_v38 = vsub.f32 1.0, %v2258_v37  ;;  %5621 = vmatprep.subr.bf16.mxu0 %v5620_v26  ;;  %v4679_v26 = vld [vmem:[%s9784_s2 + $0xde8] sm:$0xff]  ;;  %v5646_v36 = vpack.c.bf16 %v4676_v22, %v4674_v30  ;;  %v5674_v30 = vpack.c.bf16 %v4768_v32, %v4766_v61  ;;  %v4794_v16 = vld [vmem:[%s9784_s2 + $0x1180] sm:$0xff] }
 0x47c   : > { %v2288_v28 = vsub.f32 0.0, %v2268_v38 }
 0x47d   : > { %5623 = vmatpush1.bf16.msra.mxu0 %v5622_v51  ;;  %v2388_v51 = vld [vmem:[#allocation2 + $0x8] sm:$0xff] }
 0x47e   : > { %v2298_v56 = vsel %vm2278_vm13, %v2268_v38, %v2288_v28  ;;  %5625 = vmatprep.subr.bf16.mxu0 %v5624_v5  ;;  %v4749_v38 = vld [vmem:[%s9784_s2 + $0x1018] sm:$0xff] }
 0x47f   : > { %v2318_v4 = vadd.f32 1.0, %v2298_v56  ;;  %v5652_v5 = vpack.c.bf16 %v4749_v38, %v4747_v48  ;;  %v5654_v56 = vpack.c.bf16 %v4748_v40, %v4746_v20  ;;  %v4776_v48 = vld [vmem:[%s9784_s2 + $0x10f0] sm:$0xff]  ;;  %v4779_v38 = vld [vmem:[%s9784_s2 + $0x1108] sm:$0xff]  ;;  %v4778_v20 = vld [vmem:[%s9784_s2 + $0x1100] sm:$0xff] }
 0x480   : > { %v2464_v60 = vld [vmem:[#allocation2 + $0x40] sm:$0xf]  ;;  %v4780_v40 = vld [vmem:[%s9784_s2 + $0x1110] sm:$0xff] }
 0x481   : > { %v2328_v44 = vmul.f32 %v2318_v4, %v2308_v2  ;;  %5627 = vmatpush1.bf16.msra.mxu0 %v5626_v57  ;;  %v2555_v0 = vrot.slane %v2464_v60, 1  ;;  %v5656_v2 = vpack.c.bf16 %v4753_v10, %v4751_v53  ;;  %v4750_v4 = vld [vmem:[%s9784_s2 + $0x1020] sm:$0xff]  ;;  %v4752_v57 = vld [vmem:[%s9784_s2 + $0x1030] sm:$0xff]  ;;  %v4767_v60 = vld [vmem:[%s9784_s2 + $0x10a8] sm:$0xff] }
 0x482   : > { %5629 = vmatprep.subr.bf16.mxu0 %v5628_v47  ;;  %v2387_v47 = vld [vmem:[#allocation2] sm:$0xff]  ;;  %v4783_v53 = vld [vmem:[%s9784_s2 + $0x1128] sm:$0xff]  ;;  %v4785_v10 = vld [vmem:[%s9784_s2 + $0x1138] sm:$0xff] }
 0x483   : > { %v2365_v62 = vrot.slane %v2328_v44, 7  ;;  %v2556_v37 = vsel %vm682_vm3, %v2551_v35, %v2555_v0  ;;  %v4680_v35 = vld [vmem:[%s9784_s2 + $0xdf0] sm:$0xff]  ;;  %v5658_v44 = vpack.c.bf16 %v4752_v57, %v4750_v4  ;;  %v4782_v4 = vld [vmem:[%s9784_s2 + $0x1120] sm:$0xff] }
 0x484   : > { %v5650_v28 = vpack.c.bf16 %v4680_v35, %v4678_v27  ;;  %v4774_v35 = vld [vmem:[%s9784_s2 + $0x10e0] sm:$0xff]  ;;  %v4784_v57 = vld [vmem:[%s9784_s2 + $0x1130] sm:$0xff] }
 0x485   : > { %v2366_v3 = vsel %vm376_vm1, %v2361_v33, %v2365_v62  ;;  %5631 = vmatpush1.bf16.msra.mxu0 %v5630_v50  ;;  %v4671_v33 = vld [vmem:[%s9784_s2 + $0xda8] sm:$0xff]  ;;  %v4756_v62 = vld [vmem:[%s9784_s2 + $0x1050] sm:$0xff]  ;;  %v5690_v41 = vpack.c.bf16 %v4784_v57, %v4782_v4 }
 0x486   : > { %2386 = vst [vmem:[#allocation2 + $0x48] sm:$0xf] %v2366_v3  ;;  %5633 = vmatprep.subr.bf16.mxu0 %v5632_v58  ;;  %v5640_v15 = vpack.c.bf16 %v4673_v59, %v4671_v33  ;;  %v4759_v50 = vld [vmem:[%s9784_s2 + $0x1068] sm:$0xff]  ;;  %v4761_v58 = vld [vmem:[%s9784_s2 + $0x1078] sm:$0xff]  ;;  %v5662_v23 = vpack.c.bf16 %v4756_v62, %v4754_v63  ;;  %v4758_v3 = vld [vmem:[%s9784_s2 + $0x1060] sm:$0xff] }
 0x487   : > { %v5664_v1 = vpack.c.bf16 %v4761_v58, %v4759_v50  ;;  %v4762_v33 = vld [vmem:[%s9784_s2 + $0x1080] sm:$0xff]  ;;  %v4764_v59 = vld [vmem:[%s9784_s2 + $0x1090] sm:$0xff]  ;;  %v4791_v62 = vld [vmem:[%s9784_s2 + $0x1168] sm:$0xff] }
 0x488   : > { %v5670_v49 = vpack.c.bf16 %v4764_v59, %v4762_v33  ;;  %v4788_v63 = vld [vmem:[%s9784_s2 + $0x1150] sm:$0xff]  ;;  %v4793_v50 = vld [vmem:[%s9784_s2 + $0x1178] sm:$0xff]  ;;  %v4799_v33 = vld [vmem:[%s9784_s2 + $0x11a8] sm:$0xff] }
 0x489   : > { %5635 = vmatpush1.bf16.msra.mxu0 %v5634_v39  ;;  %v4765_v39 = vld [vmem:[%s9784_s2 + $0x1098] sm:$0xff]  ;;  %v4877_v4 = vld [vmem:[%s9784_s2 + $0x1410] sm:$0xff] }
 0x48a   : > { %5637 = vmatprep.subr.bf16.mxu0 %v5636_v7  ;;  %v5666_v7 = vpack.c.bf16 %v4760_v17, %v4758_v3  ;;  %v5668_v42 = vpack.c.bf16 %v4765_v39, %v4763_v6  ;;  %v4792_v3 = vld [vmem:[%s9784_s2 + $0x1170] sm:$0xff]  ;;  %v4795_v17 = vld [vmem:[%s9784_s2 + $0x1188] sm:$0xff]  ;;  %v4797_v6 = vld [vmem:[%s9784_s2 + $0x1198] sm:$0xff] }
 0x48b   : > { %v4801_v59 = vld [vmem:[%s9784_s2 + $0x11b8] sm:$0xff] }
 0x48d   : > { %v2465_v14 = vld [vmem:[#allocation2 + $0x48] sm:$0xf]  ;;  %5639 = vmatpush1.bf16.msra.mxu0 %v5638_v25  ;;  %v4769_v25 = vld [vmem:[%s9784_s2 + $0x10b8] sm:$0xff] }
 0x48e   : > { %v2557_v19 = vrot.slane %v2465_v14, 1  ;;  %5641 = vmatprep.subr.bf16.mxu0 %v5640_v15  ;;  %v2396_v15 = vld [vmem:[#allocation2 + $0x48] sm:$0x7]  ;;  %v2836_v14 = vrot.slane %v8260_v13, 2 }
 0x490   : > { %v2558_v46 = vsel %vm682_vm3, %v2553_v8, %v2557_v19  ;;  %v4681_v8 = vld [vmem:[%s9784_s2 + $0xdf8] sm:$0xff] }
 0x491   : > { %2651 = vmatprep.mubr.f32.mxu0 %v2558_v46  ;;  %5643 = vmatpush1.bf16.msra.mxu0 %v5642_v55  ;;  %v5648_v43 = vpack.c.bf16 %v4681_v8, %v4679_v26  ;;  %v4771_v55 = vld [vmem:[%s9784_s2 + $0x10c8] sm:$0xff]  ;;  %v4773_v46 = vld [vmem:[%s9784_s2 + $0x10d8] sm:$0xff]  ;;  %v4772_v26 = vld [vmem:[%s9784_s2 + $0x10d0] sm:$0xff] }
 0x492   : > { %2652 = vmatmul.mubr.f32.gmra.mrb[22].mxu0 %v2556_v37  ;;  %5645 = vmatprep.subr.bf16.mxu0 %v5644_v52  ;;  %v2837_v52 = vsel %vm974_vm4, %v2835_v24, %v2836_v14  ;;  %v5676_v22 = vpack.c.bf16 %v4773_v46, %v4771_v55  ;;  %v4770_v37 = vld [vmem:[%s9784_s2 + $0x10c0] sm:$0xff]  ;;  %v4775_v8 = vld [vmem:[%s9784_s2 + $0x10e8] sm:$0xff]  ;;  %v4800_v24 = vld [vmem:[%s9784_s2 + $0x11b0] sm:$0xff] }
 0x493   : > { %2657 = vmatprep.mubr.f32.mxu0 %v2557_v19  ;;  %v2395_v19 = vld [vmem:[#allocation2 + $0x40] sm:$0x7]  ;;  %v4804_v55 = vld [vmem:[%s9784_s2 + $0x11d0] sm:$0xff]  ;;  %v4807_v46 = vld [vmem:[%s9784_s2 + $0x11e8] sm:$0xff] }
 0x495   : > { %5647 = vmatpush1.bf16.msra.mxu0 %v5646_v36  ;;  %v4777_v36 = vld [vmem:[%s9784_s2 + $0x10f8] sm:$0xff] }
 0x496   : > { %2658 = vmatmul.mubr.f32.gmra.mrb[24].mxu0 %v2555_v0  ;;  %5649 = vmatprep.subr.bf16.mxu0 %v5648_v43  ;;  %v5672_v0 = vpack.c.bf16 %v4769_v25, %v4767_v60  ;;  %v5678_v43 = vpack.c.bf16 %v4772_v26, %v4770_v37  ;;  %v5680_v27 = vpack.c.bf16 %v4777_v36, %v4775_v8  ;;  %v4806_v37 = vld [vmem:[%s9784_s2 + $0x11e0] sm:$0xff]  ;;  %v4808_v26 = vld [vmem:[%s9784_s2 + $0x11f0] sm:$0xff] }
 0x497   : > { %2728 = vmatprep.mubr.f32.mxu0 %v2388_v51  ;;  %v4781_v51 = vld [vmem:[%s9784_s2 + $0x1118] sm:$0xff]  ;;  %v5704_v25 = vpack.c.bf16 %v4801_v59, %v4799_v33  ;;  %v2759_v8 = vld [vmem:[#allocation2] sm:$0xfc]  ;;  %v5714_v36 = vpack.c.bf16 %v4808_v26, %v4806_v37  ;;  %v4892_v33 = vld [vmem:[%s9784_s2 + $0x1488] sm:$0xff] }
 0x498   : > { %v4894_v59 = vld [vmem:[%s9784_s2 + $0x1498] sm:$0xff]  ;;  %v4901_v37 = vld [vmem:[%s9784_s2 + $0x14d0] sm:$0xff] }
 0x499   : > { %5651 = vmatpush1.bf16.msra.mxu0 %v5650_v28  ;;  %v5682_v28 = vpack.c.bf16 %v4776_v48, %v4774_v35  ;;  %v2833_v35 = vrot.slane %v8256_v12, 2 }
 0x49a   : > { %5653 = vmatprep.subr.bf16.mxu0 %v5652_v5  ;;  %v5684_v5 = vpack.c.bf16 %v4781_v51, %v4779_v38  ;;  %v2838_v38 = vrot.slane %v8285_v34, 2 }
 0x49c   : > { %2729 = vmatmul.mubr.f32.vlgmr.msra.gmra.mrb[16].mxu0 %v2387_v47  ;;  %v4787_v47 = vld [vmem:[%s9784_s2 + $0x1148] sm:$0xff] }
 0x49d   : > { %2734 = vmatprep.mubr.f32.mxu0 %v8260_v13  ;;  %5655 = vmatpush1.bf16.msra.mxu0 %v5654_v56  ;;  %v5686_v56 = vpack.c.bf16 %v4780_v40, %v4778_v20  ;;  %v2839_v20 = vsel %vm974_vm4, %v2833_v35, %v2838_v38 }
 0x49e   : > { %5657 = vmatprep.subr.bf16.mxu0 %v5656_v2  ;;  %v5688_v2 = vpack.c.bf16 %v4785_v10, %v4783_v53  ;;  %v2761_v53 = vld [vmem:[#allocation2 + $0x40] sm:$0x1f] }
 0x49f   : > { %v2846_v10 = vrot.slane %v2761_v53, 2 }
 0x4a0   : > { %2735 = vmatmul.mubr.f32.gmra.mrb[18].mxu0 %v8256_v12 }
 0x4a1   : > { %2740 = vmatprep.mubr.f32.mxu0 %v8297_v18  ;;  %5659 = vmatpush1.bf16.msra.mxu0 %v5658_v44  ;;  %v5692_v44 = vpack.c.bf16 %v4789_v45, %v4787_v47  ;;  %v4880_v47 = vld [vmem:[%s9784_s2 + $0x1428] sm:$0xff]  ;;  %v4882_v45 = vld [vmem:[%s9784_s2 + $0x1438] sm:$0xff] }
 0x4a2   : > { %5661 = vmatprep.subr.bf16.mxu0 %v5660_v21  ;;  %v4786_v21 = vld [vmem:[%s9784_s2 + $0x1140] sm:$0xff] }
 0x4a3   : > { %v5694_v58 = vpack.c.bf16 %v4788_v63, %v4786_v21  ;;  %v4881_v21 = vld [vmem:[%s9784_s2 + $0x1430] sm:$0xff] }
 0x4a4   : > { %2741 = vmatmul.mubr.f32.gmra.mrb[20].mxu0 %v8285_v34 }
 0x4a5   : > { %2746 = vmatprep.mubr.f32.mxu0 %v8345_v11  ;;  %5663 = vmatpush1.bf16.msra.mxu0 %v5662_v23  ;;  %v5696_v23 = vpack.c.bf16 %v4793_v50, %v4791_v62  ;;  %v4884_v62 = vld [vmem:[%s9784_s2 + $0x1448] sm:$0xff]  ;;  %v4886_v50 = vld [vmem:[%s9784_s2 + $0x1458] sm:$0xff] }
 0x4a6   : > { %5665 = vmatprep.subr.bf16.mxu0 %v5664_v1  ;;  %v4790_v1 = vld [vmem:[%s9784_s2 + $0x1160] sm:$0xff] }
 0x4a7   : > { %v5698_v39 = vpack.c.bf16 %v4792_v3, %v4790_v1  ;;  %v4885_v1 = vld [vmem:[%s9784_s2 + $0x1450] sm:$0xff] }
 0x4a8   : > { %2747 = vmatmul.mubr.f32.gmra.mrb[22].mxu0 %v8328_v54 }
 0x4a9   : > { %2752 = vmatprep.mubr.f32.mxu0 %v2396_v15  ;;  %5667 = vmatpush1.bf16.msra.mxu0 %v5666_v7  ;;  %v5700_v7 = vpack.c.bf16 %v4797_v6, %v4795_v17  ;;  %v4798_v15 = vld [vmem:[%s9784_s2 + $0x11a0] sm:$0xff]  ;;  %v4888_v17 = vld [vmem:[%s9784_s2 + $0x1468] sm:$0xff]  ;;  %v4890_v6 = vld [vmem:[%s9784_s2 + $0x1478] sm:$0xff] }
 0x4aa   : > { %5669 = vmatprep.subr.bf16.mxu0 %v5668_v42  ;;  %v4796_v42 = vld [vmem:[%s9784_s2 + $0x1190] sm:$0xff]  ;;  %v5706_v61 = vpack.c.bf16 %v4800_v24, %v4798_v15 }
 0x4ab   : > { %v5702_v60 = vpack.c.bf16 %v4796_v42, %v4794_v16  ;;  %v4889_v16 = vld [vmem:[%s9784_s2 + $0x1470] sm:$0xff] }
 0x4ac   : > { %2753 = vmatmul.mubr.f32.gmra.mrb[24].mxu0 %v2395_v19  ;;  %v4802_v19 = vld [vmem:[%s9784_s2 + $0x11c0] sm:$0xff]  ;;  %v4893_v15 = vld [vmem:[%s9784_s2 + $0x1490] sm:$0xff] }
 0x4ad   : > { %5671 = vmatpush1.bf16.msra.mxu0 %v5670_v49  ;;  %2924 = vmatprep.mubr.f32.mxu0 %v2837_v52  ;;  %v4803_v49 = vld [vmem:[%s9784_s2 + $0x11c8] sm:$0xff]  ;;  %v4809_v52 = vld [vmem:[%s9784_s2 + $0x11f8] sm:$0xff] }
 0x4ae   : > { %5673 = vmatprep.subr.bf16.mxu0 %v5672_v0  ;;  %v4805_v0 = vld [vmem:[%s9784_s2 + $0x11d8] sm:$0xff] }
 0x4af   : > { %v5708_v32 = vpack.c.bf16 %v4805_v0, %v4803_v49  ;;  %v4896_v49 = vld [vmem:[%s9784_s2 + $0x14a8] sm:$0xff]  ;;  %v4898_v0 = vld [vmem:[%s9784_s2 + $0x14b8] sm:$0xff] }
 0x4b1   : > { %5675 = vmatpush1.bf16.msra.mxu0 %v5674_v30  ;;  %v5710_v30 = vpack.c.bf16 %v4804_v55, %v4802_v19  ;;  %v4897_v19 = vld [vmem:[%s9784_s2 + $0x14b0] sm:$0xff] }
 0x4b2   : > { %5677 = vmatprep.subr.bf16.mxu0 %v5676_v22  ;;  %v5712_v22 = vpack.c.bf16 %v4809_v52, %v4807_v46  ;;  %v4900_v46 = vld [vmem:[%s9784_s2 + $0x14c8] sm:$0xff]  ;;  %v4902_v52 = vld [vmem:[%s9784_s2 + $0x14d8] sm:$0xff] }
 0x4b5   : > { %5679 = vmatpush1.bf16.msra.mxu0 %v5678_v43  ;;  %v2832_v43 = vrot.slane %v2759_v8, 2  ;;  %v4904_v8 = vld [vmem:[%s9784_s2 + $0x14e8] sm:$0xff] }
 0x4b6   : > { %5681 = vmatprep.subr.bf16.mxu0 %v5680_v27  ;;  %v2840_v27 = vrot.slane %v8297_v18, 2  ;;  %v2842_v18 = vrot.slane %v8328_v54, 2  ;;  %v4876_v54 = vld [vmem:[%s9784_s2 + $0x1408] sm:$0xff] }
 0x4b7   : > { %v2834_v48 = vsel %vm974_vm4, %v2832_v43, %v2833_v35  ;;  %v4905_v35 = vld [vmem:[%s9784_s2 + $0x14f0] sm:$0xff] }
 0x4b8   : > { %v2841_v51 = vsel %vm974_vm4, %v2836_v14, %v2840_v27  ;;  %v2843_v34 = vsel %vm974_vm4, %v2838_v38, %v2842_v18  ;;  %v4878_v14 = vld [vmem:[%s9784_s2 + $0x1418] sm:$0xff]  ;;  %v4908_v38 = vld [vmem:[%s9784_s2 + $0x1508] sm:$0xff] }
 0x4b9   : > { %5683 = vmatpush1.bf16.msra.mxu0 %v5682_v28  ;;  %v2844_v28 = vrot.slane %v8345_v11, 2  ;;  %v2847_v11 = vsel %vm974_vm4, %v2842_v18, %v2846_v10 }
 0x4ba   : > { %5685 = vmatprep.subr.bf16.mxu0 %v5684_v5  ;;  %v2762_v5 = vld [vmem:[#allocation2 + $0x48] sm:$0x1f] }
 0x4bb   : > { %v2845_v12 = vsel %vm974_vm4, %v2840_v27, %v2844_v28  ;;  %v2848_v40 = vrot.slane %v2762_v5, 2  ;;  %v4903_v27 = vld [vmem:[%s9784_s2 + $0x14e0] sm:$0xff] }
 0x4bc   : > { %v4907_v5 = vld [vmem:[%s9784_s2 + $0x1500] sm:$0xff] }
 0x4bd   : > { %5687 = vmatpush1.bf16.msra.mxu0 %v5686_v56  ;;  %v2849_v13 = vsel %vm974_vm4, %v2844_v28, %v2848_v40  ;;  %v5716_v56 = vpack.c.bf16 %v4878_v14, %v4876_v54  ;;  %v4918_v54 = vld [vmem:[%s9784_s2 + $0x1558] sm:$0xff] }
 0x4be   : > { %5689 = vmatprep.subr.bf16.mxu0 %v5688_v2  ;;  %v4875_v2 = vld [vmem:[%s9784_s2 + $0x1400] sm:$0xff] }
 0x4bf   : > { %v5718_v57 = vpack.c.bf16 %v4877_v4, %v4875_v2  ;;  %5717 = vmatprep.subr.bf16.mxu1 %v5716_v56  ;;  %v4915_v56 = vld [vmem:[%s9784_s2 + $0x1540] sm:$0xff]  ;;  %v4917_v2 = vld [vmem:[%s9784_s2 + $0x1550] sm:$0xff] }
 0x4c0   : > { %v5758_v4 = vpack.c.bf16 %v4917_v2, %v4915_v56 }
 0x4c1   : > { %5691 = vmatpush1.bf16.msra.mxu0 %v5690_v41  ;;  %5719 = vmatpush1.bf16.msra.mxu1 %v5718_v57  ;;  %v5720_v41 = vpack.c.bf16 %v4882_v45, %v4880_v47  ;;  %v4920_v57 = vld [vmem:[%s9784_s2 + $0x1568] sm:$0xff]  ;;  %v4922_v47 = vld [vmem:[%s9784_s2 + $0x1578] sm:$0xff] }
 0x4c2   : > { %5693 = vmatprep.subr.bf16.mxu0 %v5692_v44  ;;  %v4879_v44 = vld [vmem:[%s9784_s2 + $0x1420] sm:$0xff]  ;;  %v5760_v45 = vpack.c.bf16 %v4922_v47, %v4920_v57 }
 0x4c3   : > { %v5722_v63 = vpack.c.bf16 %v4881_v21, %v4879_v44  ;;  %5721 = vmatprep.subr.bf16.mxu1 %v5720_v41  ;;  %v4919_v41 = vld [vmem:[%s9784_s2 + $0x1560] sm:$0xff]  ;;  %v4921_v44 = vld [vmem:[%s9784_s2 + $0x1570] sm:$0xff] }
 0x4c4   : > { %v5762_v21 = vpack.c.bf16 %v4921_v44, %v4919_v41 }
 0x4c5   : > { %5695 = vmatpush1.bf16.msra.mxu0 %v5694_v58  ;;  %5723 = vmatpush1.bf16.msra.mxu1 %v5722_v63  ;;  %v5724_v58 = vpack.c.bf16 %v4886_v50, %v4884_v62  ;;  %v4924_v63 = vld [vmem:[%s9784_s2 + $0x1588] sm:$0xff]  ;;  %v4926_v62 = vld [vmem:[%s9784_s2 + $0x1598] sm:$0xff] }
 0x4c6   : > { %5697 = vmatprep.subr.bf16.mxu0 %v5696_v23  ;;  %v4883_v23 = vld [vmem:[%s9784_s2 + $0x1440] sm:$0xff]  ;;  %v5764_v50 = vpack.c.bf16 %v4926_v62, %v4924_v63 }
 0x4c7   : > { %v5726_v3 = vpack.c.bf16 %v4885_v1, %v4883_v23  ;;  %5725 = vmatprep.subr.bf16.mxu1 %v5724_v58  ;;  %v4923_v58 = vld [vmem:[%s9784_s2 + $0x1580] sm:$0xff]  ;;  %v4925_v23 = vld [vmem:[%s9784_s2 + $0x1590] sm:$0xff] }
 0x4c8   : > { %v5766_v1 = vpack.c.bf16 %v4925_v23, %v4923_v58  ;;  %v8980_v23 = vld [vmem:[%s9784_s2 + $0x1200] sm:$0xff] }
 0x4c9   : > { %5699 = vmatpush1.bf16.msra.mxu0 %v5698_v39  ;;  %5727 = vmatpush1.bf16.msra.mxu1 %v5726_v3  ;;  %v5728_v39 = vpack.c.bf16 %v4890_v6, %v4888_v17  ;;  %v4928_v3 = vld [vmem:[%s9784_s2 + $0x15a8] sm:$0xff]  ;;  %v4930_v17 = vld [vmem:[%s9784_s2 + $0x15b8] sm:$0xff] }
 0x4ca   : > { %5701 = vmatprep.subr.bf16.mxu0 %v5700_v7  ;;  %v4887_v7 = vld [vmem:[%s9784_s2 + $0x1460] sm:$0xff]  ;;  %v5768_v6 = vpack.c.bf16 %v4930_v17, %v4928_v3 }
 0x4cb   : > { %v5730_v42 = vpack.c.bf16 %v4889_v16, %v4887_v7  ;;  %5729 = vmatprep.subr.bf16.mxu1 %v5728_v39  ;;  %v4927_v39 = vld [vmem:[%s9784_s2 + $0x15a0] sm:$0xff]  ;;  %v4929_v7 = vld [vmem:[%s9784_s2 + $0x15b0] sm:$0xff] }
 0x4cc   : > { %v5770_v16 = vpack.c.bf16 %v4929_v7, %v4927_v39 }
 0x4cd   : > { %5703 = vmatpush1.bf16.msra.mxu0 %v5702_v60  ;;  %5731 = vmatpush1.bf16.msra.mxu1 %v5730_v42  ;;  %v5732_v60 = vpack.c.bf16 %v4894_v59, %v4892_v33  ;;  %v4932_v42 = vld [vmem:[%s9784_s2 + $0x15c8] sm:$0xff]  ;;  %v4934_v33 = vld [vmem:[%s9784_s2 + $0x15d8] sm:$0xff] }
 0x4ce   : > { %5705 = vmatprep.subr.bf16.mxu0 %v5704_v25  ;;  %v4891_v25 = vld [vmem:[%s9784_s2 + $0x1480] sm:$0xff]  ;;  %v5772_v59 = vpack.c.bf16 %v4934_v33, %v4932_v42 }
 0x4cf   : > { %v5734_v24 = vpack.c.bf16 %v4893_v15, %v4891_v25  ;;  %5733 = vmatprep.subr.bf16.mxu1 %v5732_v60  ;;  %v4931_v60 = vld [vmem:[%s9784_s2 + $0x15c0] sm:$0xff]  ;;  %v4933_v25 = vld [vmem:[%s9784_s2 + $0x15d0] sm:$0xff] }
 0x4d0   : > { %v5774_v15 = vpack.c.bf16 %v4933_v25, %v4931_v60 }
 0x4d1   : > { %5707 = vmatpush1.bf16.msra.mxu0 %v5706_v61  ;;  %5735 = vmatpush1.bf16.msra.mxu1 %v5734_v24  ;;  %v5736_v61 = vpack.c.bf16 %v4898_v0, %v4896_v49  ;;  %v4936_v24 = vld [vmem:[%s9784_s2 + $0x15e8] sm:$0xff]  ;;  %v4938_v49 = vld [vmem:[%s9784_s2 + $0x15f8] sm:$0xff] }
 0x4d2   : > { %5709 = vmatprep.subr.bf16.mxu0 %v5708_v32  ;;  %v4895_v32 = vld [vmem:[%s9784_s2 + $0x14a0] sm:$0xff]  ;;  %v5776_v0 = vpack.c.bf16 %v4938_v49, %v4936_v24 }
 0x4d3   : > { %v5738_v55 = vpack.c.bf16 %v4897_v19, %v4895_v32  ;;  %5737 = vmatprep.subr.bf16.mxu1 %v5736_v61  ;;  %v4935_v61 = vld [vmem:[%s9784_s2 + $0x15e0] sm:$0xff]  ;;  %v4937_v32 = vld [vmem:[%s9784_s2 + $0x15f0] sm:$0xff] }
 0x4d4   : > { %v5778_v19 = vpack.c.bf16 %v4937_v32, %v4935_v61 }
 0x4d5   : > { %5711 = vmatpush1.bf16.msra.mxu0 %v5710_v30  ;;  %5739 = vmatpush1.bf16.msra.mxu1 %v5738_v55  ;;  %v5740_v30 = vpack.c.bf16 %v4902_v52, %v4900_v46  ;;  %v4812_v55 = vld [vmem:[%s9784_s2 + $0x1208] sm:$0xff]  ;;  %v4814_v46 = vld [vmem:[%s9784_s2 + $0x1218] sm:$0xff] }
 0x4d6   : > { %5713 = vmatprep.subr.bf16.mxu0 %v5712_v22  ;;  %v4899_v22 = vld [vmem:[%s9784_s2 + $0x14c0] sm:$0xff]  ;;  %v5780_v52 = vpack.c.bf16 %v4814_v46, %v4812_v55 }
 0x4d7   : > { %v5742_v26 = vpack.c.bf16 %v4901_v37, %v4899_v22  ;;  %5741 = vmatprep.subr.bf16.mxu1 %v5740_v30  ;;  %v4810_v30 = vld [vmem:[%s9785_s3 + $0x2] ss:$4 sm:$0x3] }
 0x4d8   : > { %v8950_v22 = vrot.slane %v4810_v30, %v7248_v29  ;;  %v8953_v37 = vrot.slane %v4810_v30, %v7253_v31 }
 0x4d9   : > { %5715 = vmatpush1.bf16.msra.mxu0 %v5714_v36  ;;  %5743 = vmatpush1.bf16.msra.mxu1 %v5742_v26  ;;  %v4906_v36 = vld [vmem:[%s9784_s2 + $0x14f8] sm:$0xff] }
 0x4da   : > { %v5744_v43 = vpack.c.bf16 %v4906_v36, %v4904_v8 }
 0x4dc   : > { %2925 = vmatmul.mubr.f32.vlgmr.msra.gmra.mrb[16].mxu0 %v2834_v48  ;;  %v5746_v48 = vpack.c.bf16 %v4905_v35, %v4903_v27  ;;  %5745 = vmatprep.subr.bf16.mxu1 %v5744_v43 }
 0x4dd   : > { %2930 = vmatprep.mubr.f32.mxu0 %v2841_v51  ;;  %v4910_v51 = vld [vmem:[%s9784_s2 + $0x1518] sm:$0xff] }
 0x4de   : > { %5747 = vmatpush1.bf16.msra.mxu1 %v5746_v48  ;;  %v5748_v28 = vpack.c.bf16 %v4910_v51, %v4908_v38 }
 0x4e0   : > { %2931 = vmatmul.mubr.f32.gmra.mrb[18].mxu0 %v2839_v20  ;;  %v4909_v20 = vld [vmem:[%s9784_s2 + $0x1510] sm:$0xff]  ;;  %5749 = vmatprep.subr.bf16.mxu1 %v5748_v28 }
 0x4e1   : > { %2936 = vmatprep.mubr.f32.mxu0 %v2845_v12  ;;  %v5750_v18 = vpack.c.bf16 %v4909_v20, %v4907_v5  ;;  %v4912_v12 = vld [vmem:[%s9784_s2 + $0x1528] sm:$0xff] }
 0x4e3   : > { %5751 = vmatpush1.bf16.msra.mxu1 %v5750_v18 }
 0x4e4   : > { %2937 = vmatmul.mubr.f32.gmra.mrb[20].mxu0 %v2843_v34  ;;  %v4911_v34 = vld [vmem:[%s9784_s2 + $0x1520] sm:$0xff] }
 0x4e5   : > { %2942 = vmatprep.mubr.f32.mxu0 %v2849_v13 }
 0x4e8   : > { %2943 = vmatmul.mubr.f32.gmra.mrb[22].mxu0 %v2847_v11  ;;  %v4916_v11 = vld [vmem:[%s9784_s2 + $0x1548] sm:$0xff] }
 0x4e9   : > { %2948 = vmatprep.mubr.f32.mxu0 %v2848_v40  ;;  %v4914_v40 = vld [vmem:[%s9784_s2 + $0x1538] sm:$0xff]  ;;  %v5756_v14 = vpack.c.bf16 %v4918_v54, %v4916_v11 }
 0x4ea   : > { %v5752_v53 = vpack.c.bf16 %v4914_v40, %v4912_v12 }
 0x4ec   : > { %2949 = vmatmul.mubr.f32.gmra.mrb[24].mxu0 %v2846_v10  ;;  %v4913_v10 = vld [vmem:[%s9784_s2 + $0x1530] sm:$0xff]  ;;  %5753 = vmatprep.subr.bf16.mxu1 %v5752_v53 }
 0x4ed   : > { %v5754_v13 = vpack.c.bf16 %v4913_v10, %v4911_v34 }
 0x4ef   : > { %5755 = vmatpush1.bf16.msra.mxu1 %v5754_v13 }
 0x4f0   : > { %5757 = vmatprep.subr.bf16.mxu1 %v5756_v14 }
 0x4f3   : > { %5759 = vmatpush1.bf16.msra.mxu1 %v5758_v4 }
 0x4f4   : > { %5761 = vmatprep.subr.bf16.mxu1 %v5760_v45 }
 0x4f7   : > { %5763 = vmatpush1.bf16.msra.mxu1 %v5762_v21 }
 0x4f8   : > { %5765 = vmatprep.subr.bf16.mxu1 %v5764_v50 }
 0x4fb   : > { %5767 = vmatpush1.bf16.msra.mxu1 %v5766_v1  ;;  %v8985_v1 = vld [vmem:[%s9784_s2 + $0x1210] sm:$0xff] }
 0x4fc   : > { %5769 = vmatprep.subr.bf16.mxu1 %v5768_v6  ;;  %v5782_v25 = vpack.c.bf16 %v8985_v1, %v8980_v23 }
 0x4ff   : > { %5771 = vmatpush1.bf16.msra.mxu1 %v5770_v16 }
 0x500   : > { %5773 = vmatprep.subr.bf16.mxu1 %v5772_v59 }
 0x503   : > { %5775 = vmatpush1.bf16.msra.mxu1 %v5774_v15 }
 0x504   : > { %5777 = vmatprep.subr.bf16.mxu1 %v5776_v0 }
 0x507   : > { %5779 = vmatpush1.bf16.msra.mxu1 %v5778_v19 }
 0x508   : > { %5781 = vmatprep.subr.bf16.mxu1 %v5780_v52 }
 0x5af   : > { %v2926_v26 = vpop.f32.mrb[16].mxu0 }
 0x5b0   : > { %v8956_v8 = vadd.f32 %v8950_v22, %v2926_v26  ;;  %v2928_v36 = vpop.f32.mrb[17].mxu0 }
 0x5b1   : > { %v8959_v43 = vadd.f32 %v8953_v37, %v2928_v36 }
 0x5b2   : > { %v2988_v27 = vand.u32 2147483647, %v8956_v8  ;;  %v8990_v42 = vmul.f32 0.5, %v8956_v8  ;;  %vm3198_vm14 = vcmp.ge.f32.partialorder %v8956_v8, 0.0 }
 0x5b3   : > { %v2989_v35 = vand.u32 2147483647, %v8959_v43  ;;  %v2932_v48 = vpop.f32.mrb[18].mxu0  ;;  %v8997_v15 = vmul.f32 0.5, %v8959_v43  ;;  %vm3199_vm15 = vcmp.ge.f32.partialorder %v8959_v43, 0.0 }
 0x5b4   : > { %v2998_v38 = vmul.f32 0.70710677, %v2988_v27  ;;  %v8964_v51 = vadd.f32 %v8950_v22, %v2932_v48  ;;  %v2934_v28 = vpop.f32.mrb[19].mxu0 }
 0x5b5   : > { %v2999_v5 = vmul.f32 0.70710677, %v2989_v35  ;;  %v8967_v20 = vadd.f32 %v8953_v37, %v2934_v28 }
 0x5b6   : > { %v3008_v18 = vmul.f32 0.3275911, %v2998_v38  ;;  %v3138_v12 = vsub.f32 0.0, %v2998_v38  ;;  %v2990_v40 = vand.u32 2147483647, %v8964_v51  ;;  %v9006_v61 = vmul.f32 0.5, %v8964_v51 }
 0x5b7   : > { %v3009_v53 = vmul.f32 0.3275911, %v2999_v5  ;;  %v3139_v34 = vsub.f32 0.0, %v2999_v5  ;;  %v2991_v10 = vand.u32 2147483647, %v8967_v20  ;;  %v2938_v54 = vpop.f32.mrb[20].mxu0 }
 0x5b8   : > { %v3018_v13 = vadd.f32 1.0, %v3008_v18  ;;  %v3000_v11 = vmul.f32 0.70710677, %v2990_v40  ;;  %v2940_v2 = vpop.f32.mrb[21].mxu0  ;;  %v3148_v4 = vmul.f32 %v3138_v12, %v2998_v38  ;;  %v8972_v63 = vadd.f32 %v8950_v22, %v2938_v54 }
 0x5b9   : > { %v3019_v14 = vadd.f32 1.0, %v3009_v53  ;;  %v3001_v56 = vmul.f32 0.70710677, %v2991_v10  ;;  %v3149_v47 = vmul.f32 %v3139_v34, %v2999_v5  ;;  %v8975_v58 = vadd.f32 %v8953_v37, %v2940_v2 }
 0x5ba   : > { %6078 = vrcp.f32 %v3018_v13  ;;  %v3010_v57 = vmul.f32 0.3275911, %v3000_v11  ;;  %v3140_v21 = vsub.f32 0.0, %v3000_v11  ;;  %v3158_v3 = vmul.f32 1.442695, %v3148_v4 }
 0x5bb   : > { %6080 = vrcp.f32 %v3019_v14  ;;  %v3011_v45 = vmul.f32 0.3275911, %v3001_v56  ;;  %v2944_v41 = vpop.f32.mrb[22].mxu0  ;;  %v3141_v17 = vsub.f32 0.0, %v3001_v56  ;;  %v2992_v6 = vand.u32 2147483647, %v8972_v63 }
 0x5bc   : > { %v3020_v44 = vadd.f32 1.0, %v3010_v57  ;;  %v2946_v62 = vpop.f32.mrb[23].mxu0  ;;  %v3160_v39 = vmul.f32 1.442695, %v3149_v47  ;;  %v2993_v7 = vand.u32 2147483647, %v8975_v58  ;;  %v3150_v33 = vmul.f32 %v3140_v21, %v3000_v11 }
 0x5bd   : > { %v3021_v50 = vadd.f32 1.0, %v3011_v45  ;;  %v3002_v59 = vmul.f32 0.70710677, %v2992_v6  ;;  %v9000_v49 = vadd.f32 %v8950_v22, %v2944_v41  ;;  %v9003_v0 = vadd.f32 %v8953_v37, %v2946_v62 }
 0x5be   : > { %6082 = vrcp.f32 %v3020_v44  ;;  %v3003_v24 = vmul.f32 0.70710677, %v2993_v7  ;;  %v3151_v32 = vmul.f32 %v3141_v17, %v3001_v56  ;;  %v9009_v55 = vmul.f32 0.5, %v8967_v20 }
 0x5bf   : > { %6084 = vrcp.f32 %v3021_v50  ;;  %v2950_v16 = vpop.f32.mrb[24].mxu0  ;;  %v3012_v19 = vmul.f32 0.3275911, %v3002_v59  ;;  %v2994_v52 = vand.u32 2147483647, %v9000_v49  ;;  %v3142_v27 = vsub.f32 0.0, %v3002_v59 }
 0x5c0   : > { %v8992_v60 = vpop.f32.mrb[25].mxu0  ;;  %6086 = vpow2.f32 %v3158_v3  ;;  %v3013_v46 = vmul.f32 0.3275911, %v3003_v24  ;;  %v3162_v26 = vmul.f32 1.442695, %v3150_v33  ;;  %v3143_v5 = vsub.f32 0.0, %v3003_v24 }
 0x5c1   : > { %6088 = vpow2.f32 %v3160_v39  ;;  %v3022_v36 = vadd.f32 1.0, %v3012_v19  ;;  %v2995_v35 = vand.u32 2147483647, %v9003_v0  ;;  %v3004_v18 = vmul.f32 0.70710677, %v2994_v52 }
 0x5c2   : > { %v3023_v28 = vadd.f32 1.0, %v3013_v46  ;;  %v3164_v40 = vmul.f32 1.442695, %v3151_v32  ;;  %v9020_v13 = vadd.f32 %v8950_v22, %v2950_v16  ;;  %v3152_v14 = vmul.f32 %v3142_v27, %v3002_v59 }
 0x5c3   : > { %6090 = vrcp.f32 %v3022_v36  ;;  %v3005_v53 = vmul.f32 0.70710677, %v2995_v35  ;;  %v3014_v10 = vmul.f32 0.3275911, %v3004_v18  ;;  %v3144_v56 = vsub.f32 0.0, %v3004_v18 }
 0x5c4   : > { %v9012_v30 = vpop.eup %6078  ;;  %6092 = vrcp.f32 %v3023_v28  ;;  %v3153_v45 = vmul.f32 %v3143_v5, %v3003_v24  ;;  %v3166_v16 = vmul.f32 1.442695, %v3152_v14  ;;  %vm3200_vm0 = vcmp.ge.f32.partialorder %v8964_v51, 0.0 }
 0x5c5   : > { %v9015_v48 = vpop.eup %6080  ;;  %v3048_v38 = vmul.f32 1.0614054, %v9012_v30  ;;  %v3015_v2 = vmul.f32 0.3275911, %v3005_v53  ;;  %v3024_v41 = vadd.f32 1.0, %v3014_v10  ;;  %v3154_v22 = vmul.f32 %v3144_v56, %v3004_v18 }
 0x5c6   : > { %v3049_v12 = vmul.f32 1.0614054, %v9015_v48  ;;  %v3145_v17 = vsub.f32 0.0, %v3005_v53  ;;  %v3168_v32 = vmul.f32 1.442695, %v3153_v45  ;;  %vm3201_vm2 = vcmp.ge.f32.partialorder %v8967_v20, 0.0 }
 0x5c7   : > { %v3058_v34 = vadd.f32 -1.4531521, %v3048_v38  ;;  %v3025_v62 = vadd.f32 1.0, %v3015_v2  ;;  %6094 = vrcp.f32 %v3024_v41  ;;  %v3170_v36 = vmul.f32 1.442695, %v3154_v22 }
 0x5c8   : > { %v9022_v11 = vpop.eup %6082  ;;  %v3059_v54 = vadd.f32 -1.4531521, %v3049_v12  ;;  %v3155_v19 = vmul.f32 %v3145_v17, %v3005_v53  ;;  %v2996_v12 = vand.u32 2147483647, %v9020_v13  ;;  %vm3202_vm5 = vcmp.ge.f32.partialorder %v8972_v63, 0.0 }
 0x5c9   : > { %v9024_v4 = vpop.eup %6084  ;;  %v3068_v57 = vmul.f32 %v9012_v30, %v3058_v34  ;;  %v3050_v47 = vmul.f32 1.0614054, %v9022_v11  ;;  %6096 = vrcp.f32 %v3025_v62  ;;  %v3232_v20 = vmul.f32 0.5, %v8972_v63 }
 0x5ca   : > { %v3069_v44 = vmul.f32 %v9015_v48, %v3059_v54  ;;  %v3051_v21 = vmul.f32 1.0614054, %v9024_v4  ;;  %v6087_v6 = vpop.eup %6086  ;;  %6098 = vpow2.f32 %v3162_v26  ;;  %v3172_v38 = vmul.f32 1.442695, %v3155_v19 }
 0x5cb   : > { %v3078_v50 = vadd.f32 1.4214138, %v3068_v57  ;;  %v3060_v3 = vadd.f32 -1.4531521, %v3050_v47  ;;  %v6089_v33 = vpop.eup %6088  ;;  %6100 = vpow2.f32 %v3164_v40  ;;  %v9045_v56 = vmul.f32 0.70710677, %v2996_v12 }
 0x5cc   : > { %v3079_v39 = vadd.f32 1.4214138, %v3069_v44  ;;  %v3061_v7 = vadd.f32 -1.4531521, %v3051_v21  ;;  %6102 = vpow2.f32 %v3166_v16  ;;  %vm3203_vm6 = vcmp.ge.f32.partialorder %v8975_v58, 0.0 }
 0x5cd   : > { %v3088_v59 = vmul.f32 %v9012_v30, %v3078_v50  ;;  %v3070_v24 = vmul.f32 %v9022_v11, %v3060_v3  ;;  %v9034_v28 = vpop.eup %6090  ;;  %6104 = vpow2.f32 %v3168_v32  ;;  %v9055_v3 = vmul.f32 0.3275911, %v9045_v56 }
 0x5ce   : > { %v3089_v46 = vmul.f32 %v9015_v48, %v3079_v39  ;;  %v3071_v52 = vmul.f32 %v9024_v4, %v3061_v7  ;;  %v9037_v34 = vpop.eup %6092  ;;  %v3052_v10 = vmul.f32 1.0614054, %v9034_v28  ;;  %6106 = vpow2.f32 %v3170_v36 }
 0x5cf   : > { %v3098_v27 = vadd.f32 -0.28449672, %v3088_v59  ;;  %v3080_v35 = vadd.f32 1.4214138, %v3070_v24  ;;  %v3053_v14 = vmul.f32 1.0614054, %v9037_v34  ;;  %6108 = vpow2.f32 %v3172_v38 }
 0x5d0   : > { %v3099_v5 = vadd.f32 -0.28449672, %v3089_v46  ;;  %v3081_v18 = vadd.f32 1.4214138, %v3071_v52  ;;  %v3062_v47 = vadd.f32 -1.4531521, %v3052_v10 }
 0x5d1   : > { %v3108_v53 = vmul.f32 %v9012_v30, %v3098_v27  ;;  %v3090_v26 = vmul.f32 %v9022_v11, %v3080_v35  ;;  %v3063_v44 = vadd.f32 -1.4531521, %v3053_v14  ;;  %v9048_v21 = vpop.eup %6094  ;;  %vm3204_vm7 = vcmp.ge.f32.partialorder %v9000_v49, 0.0 }
 0x5d2   : > { %v3109_v54 = vmul.f32 %v9015_v48, %v3099_v5  ;;  %v3091_v40 = vmul.f32 %v9024_v4, %v3081_v18  ;;  %v3072_v50 = vmul.f32 %v9034_v28, %v3062_v47  ;;  %v3054_v59 = vmul.f32 1.0614054, %v9048_v21 }
 0x5d3   : > { %v3118_v2 = vadd.f32 0.2548296, %v3108_v53  ;;  %v3100_v57 = vadd.f32 -0.28449672, %v3090_v26  ;;  %v9057_v17 = vpop.eup %6096  ;;  %v3073_v16 = vmul.f32 %v9037_v34, %v3063_v44  ;;  %vm3205_vm8 = vcmp.ge.f32.partialorder %v9003_v0, 0.0 }
 0x5d4   : > { %v3119_v45 = vadd.f32 0.2548296, %v3109_v54  ;;  %v3101_v41 = vadd.f32 -0.28449672, %v3091_v40  ;;  %v3082_v32 = vadd.f32 1.4214138, %v3072_v50  ;;  %v6099_v46 = vpop.eup %6098 }
 0x5d5   : > { %v3128_v22 = vmul.f32 %v9012_v30, %v3118_v2  ;;  %v3110_v62 = vmul.f32 %v9022_v11, %v3100_v57  ;;  %v3055_v19 = vmul.f32 1.0614054, %v9057_v17  ;;  %v3083_v27 = vadd.f32 1.4214138, %v3073_v16  ;;  %v6101_v38 = vpop.eup %6100 }
 0x5d6   : > { %v3129_v39 = vmul.f32 %v9015_v48, %v3119_v45  ;;  %v3111_v7 = vmul.f32 %v9024_v4, %v3101_v41  ;;  %v3064_v35 = vadd.f32 -1.4531521, %v3054_v59  ;;  %v3092_v18 = vmul.f32 %v9034_v28, %v3082_v32  ;;  %v6103_v12 = vpop.eup %6102 }
 0x5d7   : > { %v3178_v30 = vmul.f32 %v6087_v6, %v3128_v22  ;;  %v3120_v24 = vadd.f32 0.2548296, %v3110_v62  ;;  %v3065_v6 = vadd.f32 -1.4531521, %v3055_v19  ;;  %v6105_v54 = vpop.eup %6104 }
 0x5d8   : > { %v3179_v52 = vmul.f32 %v6089_v33, %v3129_v39  ;;  %v3121_v36 = vadd.f32 0.2548296, %v3111_v7  ;;  %v3093_v33 = vmul.f32 %v9037_v34, %v3083_v27  ;;  %v3074_v10 = vmul.f32 %v9048_v21, %v3064_v35  ;;  %v6107_v44 = vpop.eup %6106 }
 0x5d9   : > { %v3188_v48 = vsub.f32 1.0, %v3178_v30  ;;  %v3130_v5 = vmul.f32 %v9022_v11, %v3120_v24  ;;  %v3102_v2 = vadd.f32 -0.28449672, %v3092_v18  ;;  %v3075_v57 = vmul.f32 %v9057_v17, %v3065_v6  ;;  %v6109_v39 = vpop.eup %6108 }
 0x5da   : > { %v3189_v53 = vsub.f32 1.0, %v3179_v52  ;;  %v3131_v26 = vmul.f32 %v9024_v4, %v3121_v36  ;;  %v3103_v45 = vadd.f32 -0.28449672, %v3093_v33  ;;  %v3084_v41 = vadd.f32 1.4214138, %v3074_v10 }
 0x5db   : > { %v3208_v40 = vsub.f32 0.0, %v3188_v48  ;;  %v3180_v14 = vmul.f32 %v6099_v46, %v3130_v5  ;;  %v3112_v4 = vmul.f32 %v9034_v28, %v3102_v2  ;;  %v3085_v50 = vadd.f32 1.4214138, %v3075_v57 }
 0x5dc   : > { %v3209_v11 = vsub.f32 0.0, %v3189_v53  ;;  %v3181_v47 = vmul.f32 %v6101_v38, %v3131_v26  ;;  %v3113_v30 = vmul.f32 %v9037_v34, %v3103_v45  ;;  %v3094_v46 = vmul.f32 %v9048_v21, %v3084_v41 }
 0x5dd   : > { %v3218_v22 = vsel %vm3198_vm14, %v3188_v48, %v3208_v40  ;;  %v3190_v62 = vsub.f32 1.0, %v3180_v14  ;;  %v3122_v19 = vadd.f32 0.2548296, %v3112_v4  ;;  %v3095_v27 = vmul.f32 %v9057_v17, %v3085_v50 }
 0x5de   : > { %v3238_v7 = vadd.f32 1.0, %v3218_v22  ;;  %v3219_v16 = vsel %vm3199_vm15, %v3189_v53, %v3209_v11  ;;  %v3191_v59 = vsub.f32 1.0, %v3181_v47  ;;  %v3123_v36 = vadd.f32 0.2548296, %v3113_v30 }
 0x5df   : > { %v3239_v24 = vadd.f32 1.0, %v3219_v16  ;;  %v3210_v32 = vsub.f32 0.0, %v3190_v62  ;;  %v3132_v38 = vmul.f32 %v9034_v28, %v3122_v19  ;;  %v3104_v48 = vadd.f32 -0.28449672, %v3094_v46 }
 0x5e0   : > { %v3248_v8 = vmul.f32 %v3238_v7, %v8990_v42  ;;  %v3211_v52 = vsub.f32 0.0, %v3191_v59  ;;  %v3133_v42 = vmul.f32 %v9037_v34, %v3123_v36  ;;  %v3105_v40 = vadd.f32 -0.28449672, %v3095_v27 }
 0x5e1   : > { %v3249_v35 = vmul.f32 %v3239_v24, %v8997_v15  ;;  %v3220_v43 = vsel %vm3200_vm0, %v3190_v62, %v3210_v32  ;;  %v3182_v33 = vmul.f32 %v6103_v12, %v3132_v38  ;;  %v3114_v10 = vmul.f32 %v9048_v21, %v3104_v48 }
 0x5e2   : > { %v3278_v5 = vrot.slane %v3248_v8, 7  ;;  %v3240_v18 = vadd.f32 1.0, %v3220_v43  ;;  %v3221_v6 = vsel %vm3201_vm2, %v3191_v59, %v3211_v52  ;;  %v3183_v51 = vmul.f32 %v6105_v54, %v3133_v42 }
 0x5e3   : > { %v3279_v53 = vrot.slane %v3249_v35, 7  ;;  %v3241_v26 = vadd.f32 1.0, %v3221_v6  ;;  %v3026_v28 = vadd.f32 1.0, %v9055_v3  ;;  %v3192_v2 = vsub.f32 1.0, %v3182_v33 }
 0x5e4   : > { %3306 = vst [vmem:[#allocation3] sm:$0xfe] %v3278_v5  ;;  %v3250_v15 = vmul.f32 %v3240_v18, %v9006_v61  ;;  %v3124_v57 = vadd.f32 0.2548296, %v3114_v10  ;;  %v3193_v11 = vsub.f32 1.0, %v3183_v51  ;;  %v3115_v12 = vmul.f32 %v9057_v17, %v3105_v40  ;;  %v4818_v10 = vld [vmem:[%s9784_s2 + $0x1238] sm:$0xff] }
 0x5e5   : > { %3307 = vst [vmem:[#allocation3 + $0x8] sm:$0xfe] %v3279_v53  ;;  %v3251_v14 = vmul.f32 %v3241_v26, %v9009_v55  ;;  %6110 = vrcp.f32 %v3026_v28  ;;  %v3212_v45 = vsub.f32 0.0, %v3192_v2  ;;  %v9098_v54 = vadd.f32 %v8953_v37, %v8992_v60 }
 0x5e6   : > { %v3280_v34 = vrot.slane %v3250_v15, 7  ;;  %v3134_v61 = vmul.f32 %v9048_v21, %v3124_v57  ;;  %v3213_v55 = vsub.f32 0.0, %v3193_v11  ;;  %v3125_v41 = vadd.f32 0.2548296, %v3115_v12 }
 0x5e7   : > { %v3282_v47 = vrot.slane %v3251_v14, 7  ;;  %v3222_v62 = vsel %vm3202_vm5, %v3192_v2, %v3212_v45  ;;  %v3233_v4 = vmul.f32 0.5, %v8975_v58  ;;  %v3146_v60 = vsub.f32 0.0, %v9045_v56 }
 0x5e8   : > { %v9101_v3 = vsel %vm376_vm1, %v3278_v5, %v3280_v34  ;;  %v3184_v21 = vmul.f32 %v6107_v44, %v3134_v61  ;;  %v3242_v50 = vadd.f32 1.0, %v3222_v62  ;;  %v3223_v7 = vsel %vm3203_vm6, %v3193_v11, %v3213_v55  ;;  %v4820_v62 = vld [vmem:[%s9784_s2 + $0x1248] sm:$0xff] }
 0x5e9   : > { %v9105_v22 = vsel %vm376_vm1, %v3279_v53, %v3282_v47  ;;  %v3135_v37 = vmul.f32 %v9057_v17, %v3125_v41  ;;  %v3243_v16 = vadd.f32 1.0, %v3223_v7  ;;  %v2997_v30 = vand.u32 2147483647, %v9098_v54 }
 0x5ea   : > { %v3194_v59 = vsub.f32 1.0, %v3184_v21  ;;  %v3252_v24 = vmul.f32 %v3242_v50, %v3232_v20  ;;  %v3234_v32 = vmul.f32 0.5, %v9000_v49  ;;  %v3156_v27 = vmul.f32 %v3146_v60, %v9045_v56  ;;  %v4816_v49 = vld [vmem:[%s9784_s2 + $0x1228] sm:$0xff] }
 0x5eb   : > { %v3185_v63 = vmul.f32 %v6109_v39, %v3135_v37  ;;  %v3253_v44 = vmul.f32 %v3243_v16, %v3233_v4  ;;  %v9116_v46 = vmul.f32 0.70710677, %v2997_v30  ;;  %v3391_v8 = vld [vmem:[#allocation3] sm:$0xfe]  ;;  %v3474_v35 = vrot.slane %v9105_v22, 1  ;;  %v4822_v4 = vld [vmem:[%s9784_s2 + $0x1258] sm:$0xff] }
 0x5ec   : > { %v3392_v58 = vld [vmem:[#allocation3 + $0x8] sm:$0xfe]  ;;  %v3214_v19 = vsub.f32 0.0, %v3194_v59  ;;  %v3262_v52 = vsel %vm526_vm10, %v3252_v24, 0.0  ;;  %v3470_v53 = vrot.slane %v3391_v8, 1  ;;  %v3235_v28 = vmul.f32 0.5, %v9003_v0 }
 0x5ed   : > { %v3473_v17 = vrot.slane %v3392_v58, 1  ;;  %v3195_v36 = vsub.f32 1.0, %v3185_v63  ;;  %v3284_v43 = vrot.slane %v3262_v52, 7  ;;  %v3263_v39 = vsel %vm526_vm10, %v3253_v44, 0.0  ;;  %v4817_v0 = vld [vmem:[%s9784_s2 + $0x1230] sm:$0xff]  ;;  %v4819_v30 = vld [vmem:[%s9784_s2 + $0x1240] sm:$0xff] }
 0x5ee   : > { %v3224_v38 = vsel %vm3204_vm7, %v3194_v59, %v3214_v19  ;;  %v3017_v48 = vmul.f32 0.3275911, %v9116_v46  ;;  %v3286_v18 = vrot.slane %v3263_v39, 7  ;;  %v3471_v20 = vrot.slane %v9101_v3, 1  ;;  %v4821_v24 = vld [vmem:[%s9784_s2 + $0x1250] sm:$0xff]  ;;  %v4824_v63 = vld [vmem:[%s9784_s2 + $0x1268] sm:$0xff] }
 0x5ef   : > { %v9127_v5 = vpop.eup %6110  ;;  %v3244_v6 = vadd.f32 1.0, %v3224_v38  ;;  %v3215_v42 = vsub.f32 0.0, %v3195_v36  ;;  %v9130_v26 = vsel %vm376_vm1, %v3280_v34, %v3284_v43  ;;  %v3475_v9 = vsel %vm682_vm3, %v3473_v17, %v3474_v35  ;;  %v4826_v58 = vld [vmem:[%s9784_s2 + $0x1278] sm:$0xff] }
 0x5f0   : > { %v3056_v56 = vmul.f32 1.0614054, %v9127_v5  ;;  %v3027_v33 = vadd.f32 1.0, %v3017_v48  ;;  %v9141_v15 = vsel %vm376_vm1, %v3282_v47, %v3286_v18  ;;  %3562 = vmatprep.mubr.f32.mxu1 %v3475_v9  ;;  %v3174_v34 = vmul.f32 1.442695, %v3156_v27  ;;  %v4815_v47 = vld [vmem:[%s9784_s2 + $0x1220] sm:$0xff] }
 0x5f1   : > { %v9143_v51 = vmul.f32 %v3244_v6, %v3234_v32  ;;  %v3225_v40 = vsel %vm3205_vm8, %v3195_v36, %v3215_v42  ;;  %v5784_v11 = vpack.c.bf16 %v4818_v10, %v4816_v49  ;;  %v3478_v12 = vrot.slane %v9141_v15, 1  ;;  %v4823_v36 = vld [vmem:[%s9784_s2 + $0x1260] sm:$0xff]  ;;  %v4825_v27 = vld [vmem:[%s9784_s2 + $0x1270] sm:$0xff]  ;;  %v4828_v48 = vld [vmem:[%s9784_s2 + $0x1288] sm:$0xff] }
 0x5f2   : > { %v3245_v14 = vadd.f32 1.0, %v3225_v40  ;;  %v3066_v2 = vadd.f32 -1.4531521, %v3056_v56  ;;  %6112 = vrcp.f32 %v3027_v33  ;;  %v3472_v55 = vsel %vm682_vm3, %v3470_v53, %v3471_v20  ;;  %v4827_v33 = vld [vmem:[%s9784_s2 + $0x1280] sm:$0xff]  ;;  %v4829_v9 = vld [vmem:[%s9784_s2 + $0x1290] sm:$0xff]  ;;  %v4832_v40 = vld [vmem:[%s9784_s2 + $0x12a8] sm:$0xff] }
 0x5f3   : > { %v3288_v57 = vrot.slane %v9143_v51, 7  ;;  %v3476_v41 = vrot.slane %v9130_v26, 1  ;;  %3563 = vmatmul.mubr.f32.vlgmr.msra.gmra.mrb[16].mxu1 %v3472_v55  ;;  %v3479_v50 = vsel %vm682_vm3, %v3474_v35, %v3478_v12  ;;  %v5786_v60 = vpack.c.bf16 %v4817_v0, %v4815_v47  ;;  %v4833_v47 = vld [vmem:[%s9784_s2 + $0x12b0] sm:$0xff]  ;;  %v4838_v55 = vld [vmem:[%s9784_s2 + $0x12d8] sm:$0xff] }
 0x5f4   : > { %v9157_v45 = vmul.f32 %v3245_v14, %v3235_v28  ;;  %v3076_v61 = vmul.f32 %v9127_v5, %v3066_v2  ;;  %5783 = vmatpush1.bf16.msra.mxu1 %v5782_v25  ;;  %3568 = vmatprep.mubr.f32.mxu1 %v3479_v50  ;;  %6114 = vpow2.f32 %v3174_v34  ;;  %v3147_v16 = vsub.f32 0.0, %v9116_v46  ;;  %v4834_v28 = vld [vmem:[%s9784_s2 + $0x12b8] sm:$0xff] }
 0x5f5   : > { %v9171_v21 = vsel %vm376_vm1, %v3284_v43, %v3288_v57  ;;  %5785 = vmatprep.subr.bf16.mxu1 %v5784_v11  ;;  %v5788_v59 = vpack.c.bf16 %v4822_v4, %v4820_v62  ;;  %v3477_v25 = vsel %vm682_vm3, %v3471_v20, %v3476_v41  ;;  %v5790_v17 = vpack.c.bf16 %v4821_v24, %v4819_v30  ;;  %v4840_v30 = vld [vmem:[%s9784_s2 + $0x12e8] sm:$0xff]  ;;  %v4842_v24 = vld [vmem:[%s9784_s2 + $0x12f8] sm:$0xff] }
 0x5f6   : > { %v3290_v7 = vrot.slane %v9157_v45, 7  ;;  %v3086_v37 = vadd.f32 1.4214138, %v3076_v61  ;;  %v3480_v32 = vrot.slane %v9171_v21, 1  ;;  %v5792_v52 = vpack.c.bf16 %v4826_v58, %v4824_v63  ;;  %v4836_v61 = vld [vmem:[%s9784_s2 + $0x12c8] sm:$0xff]  ;;  %v4850_v51 = vld [vmem:[%s9784_s2 + $0x1338] sm:$0xff] }
 0x5f7   : > { %3569 = vmatmul.mubr.f32.gmra.mrb[18].mxu1 %v3477_v25  ;;  %v3157_v39 = vmul.f32 %v3147_v16, %v9116_v46  ;;  %v5794_v53 = vpack.c.bf16 %v4825_v27, %v4823_v36  ;;  %v5798_v34 = vpack.c.bf16 %v4829_v9, %v4827_v33  ;;  %vm3206_vm10 = vcmp.ge.f32.partialorder %v9020_v13, 0.0  ;;  %v4837_v16 = vld [vmem:[%s9784_s2 + $0x12d0] sm:$0xff]  ;;  %v4846_v27 = vld [vmem:[%s9784_s2 + $0x1318] sm:$0xff] }
 0x5f8   : > { %v9188_v23 = vsel %vm376_vm1, %v3286_v18, %v3290_v7  ;;  %v3096_v1 = vmul.f32 %v9127_v5, %v3086_v37  ;;  %5787 = vmatpush1.bf16.msra.mxu1 %v5786_v60  ;;  %v3481_v38 = vsel %vm682_vm3, %v3476_v41, %v3480_v32  ;;  %v4830_v18 = vld [vmem:[%s9784_s2 + $0x1298] sm:$0xff]  ;;  %v5804_v37 = vpack.c.bf16 %v4838_v55, %v4836_v61  ;;  %v4835_v60 = vld [vmem:[%s9784_s2 + $0x12c0] sm:$0xff]  ;;  %v4841_v36 = vld [vmem:[%s9784_s2 + $0x12f0] sm:$0xff] }
 0x5f9   : > { %v3482_v44 = vrot.slane %v9188_v23, 1  ;;  %5789 = vmatprep.subr.bf16.mxu1 %v5788_v59  ;;  %v5796_v46 = vpack.c.bf16 %v4830_v18, %v4828_v48  ;;  %v3176_v10 = vmul.f32 1.442695, %v3157_v39  ;;  %v5806_v58 = vpack.c.bf16 %v4837_v16, %v4835_v60  ;;  %v4862_v60 = vld [vmem:[%s9784_s2 + $0x1398] sm:$0xff]  ;;  %v4861_v45 = vld [vmem:[%s9784_s2 + $0x1390] sm:$0xff] }
 0x5fa   : > { %v3106_v19 = vadd.f32 -0.28449672, %v3096_v1  ;;  %v3236_v1 = vmul.f32 0.5, %v9020_v13  ;;  %v4844_v13 = vld [vmem:[%s9784_s2 + $0x1308] sm:$0xff]  ;;  %vm3207_vm9 = vcmp.ge.f32.partialorder %v9098_v54, 0.0  ;;  %vm4193_vm0 = vcmask 57344  }
 0x5fb   : > { %v3483_v8 = vsel %vm682_vm3, %v3478_v12, %v3482_v44  ;;  %v5800_v12 = vpack.c.bf16 %v4834_v28, %v4832_v40  ;;  %6116 = vpow2.f32 %v3176_v10  ;;  %v4849_v10 = vld [vmem:[%s9784_s2 + $0x1330] sm:$0xff]  ;;  %v4852_v40 = vld [vmem:[%s9784_s2 + $0x1348] sm:$0xff]  ;;  %v4854_v28 = vld [vmem:[%s9784_s2 + $0x1358] sm:$0xff] }
 0x5fc   : > { %v6113_v35 = vpop.eup %6112  ;;  %v3116_v43 = vmul.f32 %v9127_v5, %v3106_v19  ;;  %3574 = vmatprep.mubr.f32.mxu1 %v3483_v8  ;;  %5791 = vmatpush1.bf16.msra.mxu1 %v5790_v17  ;;  %v5808_v8 = vpack.c.bf16 %v4842_v24, %v4840_v30  ;;  %v4859_v30 = vld [vmem:[%s9784_s2 + $0x1380] sm:$0xff]  ;;  %v4866_v24 = vld [vmem:[%s9784_s2 + $0x13b8] sm:$0xff] }
 0x5fd   : > { %v3057_v6 = vmul.f32 1.0614054, %v6113_v35  ;;  %3575 = vmatmul.mubr.f32.gmra.mrb[20].mxu1 %v3481_v38  ;;  %5793 = vmatprep.subr.bf16.mxu1 %v5792_v52  ;;  %v4839_v52 = vld [vmem:[%s9784_s2 + $0x12e0] sm:$0xff] }
 0x5fe   : > { %v3126_v42 = vadd.f32 0.2548296, %v3116_v43  ;;  %v6115_v14 = vpop.eup %6114  ;;  %v5810_v48 = vpack.c.bf16 %v4841_v36, %v4839_v52  ;;  %v4868_v52 = vld [vmem:[%s9784_s2 + $0x13c8] sm:$0xff]  ;;  %v4870_v36 = vld [vmem:[%s9784_s2 + $0x13d8] sm:$0xff] }
 0x5ff   : > { %v3067_v56 = vadd.f32 -1.4531521, %v3057_v6 }
 0x600   : > { %v3136_v49 = vmul.f32 %v9127_v5, %v3126_v42  ;;  %5795 = vmatpush1.bf16.msra.mxu1 %v5794_v53  ;;  %v4831_v5 = vld [vmem:[%s9784_s2 + $0x12a0] sm:$0xff]  ;;  %v5812_v42 = vpack.c.bf16 %v4846_v27, %v4844_v13 }
 0x601   : > { %v3077_v2 = vmul.f32 %v6113_v35, %v3067_v56  ;;  %5797 = vmatprep.subr.bf16.mxu1 %v5796_v46  ;;  %v5802_v4 = vpack.c.bf16 %v4833_v47, %v4831_v5  ;;  %v4843_v53 = vld [vmem:[%s9784_s2 + $0x1300] sm:$0xff]  ;;  %v4845_v56 = vld [vmem:[%s9784_s2 + $0x1310] sm:$0xff] }
 0x602   : > { %v3186_v20 = vmul.f32 %v6115_v14, %v3136_v49  ;;  %v5814_v46 = vpack.c.bf16 %v4845_v56, %v4843_v53  ;;  %v4847_v49 = vld [vmem:[%s9784_s2 + $0x1320] sm:$0xff]  ;;  %v4853_v5 = vld [vmem:[%s9784_s2 + $0x1350] sm:$0xff] }
 0x603   : > { %v3087_v11 = vadd.f32 1.4214138, %v3077_v2  ;;  %v3237_v2 = vmul.f32 0.5, %v9098_v54  ;;  %v4858_v54 = vld [vmem:[%s9784_s2 + $0x1378] sm:$0xff]  ;;  %v4871_v56 = vld [vmem:[%s9784_s2 + $0x13e0] sm:$0xff] }
 0x604   : > { %v3196_v0 = vsub.f32 1.0, %v3186_v20  ;;  %5799 = vmatpush1.bf16.msra.mxu1 %v5798_v34  ;;  %v5818_v34 = vpack.c.bf16 %v4849_v10, %v4847_v49  ;;  %v4941_v49 = vld [vmem:[%s9784_s2 + $0x1610] sm:$0xff]  ;;  %v4944_v10 = vld [vmem:[%s9784_s2 + $0x1628] sm:$0xff] }
 0x605   : > { %v3097_v41 = vmul.f32 %v6113_v35, %v3087_v11  ;;  %5801 = vmatprep.subr.bf16.mxu1 %v5800_v12  ;;  %v6117_v38 = vpop.eup %6116  ;;  %v5820_v11 = vpack.c.bf16 %v4854_v28, %v4852_v40  ;;  %v4851_v12 = vld [vmem:[%s9784_s2 + $0x1340] sm:$0xff]  ;;  %v4946_v40 = vld [vmem:[%s9784_s2 + $0x1638] sm:$0xff] }
 0x606   : > { %v3216_v62 = vsub.f32 0.0, %v3196_v0  ;;  %v5822_v55 = vpack.c.bf16 %v4853_v5, %v4851_v12  ;;  %v4950_v12 = vld [vmem:[%s9784_s2 + $0x1658] sm:$0xff] }
 0x607   : > { %v3107_v50 = vadd.f32 -0.28449672, %v3097_v41 }
 0x608   : > { %v3226_v59 = vsel %vm3206_vm10, %v3196_v0, %v3216_v62  ;;  %5803 = vmatpush1.bf16.msra.mxu1 %v5802_v4  ;;  %v4856_v0 = vld [vmem:[%s9784_s2 + $0x1368] sm:$0xff]  ;;  %v4855_v62 = vld [vmem:[%s9784_s2 + $0x1360] sm:$0xff]  ;;  %v4857_v4 = vld [vmem:[%s9784_s2 + $0x1370] sm:$0xff] }
 0x609   : > { %v3246_v25 = vadd.f32 1.0, %v3226_v59  ;;  %v3117_v63 = vmul.f32 %v6113_v35, %v3107_v50  ;;  %5805 = vmatprep.subr.bf16.mxu1 %v5804_v37  ;;  %v5824_v41 = vpack.c.bf16 %v4858_v54, %v4856_v0  ;;  %v4860_v37 = vld [vmem:[%s9784_s2 + $0x1388] sm:$0xff]  ;;  %v5826_v16 = vpack.c.bf16 %v4857_v4, %v4855_v62  ;;  %v4947_v0 = vld [vmem:[%s9784_s2 + $0x1640] sm:$0xff]  ;;  %v4949_v54 = vld [vmem:[%s9784_s2 + $0x1650] sm:$0xff] }
 0x60a   : > { %v5828_v59 = vpack.c.bf16 %v4862_v60, %v4860_v37  ;;  %v4951_v4 = vld [vmem:[%s9784_s2 + $0x1660] sm:$0xff]  ;;  %v4956_v37 = vld [vmem:[%s9784_s2 + $0x1688] sm:$0xff]  ;;  %v4958_v60 = vld [vmem:[%s9784_s2 + $0x1698] sm:$0xff] }
 0x60b   : > { %v3256_v19 = vmul.f32 %v3246_v25, %v3236_v1  ;;  %v3127_v17 = vadd.f32 0.2548296, %v3117_v63  ;;  %v5830_v25 = vpack.c.bf16 %v4861_v45, %v4859_v30  ;;  %v5860_v30 = vpack.c.bf16 %v4958_v60, %v4956_v37  ;;  %v4955_v45 = vld [vmem:[%s9784_s2 + $0x1680] sm:$0xff] }
 0x60c   : > { %5807 = vmatpush1.bf16.msra.mxu1 %v5806_v58  ;;  %v4863_v58 = vld [vmem:[%s9784_s2 + $0x13a0] sm:$0xff] }
 0x60d   : > { %v3292_v43 = vrot.slane %v3256_v19, 7  ;;  %v3137_v39 = vmul.f32 %v6113_v35, %v3127_v17  ;;  %5809 = vmatprep.subr.bf16.mxu1 %v5808_v8  ;;  %v4848_v35 = vld [vmem:[%s9784_s2 + $0x1328] sm:$0xff]  ;;  %v4865_v19 = vld [vmem:[%s9784_s2 + $0x13b0] sm:$0xff] }
 0x60e   : > { %v5816_v9 = vpack.c.bf16 %v4850_v51, %v4848_v35  ;;  %v5834_v27 = vpack.c.bf16 %v4865_v19, %v4863_v58  ;;  %v4940_v35 = vld [vmem:[%s9784_s2 + $0x1608] sm:$0xff]  ;;  %v4942_v51 = vld [vmem:[%s9784_s2 + $0x1618] sm:$0xff]  ;;  %v3765_v19 = vrot.slane %v9105_v22, 2 }
 0x60f   : > { %v3293_v18 = vsel %vm376_vm1, %v3288_v57, %v3292_v43  ;;  %v3187_v6 = vmul.f32 %v6117_v38, %v3137_v39  ;;  %v5836_v39 = vpack.c.bf16 %v4870_v36, %v4868_v52  ;;  %v4867_v38 = vld [vmem:[%s9784_s2 + $0x13c0] sm:$0xff]  ;;  %v4961_v52 = vld [vmem:[%s9784_s2 + $0x16b0] sm:$0xff] }
 0x610   : > { %3314 = vst [vmem:[#allocation3 + $0x40] sm:$0xf] %v3293_v18  ;;  %5811 = vmatpush1.bf16.msra.mxu1 %v5810_v48  ;;  %v4869_v48 = vld [vmem:[%s9784_s2 + $0x13d0] sm:$0xff] }
 0x611   : > { %v3197_v57 = vsub.f32 1.0, %v3187_v6  ;;  %5813 = vmatprep.subr.bf16.mxu1 %v5812_v42  ;;  %v4872_v6 = vld [vmem:[%s9784_s2 + $0x13e8] sm:$0xff]  ;;  %v5838_v42 = vpack.c.bf16 %v4869_v48, %v4867_v38  ;;  %v4963_v48 = vld [vmem:[%s9784_s2 + $0x16c0] sm:$0xff] }
 0x613   : > { %v3217_v33 = vsub.f32 0.0, %v3197_v57 }
 0x614   : > { %5815 = vmatpush1.bf16.msra.mxu1 %v5814_v46 }
 0x615   : > { %v3227_v14 = vsel %vm3207_vm9, %v3197_v57, %v3217_v33  ;;  %5817 = vmatprep.subr.bf16.mxu1 %v5816_v9  ;;  %v3317_v57 = vld [vmem:[#allocation3 + $0x8] sm:$0xff]  ;;  %v5844_v33 = vpack.c.bf16 %v4942_v51, %v4940_v35  ;;  %v4939_v9 = vld [vmem:[%s9784_s2 + $0x1600] sm:$0xff]  ;;  %v4972_v35 = vld [vmem:[%s9784_s2 + $0x1708] sm:$0xff] }
 0x616   : > { %v3247_v20 = vadd.f32 1.0, %v3227_v14  ;;  %v5846_v28 = vpack.c.bf16 %v4941_v49, %v4939_v9  ;;  %v5848_v14 = vpack.c.bf16 %v4946_v40, %v4944_v10  ;;  %v4974_v51 = vld [vmem:[%s9784_s2 + $0x1718] sm:$0xff]  ;;  %v4973_v9 = vld [vmem:[%s9784_s2 + $0x1710] sm:$0xff]  ;;  %v4976_v49 = vld [vmem:[%s9784_s2 + $0x1728] sm:$0xff] }
 0x617   : > { %v3393_v1 = vld [vmem:[#allocation3 + $0x40] sm:$0xf]  ;;  %v4978_v10 = vld [vmem:[%s9784_s2 + $0x1738] sm:$0xff] }
 0x618   : > { %v3257_v47 = vmul.f32 %v3247_v20, %v3237_v2  ;;  %5819 = vmatpush1.bf16.msra.mxu1 %v5818_v34  ;;  %v3484_v8 = vrot.slane %v3393_v1, 1  ;;  %v4943_v2 = vld [vmem:[%s9784_s2 + $0x1620] sm:$0xff]  ;;  %v4945_v20 = vld [vmem:[%s9784_s2 + $0x1630] sm:$0xff]  ;;  %v4962_v1 = vld [vmem:[%s9784_s2 + $0x16b8] sm:$0xff] }
 0x619   : > { %5821 = vmatprep.subr.bf16.mxu1 %v5820_v11  ;;  %v3316_v34 = vld [vmem:[#allocation3] sm:$0xff]  ;;  %v4948_v11 = vld [vmem:[%s9784_s2 + $0x1648] sm:$0xff]  ;;  %v5850_v5 = vpack.c.bf16 %v4945_v20, %v4943_v2 }
 0x61a   : > { %v3294_v61 = vrot.slane %v3257_v47, 7  ;;  %v3485_v18 = vsel %vm682_vm3, %v3480_v32, %v3484_v8  ;;  %v4873_v32 = vld [vmem:[%s9784_s2 + $0x13f0] sm:$0xff]  ;;  %v5852_v47 = vpack.c.bf16 %v4950_v12, %v4948_v11  ;;  %v4980_v20 = vld [vmem:[%s9784_s2 + $0x1748] sm:$0xff] }
 0x61b   : > { %v5842_v46 = vpack.c.bf16 %v4873_v32, %v4871_v56  ;;  %v3324_v36 = vld [vmem:[#allocation3 + $0x40] sm:$0x7]  ;;  %v4967_v56 = vld [vmem:[%s9784_s2 + $0x16e0] sm:$0xff] }
 0x61c   : > { %v3295_v50 = vsel %vm376_vm1, %v3290_v7, %v3294_v61  ;;  %5823 = vmatpush1.bf16.msra.mxu1 %v5822_v55  ;;  %v4864_v7 = vld [vmem:[%s9784_s2 + $0x13a8] sm:$0xff]  ;;  %v4954_v55 = vld [vmem:[%s9784_s2 + $0x1678] sm:$0xff]  ;;  %v4969_v32 = vld [vmem:[%s9784_s2 + $0x16f0] sm:$0xff] }
 0x61d   : > { %3315 = vst [vmem:[#allocation3 + $0x48] sm:$0xf] %v3295_v50  ;;  %5825 = vmatprep.subr.bf16.mxu1 %v5824_v41  ;;  %v5832_v63 = vpack.c.bf16 %v4866_v24, %v4864_v7  ;;  %v4952_v61 = vld [vmem:[%s9784_s2 + $0x1668] sm:$0xff]  ;;  %v5854_v41 = vpack.c.bf16 %v4949_v54, %v4947_v0  ;;  %v4953_v50 = vld [vmem:[%s9784_s2 + $0x1670] sm:$0xff]  ;;  %v4986_v54 = vld [vmem:[%s9784_s2 + $0x1778] sm:$0xff] }
 0x61e   : > { %v5856_v62 = vpack.c.bf16 %v4954_v55, %v4952_v61  ;;  %v4957_v7 = vld [vmem:[%s9784_s2 + $0x1690] sm:$0xff]  ;;  %v4960_v24 = vld [vmem:[%s9784_s2 + $0x16a8] sm:$0xff] }
 0x61f   : > { %v5862_v58 = vpack.c.bf16 %v4957_v7, %v4955_v45  ;;  %v4977_v2 = vld [vmem:[%s9784_s2 + $0x1730] sm:$0xff]  ;;  %v4984_v0 = vld [vmem:[%s9784_s2 + $0x1768] sm:$0xff]  ;;  %v4994_v45 = vld [vmem:[%s9784_s2 + $0x17b8] sm:$0xff] }
 0x620   : > { %5827 = vmatpush1.bf16.msra.mxu1 %v5826_v16  ;;  %v5858_v16 = vpack.c.bf16 %v4953_v50, %v4951_v4  ;;  %v5888_v55 = vpack.c.bf16 %v4986_v54, %v4984_v0  ;;  %v4988_v4 = vld [vmem:[%s9784_s2 + $0x1788] sm:$0xff]  ;;  %v4990_v50 = vld [vmem:[%s9784_s2 + $0x1798] sm:$0xff] }
 0x621   : > { %5829 = vmatprep.subr.bf16.mxu1 %v5828_v59  ;;  %v3689_v59 = vld [vmem:[#allocation3 + $0x8] sm:$0xfc]  ;;  %v5892_v60 = vpack.c.bf16 %v4990_v50, %v4988_v4 }
 0x624   : > { %v3394_v17 = vld [vmem:[#allocation3 + $0x48] sm:$0xf]  ;;  %5831 = vmatpush1.bf16.msra.mxu1 %v5830_v25 }
 0x625   : > { %v3486_v13 = vrot.slane %v3394_v17, 1  ;;  %5833 = vmatprep.subr.bf16.mxu1 %v5832_v63  ;;  %v3325_v25 = vld [vmem:[#allocation3 + $0x48] sm:$0x7]  ;;  %v3764_v63 = vrot.slane %v3689_v59, 2  ;;  %v5864_v17 = vpack.c.bf16 %v4962_v1, %v4960_v24  ;;  %v4989_v59 = vld [vmem:[%s9784_s2 + $0x1790] sm:$0xff]  ;;  %v4991_v1 = vld [vmem:[%s9784_s2 + $0x17a0] sm:$0xff] }
 0x627   : > { %v3487_v43 = vsel %vm682_vm3, %v3482_v44, %v3486_v13  ;;  %v4874_v44 = vld [vmem:[%s9784_s2 + $0x13f8] sm:$0xff] }
 0x628   : > { %3580 = vmatprep.mubr.f32.mxu1 %v3487_v43  ;;  %5835 = vmatpush1.bf16.msra.mxu1 %v5834_v27  ;;  %v5840_v53 = vpack.c.bf16 %v4874_v44, %v4872_v6  ;;  %v4966_v27 = vld [vmem:[%s9784_s2 + $0x16d8] sm:$0xff]  ;;  %v3766_v43 = vsel %vm974_vm4, %v3764_v63, %v3765_v19  ;;  %v4968_v6 = vld [vmem:[%s9784_s2 + $0x16e8] sm:$0xff] }
 0x629   : > { %3581 = vmatmul.mubr.f32.gmra.mrb[22].mxu1 %v3485_v18  ;;  %5837 = vmatprep.subr.bf16.mxu1 %v5836_v39  ;;  %v4965_v18 = vld [vmem:[%s9784_s2 + $0x16d0] sm:$0xff]  ;;  %v4970_v44 = vld [vmem:[%s9784_s2 + $0x16f8] sm:$0xff]  ;;  %v4996_v63 = vld [vmem:[%s9784_s2 + $0x17c8] sm:$0xff] }
 0x62a   : > { %3586 = vmatprep.mubr.f32.mxu1 %v3486_v13  ;;  %v4964_v13 = vld [vmem:[%s9784_s2 + $0x16c8] sm:$0xff] }
 0x62b   : > { %v5868_v38 = vpack.c.bf16 %v4966_v27, %v4964_v13  ;;  %v5000_v13 = vld [vmem:[%s9784_s2 + $0x17e8] sm:$0xff]  ;;  %v5002_v27 = vld [vmem:[%s9784_s2 + $0x17f8] sm:$0xff] }
 0x62c   : > { %5839 = vmatpush1.bf16.msra.mxu1 %v5838_v42  ;;  %v5870_v42 = vpack.c.bf16 %v4965_v18, %v4963_v48  ;;  %v5001_v48 = vld [vmem:[%s9784_s2 + $0x17f0] sm:$0xff] }
 0x62d   : > { %3587 = vmatmul.mubr.f32.gmra.mrb[24].mxu1 %v3484_v8  ;;  %5841 = vmatprep.subr.bf16.mxu1 %v5840_v53  ;;  %v4959_v8 = vld [vmem:[%s9784_s2 + $0x16a0] sm:$0xff]  ;;  %v5872_v53 = vpack.c.bf16 %v4970_v44, %v4968_v6  ;;  %v3688_v18 = vld [vmem:[#allocation3] sm:$0xfc] }
 0x62e   : > { %3657 = vmatprep.mubr.f32.mxu1 %v3317_v57  ;;  %v5866_v39 = vpack.c.bf16 %v4961_v52, %v4959_v8  ;;  %v5874_v57 = vpack.c.bf16 %v4969_v32, %v4967_v56  ;;  %v4995_v52 = vld [vmem:[%s9784_s2 + $0x17c0] sm:$0xff]  ;;  %v3761_v44 = vrot.slane %v3688_v18, 2  ;;  %v3767_v32 = vrot.slane %v9130_v26, 2 }
 0x630   : > { %5843 = vmatpush1.bf16.msra.mxu1 %v5842_v46  ;;  %v5876_v46 = vpack.c.bf16 %v4974_v51, %v4972_v35  ;;  %v3773_v51 = vrot.slane %v9188_v23, 2 }
 0x631   : > { %5845 = vmatprep.subr.bf16.mxu1 %v5844_v33  ;;  %v4971_v33 = vld [vmem:[%s9784_s2 + $0x1700] sm:$0xff] }
 0x632   : > { %v5878_v40 = vpack.c.bf16 %v4973_v9, %v4971_v33  ;;  %v3690_v9 = vld [vmem:[#allocation3 + $0x40] sm:$0x1f] }
 0x633   : > { %3658 = vmatmul.mubr.f32.vlgmr.msra.gmra.mrb[16].mxu1 %v3316_v34  ;;  %v4982_v34 = vld [vmem:[%s9784_s2 + $0x1758] sm:$0xff] }
 0x634   : > { %3663 = vmatprep.mubr.f32.mxu1 %v9105_v22  ;;  %5847 = vmatpush1.bf16.msra.mxu1 %v5846_v28  ;;  %v5880_v28 = vpack.c.bf16 %v4978_v10, %v4976_v49  ;;  %v5884_v12 = vpack.c.bf16 %v4982_v34, %v4980_v20  ;;  %v3775_v49 = vrot.slane %v3690_v9, 2 }
 0x635   : > { %5849 = vmatprep.subr.bf16.mxu1 %v5848_v14  ;;  %v4975_v14 = vld [vmem:[%s9784_s2 + $0x1720] sm:$0xff] }
 0x636   : > { %v5882_v11 = vpack.c.bf16 %v4977_v2, %v4975_v14 }
 0x637   : > { %3664 = vmatmul.mubr.f32.gmra.mrb[18].mxu1 %v9101_v3 }
 0x638   : > { %3669 = vmatprep.mubr.f32.mxu1 %v9141_v15  ;;  %5851 = vmatpush1.bf16.msra.mxu1 %v5850_v5  ;;  %v4979_v5 = vld [vmem:[%s9784_s2 + $0x1740] sm:$0xff] }
 0x639   : > { %5853 = vmatprep.subr.bf16.mxu1 %v5852_v47  ;;  %v4981_v47 = vld [vmem:[%s9784_s2 + $0x1750] sm:$0xff] }
 0x63a   : > { %v5886_v61 = vpack.c.bf16 %v4981_v47, %v4979_v5 }
 0x63b   : > { %3670 = vmatmul.mubr.f32.gmra.mrb[20].mxu1 %v9130_v26 }
 0x63c   : > { %3675 = vmatprep.mubr.f32.mxu1 %v9188_v23  ;;  %5855 = vmatpush1.bf16.msra.mxu1 %v5854_v41  ;;  %v4983_v41 = vld [vmem:[%s9784_s2 + $0x1760] sm:$0xff] }
 0x63d   : > { %5857 = vmatprep.subr.bf16.mxu1 %v5856_v62  ;;  %v4985_v62 = vld [vmem:[%s9784_s2 + $0x1770] sm:$0xff] }
 0x63e   : > { %v5890_v37 = vpack.c.bf16 %v4985_v62, %v4983_v41 }
 0x63f   : > { %3676 = vmatmul.mubr.f32.gmra.mrb[22].mxu1 %v9171_v21 }
 0x640   : > { %3681 = vmatprep.mubr.f32.mxu1 %v3325_v25  ;;  %5859 = vmatpush1.bf16.msra.mxu1 %v5858_v16  ;;  %v4987_v16 = vld [vmem:[%s9784_s2 + $0x1780] sm:$0xff]  ;;  %v4993_v25 = vld [vmem:[%s9784_s2 + $0x17b0] sm:$0xff] }
 0x641   : > { %5861 = vmatprep.subr.bf16.mxu1 %v5860_v30  ;;  %v4992_v30 = vld [vmem:[%s9784_s2 + $0x17a8] sm:$0xff]  ;;  %v5894_v7 = vpack.c.bf16 %v4989_v59, %v4987_v16 }
 0x642   : > { %v5896_v24 = vpack.c.bf16 %v4994_v45, %v4992_v30 }
 0x643   : > { %3682 = vmatmul.mubr.f32.gmra.mrb[24].mxu1 %v3324_v36  ;;  %v4997_v36 = vld [vmem:[%s9784_s2 + $0x17d0] sm:$0xff] }
 0x644   : > { %5863 = vmatpush1.bf16.msra.mxu1 %v5862_v58  ;;  %3853 = vmatprep.mubr.f32.mxu1 %v3766_v43  ;;  %v4998_v58 = vld [vmem:[%s9784_s2 + $0x17d8] sm:$0xff]  ;;  %v5902_v43 = vpack.c.bf16 %v4997_v36, %v4995_v52 }
 0x645   : > { %5865 = vmatprep.subr.bf16.mxu1 %v5864_v17  ;;  %v5898_v17 = vpack.c.bf16 %v4993_v25, %v4991_v1  ;;  %v5900_v8 = vpack.c.bf16 %v4998_v58, %v4996_v63 }
 0x648   : > { %5867 = vmatpush1.bf16.msra.mxu1 %v5866_v39  ;;  %v5904_v39 = vpack.c.bf16 %v5002_v27, %v5000_v13 }
 0x649   : > { %5869 = vmatprep.subr.bf16.mxu1 %v5868_v38  ;;  %v4999_v38 = vld [vmem:[%s9784_s2 + $0x17e0] sm:$0xff] }
 0x64a   : > { %v5906_v6 = vpack.c.bf16 %v5001_v48, %v4999_v38 }
 0x64c   : > { %5871 = vmatpush1.bf16.msra.mxu1 %v5870_v42  ;;  %v3769_v42 = vrot.slane %v9141_v15, 2  ;;  %v3771_v15 = vrot.slane %v9171_v21, 2  ;;  %v5003_v21 = vld [vmem:[%s9785_s3 + $0x3] ss:$4 sm:$0x3] }
 0x64d   : > { %5873 = vmatprep.subr.bf16.mxu1 %v5872_v53  ;;  %v3762_v53 = vrot.slane %v9101_v3, 2  ;;  %v9598_v10 = vrot.slane %v5003_v21, %v7253_v31 }
 0x64e   : > { %v3770_v35 = vsel %vm974_vm4, %v3765_v19, %v3769_v42  ;;  %v3774_v3 = vsel %vm974_vm4, %v3769_v42, %v3773_v51  ;;  %v3772_v26 = vsel %vm974_vm4, %v3767_v32, %v3771_v15  ;;  %v3776_v23 = vsel %vm974_vm4, %v3771_v15, %v3775_v49 }
 0x64f   : > { %v3763_v56 = vsel %vm974_vm4, %v3761_v44, %v3762_v53  ;;  %v9595_v19 = vrot.slane %v5003_v21, %v7248_v29 }
 0x650   : > { %5875 = vmatpush1.bf16.msra.mxu1 %v5874_v57  ;;  %v3691_v57 = vld [vmem:[#allocation3 + $0x48] sm:$0x1f] }
 0x651   : > { %5877 = vmatprep.subr.bf16.mxu1 %v5876_v46  ;;  %v3768_v46 = vsel %vm974_vm4, %v3762_v53, %v3767_v32  ;;  %v3777_v33 = vrot.slane %v3691_v57, 2 }
 0x653   : > { %v3778_v22 = vsel %vm974_vm4, %v3773_v51, %v3777_v33 }
 0x654   : > { %5879 = vmatpush1.bf16.msra.mxu1 %v5878_v40 }
 0x655   : > { %5881 = vmatprep.subr.bf16.mxu1 %v5880_v28 }
 0x658   : > { %5883 = vmatpush1.bf16.msra.mxu1 %v5882_v11 }
 0x659   : > { %5885 = vmatprep.subr.bf16.mxu1 %v5884_v12 }
 0x65c   : > { %5887 = vmatpush1.bf16.msra.mxu1 %v5886_v61 }
 0x65d   : > { %5889 = vmatprep.subr.bf16.mxu1 %v5888_v55 }
 0x660   : > { %5891 = vmatpush1.bf16.msra.mxu1 %v5890_v37 }
 0x661   : > { %5893 = vmatprep.subr.bf16.mxu1 %v5892_v60 }
 0x664   : > { %5895 = vmatpush1.bf16.msra.mxu1 %v5894_v7 }
 0x665   : > { %5897 = vmatprep.subr.bf16.mxu1 %v5896_v24 }
 0x668   : > { %5899 = vmatpush1.bf16.msra.mxu1 %v5898_v17 }
 0x669   : > { %5901 = vmatprep.subr.bf16.mxu1 %v5900_v8 }
 0x66c   : > { %5903 = vmatpush1.bf16.msra.mxu1 %v5902_v43 }
 0x66d   : > { %5905 = vmatprep.subr.bf16.mxu1 %v5904_v39 }
 0x670   : > { %5907 = vmatpush1.bf16.msra.mxu1 %v5906_v6 }
 0x673   : > { %3854 = vmatmul.mubr.f32.vlgmr.msra.gmra.mrb[16].mxu1 %v3763_v56 }
 0x674   : > { %3859 = vmatprep.mubr.f32.mxu1 %v3770_v35 }
 0x677   : > { %3860 = vmatmul.mubr.f32.gmra.mrb[18].mxu1 %v3768_v46 }
 0x678   : > { %3865 = vmatprep.mubr.f32.mxu1 %v3774_v3 }
 0x67b   : > { %3866 = vmatmul.mubr.f32.gmra.mrb[20].mxu1 %v3772_v26 }
 0x67c   : > { %3871 = vmatprep.mubr.f32.mxu1 %v3778_v22 }
 0x67f   : > { %3872 = vmatmul.mubr.f32.gmra.mrb[22].mxu1 %v3776_v23 }
 0x680   : > { %3877 = vmatprep.mubr.f32.mxu1 %v3777_v33 }
 0x683   : > { %3878 = vmatmul.mubr.f32.gmra.mrb[24].mxu1 %v3775_v49 }
 0x746   : > { %v3855_v40 = vpop.f32.mrb[16].mxu1 }
 0x747   : > { %v9601_v28 = vadd.f32 %v9595_v19, %v3855_v40  ;;  %v3857_v14 = vpop.f32.mrb[17].mxu1 }
 0x748   : > { %v9604_v2 = vadd.f32 %v9598_v10, %v3857_v14 }
 0x749   : > { %v3917_v20 = vand.u32 2147483647, %v9601_v28  ;;  %v9625_v18 = vmul.f32 0.5, %v9601_v28  ;;  %vm4127_vm1 = vcmp.ge.f32.partialorder %v9601_v28, 0.0 }
 0x74a   : > { %v3918_v34 = vand.u32 2147483647, %v9604_v2  ;;  %v3861_v11 = vpop.f32.mrb[18].mxu1  ;;  %v9630_v53 = vmul.f32 0.5, %v9604_v2  ;;  %vm4128_vm3 = vcmp.ge.f32.partialorder %v9604_v2, 0.0 }
 0x74b   : > { %v3927_v12 = vmul.f32 0.70710677, %v3917_v20  ;;  %v9609_v29 = vadd.f32 %v9595_v19, %v3861_v11  ;;  %v3863_v5 = vpop.f32.mrb[19].mxu1 }
 0x74c   : > { %v3928_v31 = vmul.f32 0.70710677, %v3918_v34  ;;  %v9612_v47 = vadd.f32 %v9598_v10, %v3863_v5 }
 0x74d   : > { %v3937_v0 = vmul.f32 0.3275911, %v3927_v12  ;;  %v4067_v54 = vsub.f32 0.0, %v3927_v12  ;;  %v3919_v61 = vand.u32 2147483647, %v9609_v29  ;;  %v9639_v51 = vmul.f32 0.5, %v9609_v29 }
 0x74e   : > { %v3938_v55 = vmul.f32 0.3275911, %v3928_v31  ;;  %v4068_v41 = vsub.f32 0.0, %v3928_v31  ;;  %v3920_v62 = vand.u32 2147483647, %v9612_v47  ;;  %v3867_v37 = vpop.f32.mrb[20].mxu1 }
 0x74f   : > { %v3947_v4 = vadd.f32 1.0, %v3937_v0  ;;  %v3929_v50 = vmul.f32 0.70710677, %v3919_v61  ;;  %v3869_v59 = vpop.f32.mrb[21].mxu1  ;;  %v4077_v30 = vmul.f32 %v4067_v54, %v3927_v12  ;;  %v9617_v17 = vadd.f32 %v9595_v19, %v3867_v37 }
 0x750   : > { %v3948_v60 = vadd.f32 1.0, %v3938_v55  ;;  %v3930_v16 = vmul.f32 0.70710677, %v3920_v62  ;;  %v4078_v24 = vmul.f32 %v4068_v41, %v3928_v31  ;;  %v9620_v36 = vadd.f32 %v9598_v10, %v3869_v59 }
 0x751   : > { %6118 = vrcp.f32 %v3947_v4  ;;  %v3939_v45 = vmul.f32 0.3275911, %v3929_v50  ;;  %v4069_v7 = vsub.f32 0.0, %v3929_v50  ;;  %v4087_v13 = vmul.f32 1.442695, %v4077_v30 }
 0x752   : > { %6120 = vrcp.f32 %v3948_v60  ;;  %v3940_v1 = vmul.f32 0.3275911, %v3930_v16  ;;  %v3873_v25 = vpop.f32.mrb[22].mxu1  ;;  %v4070_v27 = vsub.f32 0.0, %v3930_v16  ;;  %v3921_v43 = vand.u32 2147483647, %v9617_v17 }
 0x753   : > { %v3949_v63 = vadd.f32 1.0, %v3939_v45  ;;  %v4079_v58 = vmul.f32 %v4069_v7, %v3929_v50  ;;  %v3875_v8 = vpop.f32.mrb[23].mxu1  ;;  %v4089_v39 = vmul.f32 1.442695, %v4078_v24  ;;  %v3922_v38 = vand.u32 2147483647, %v9620_v36 }
 0x754   : > { %v3950_v52 = vadd.f32 1.0, %v3940_v1  ;;  %v3931_v44 = vmul.f32 0.70710677, %v3921_v43  ;;  %v9633_v32 = vadd.f32 %v9595_v19, %v3873_v25  ;;  %v9636_v35 = vadd.f32 %v9598_v10, %v3875_v8 }
 0x755   : > { %6122 = vrcp.f32 %v3949_v63  ;;  %v4091_v6 = vmul.f32 1.442695, %v4079_v58  ;;  %v3932_v56 = vmul.f32 0.70710677, %v3922_v38  ;;  %v4080_v57 = vmul.f32 %v4070_v27, %v3930_v16 }
 0x756   : > { %6124 = vrcp.f32 %v3950_v52  ;;  %v3879_v48 = vpop.f32.mrb[24].mxu1  ;;  %v3941_v46 = vmul.f32 0.3275911, %v3931_v44  ;;  %v9642_v15 = vmul.f32 0.5, %v9612_v47  ;;  %v3923_v33 = vand.u32 2147483647, %v9633_v32 }
 0x757   : > { %v9627_v42 = vpop.f32.mrb[25].mxu1  ;;  %6126 = vpow2.f32 %v4087_v13  ;;  %v3942_v3 = vmul.f32 0.3275911, %v3932_v56  ;;  %v4071_v49 = vsub.f32 0.0, %v3931_v44  ;;  %v3924_v22 = vand.u32 2147483647, %v9636_v35 }
 0x758   : > { %6128 = vpow2.f32 %v4089_v39  ;;  %v3951_v26 = vadd.f32 1.0, %v3941_v46  ;;  %v4072_v14 = vsub.f32 0.0, %v3932_v56  ;;  %v3933_v20 = vmul.f32 0.70710677, %v3923_v33 }
 0x759   : > { %6130 = vpow2.f32 %v4091_v6  ;;  %v3952_v40 = vadd.f32 1.0, %v3942_v3  ;;  %v4093_v11 = vmul.f32 1.442695, %v4080_v57  ;;  %v3934_v12 = vmul.f32 0.70710677, %v3924_v22 }
 0x75a   : > { %6132 = vrcp.f32 %v3951_v26  ;;  %v3943_v31 = vmul.f32 0.3275911, %v3933_v20  ;;  %v9653_v0 = vadd.f32 %v9595_v19, %v3879_v48  ;;  %v4081_v55 = vmul.f32 %v4071_v49, %v3931_v44 }
 0x75b   : > { %v9645_v9 = vpop.eup %6118  ;;  %6134 = vrcp.f32 %v3952_v40  ;;  %v4073_v41 = vsub.f32 0.0, %v3933_v20  ;;  %v3944_v62 = vmul.f32 0.3275911, %v3934_v12  ;;  %v4082_v60 = vmul.f32 %v4072_v14, %v3932_v56 }
 0x75c   : > { %v9648_v23 = vpop.eup %6120  ;;  %v3977_v21 = vmul.f32 1.0614054, %v9645_v9  ;;  %v3953_v16 = vadd.f32 1.0, %v3943_v31  ;;  %v4074_v1 = vsub.f32 0.0, %v3934_v12  ;;  %v4095_v8 = vmul.f32 1.442695, %v4081_v55 }
 0x75d   : > { %v3978_v34 = vmul.f32 1.0614054, %v9648_v23  ;;  %v4083_v19 = vmul.f32 %v4073_v41, %v3933_v20  ;;  %v3954_v45 = vadd.f32 1.0, %v3944_v62  ;;  %v4097_v43 = vmul.f32 1.442695, %v4082_v60 }
 0x75e   : > { %v3987_v5 = vadd.f32 -1.4531521, %v3977_v21  ;;  %6136 = vrcp.f32 %v3953_v16  ;;  %v4084_v39 = vmul.f32 %v4074_v1, %v3934_v12  ;;  %v9671_v3 = vadd.f32 %v9598_v10, %v9627_v42 }
 0x75f   : > { %v9655_v54 = vpop.eup %6122  ;;  %v3988_v61 = vadd.f32 -1.4531521, %v3978_v34  ;;  %6138 = vrcp.f32 %v3954_v45  ;;  %v4099_v44 = vmul.f32 1.442695, %v4083_v19  ;;  %v3925_v22 = vand.u32 2147483647, %v9653_v0 }
 0x760   : > { %v9657_v4 = vpop.eup %6124  ;;  %v3997_v50 = vmul.f32 %v9645_v9, %v3987_v5  ;;  %v3979_v37 = vmul.f32 1.0614054, %v9655_v54  ;;  %6140 = vpow2.f32 %v4093_v11  ;;  %v4101_v46 = vmul.f32 1.442695, %v4084_v39 }
 0x761   : > { %v3998_v59 = vmul.f32 %v9648_v23, %v3988_v61  ;;  %v3980_v30 = vmul.f32 1.0614054, %v9657_v4  ;;  %v6127_v25 = vpop.eup %6126  ;;  %6142 = vpow2.f32 %v4095_v8  ;;  %v9684_v11 = vmul.f32 0.70710677, %v3925_v22 }
 0x762   : > { %v4007_v7 = vadd.f32 1.4214138, %v3997_v50  ;;  %v3989_v24 = vadd.f32 -1.4531521, %v3979_v37  ;;  %v6129_v52 = vpop.eup %6128  ;;  %6144 = vpow2.f32 %v4097_v43  ;;  %vm4129_vm12 = vcmp.ge.f32.partialorder %v9609_v29, 0.0 }
 0x763   : > { %v4008_v63 = vadd.f32 1.4214138, %v3998_v59  ;;  %v3990_v58 = vadd.f32 -1.4531521, %v3980_v30  ;;  %v9665_v38 = vpop.eup %6130  ;;  %6146 = vpow2.f32 %v4099_v44  ;;  %v9694_v16 = vmul.f32 0.3275911, %v9684_v11 }
 0x764   : > { %v4017_v13 = vmul.f32 %v9645_v9, %v4007_v7  ;;  %v3999_v27 = vmul.f32 %v9655_v54, %v3989_v24  ;;  %v9673_v33 = vpop.eup %6132  ;;  %6148 = vpow2.f32 %v4101_v46  ;;  %vm4130_vm13 = vcmp.ge.f32.partialorder %v9612_v47, 0.0 }
 0x765   : > { %v4018_v48 = vmul.f32 %v9648_v23, %v4008_v63  ;;  %v4000_v6 = vmul.f32 %v9657_v4, %v3990_v58  ;;  %v9676_v21 = vpop.eup %6134  ;;  %v3981_v20 = vmul.f32 1.0614054, %v9673_v33  ;;  %vm4131_vm14 = vcmp.ge.f32.partialorder %v9617_v17, 0.0 }
 0x766   : > { %v4027_v56 = vadd.f32 -0.28449672, %v4017_v13  ;;  %v4009_v57 = vadd.f32 1.4214138, %v3999_v27  ;;  %v3982_v42 = vmul.f32 1.0614054, %v9676_v21 }
 0x767   : > { %v4028_v26 = vadd.f32 -0.28449672, %v4018_v48  ;;  %v4010_v49 = vadd.f32 1.4214138, %v4000_v6  ;;  %v3991_v31 = vadd.f32 -1.4531521, %v3981_v20 }
 0x768   : > { %v4037_v40 = vmul.f32 %v9645_v9, %v4027_v56  ;;  %v4019_v14 = vmul.f32 %v9655_v54, %v4009_v57  ;;  %v3992_v41 = vadd.f32 -1.4531521, %v3982_v42  ;;  %v9687_v62 = vpop.eup %6136  ;;  %vm4132_vm15 = vcmp.ge.f32.partialorder %v9620_v36, 0.0 }
 0x769   : > { %v4038_v34 = vmul.f32 %v9648_v23, %v4028_v26  ;;  %v4020_v10 = vmul.f32 %v9657_v4, %v4010_v49  ;;  %v4001_v60 = vmul.f32 %v9673_v33, %v3991_v31  ;;  %v9696_v59 = vpop.eup %6138  ;;  %v3983_v7 = vmul.f32 1.0614054, %v9687_v62 }
 0x76a   : > { %v4047_v12 = vadd.f32 0.2548296, %v4037_v40  ;;  %v4029_v5 = vadd.f32 -0.28449672, %v4019_v14  ;;  %v4002_v45 = vmul.f32 %v9676_v21, %v3992_v41  ;;  %v3984_v63 = vmul.f32 1.0614054, %v9696_v59  ;;  %v6141_v58 = vpop.eup %6140 }
 0x76b   : > { %v4048_v61 = vadd.f32 0.2548296, %v4038_v34  ;;  %v4030_v55 = vadd.f32 -0.28449672, %v4020_v10  ;;  %v4011_v1 = vadd.f32 1.4214138, %v4001_v60  ;;  %v6143_v6 = vpop.eup %6142 }
 0x76c   : > { %v4057_v50 = vmul.f32 %v9645_v9, %v4047_v12  ;;  %v4039_v37 = vmul.f32 %v9655_v54, %v4029_v5  ;;  %v4012_v27 = vadd.f32 1.4214138, %v4002_v45  ;;  %v3993_v43 = vadd.f32 -1.4531521, %v3983_v7  ;;  %v6145_v46 = vpop.eup %6144 }
 0x76d   : > { %v4058_v30 = vmul.f32 %v9648_v23, %v4048_v61  ;;  %v4040_v19 = vmul.f32 %v9657_v4, %v4030_v55  ;;  %v4021_v48 = vmul.f32 %v9673_v33, %v4011_v1  ;;  %v6147_v10 = vpop.eup %6146  ;;  %vm4133_vm2 = vcmp.ge.f32.partialorder %v9633_v32, 0.0 }
 0x76e   : > { %v4107_v9 = vmul.f32 %v6127_v25, %v4057_v50  ;;  %v4049_v24 = vadd.f32 0.2548296, %v4039_v37  ;;  %v3994_v25 = vadd.f32 -1.4531521, %v3984_v63  ;;  %v4003_v57 = vmul.f32 %v9687_v62, %v3993_v43  ;;  %v6149_v31 = vpop.eup %6148 }
 0x76f   : > { %v4108_v8 = vmul.f32 %v6129_v52, %v4058_v30  ;;  %v4050_v13 = vadd.f32 0.2548296, %v4040_v19  ;;  %v4022_v52 = vmul.f32 %v9676_v21, %v4012_v27  ;;  %v4031_v22 = vadd.f32 -0.28449672, %v4021_v48 }
 0x770   : > { %v4117_v23 = vsub.f32 1.0, %v4107_v9  ;;  %v4059_v39 = vmul.f32 %v9655_v54, %v4049_v24  ;;  %v4004_v54 = vmul.f32 %v9696_v59, %v3994_v25  ;;  %v4013_v34 = vadd.f32 1.4214138, %v4003_v57 }
 0x771   : > { %v4118_v44 = vsub.f32 1.0, %v4108_v8  ;;  %v4060_v56 = vmul.f32 %v9657_v4, %v4050_v13  ;;  %v4032_v20 = vadd.f32 -0.28449672, %v4022_v52  ;;  %v4041_v12 = vmul.f32 %v9673_v33, %v4031_v22 }
 0x772   : > { %v4137_v26 = vsub.f32 0.0, %v4117_v23  ;;  %v4109_v49 = vmul.f32 %v9665_v38, %v4059_v39  ;;  %v4014_v5 = vadd.f32 1.4214138, %v4004_v54  ;;  %v4023_v60 = vmul.f32 %v9687_v62, %v4013_v34 }
 0x773   : > { %v4138_v40 = vsub.f32 0.0, %v4118_v44  ;;  %v4110_v14 = vmul.f32 %v6141_v58, %v4060_v56  ;;  %v4042_v41 = vmul.f32 %v9676_v21, %v4032_v20  ;;  %v4051_v37 = vadd.f32 0.2548296, %v4041_v12 }
 0x774   : > { %v4147_v4 = vsel %vm4127_vm1, %v4117_v23, %v4137_v26  ;;  %v4119_v42 = vsub.f32 1.0, %v4109_v49  ;;  %v4024_v45 = vmul.f32 %v9696_v59, %v4014_v5  ;;  %v4033_v1 = vadd.f32 -0.28449672, %v4023_v60 }
 0x775   : > { %v4167_v61 = vadd.f32 1.0, %v4147_v4  ;;  %v4148_v38 = vsel %vm4128_vm3, %v4118_v44, %v4138_v40  ;;  %v4120_v55 = vsub.f32 1.0, %v4110_v14  ;;  %v4052_v19 = vadd.f32 0.2548296, %v4042_v41 }
 0x776   : > { %v4168_v28 = vadd.f32 1.0, %v4148_v38  ;;  %v4139_v50 = vsub.f32 0.0, %v4119_v42  ;;  %v4061_v24 = vmul.f32 %v9673_v33, %v4051_v37  ;;  %v4034_v8 = vadd.f32 -0.28449672, %v4024_v45 }
 0x777   : > { %v4177_v30 = vmul.f32 %v4167_v61, %v9625_v18  ;;  %v4140_v2 = vsub.f32 0.0, %v4120_v55  ;;  %v4062_v18 = vmul.f32 %v9676_v21, %v4052_v19  ;;  %v4043_v29 = vmul.f32 %v9687_v62, %v4033_v1 }
 0x778   : > { %v4178_v7 = vmul.f32 %v4168_v28, %v9630_v53  ;;  %v4149_v9 = vsel %vm4129_vm12, %v4119_v42, %v4139_v50  ;;  %v4111_v53 = vmul.f32 %v6143_v6, %v4061_v24  ;;  %v3955_v27 = vadd.f32 1.0, %v9694_v16 }
 0x779   : > { %4187 = vst [vmem:[%s9723_s19] sm:$0xff] %v4177_v30  ;;  %v4169_v63 = vadd.f32 1.0, %v4149_v9  ;;  %v4150_v58 = vsel %vm4130_vm13, %v4120_v55, %v4140_v2  ;;  %v4112_v43 = vmul.f32 %v6145_v46, %v4062_v18  ;;  %v4044_v23 = vmul.f32 %v9696_v59, %v4034_v8 }
 0x77a   : > { %4189 = vst.msk [vmem:[%s9723_s19 + $0x8] sm:$0xff] %vm4188_vm11, %v4178_v7  ;;  %v4170_v13 = vadd.f32 1.0, %v4150_v58  ;;  %v4121_v39 = vsub.f32 1.0, %v4111_v53  ;;  %v4053_v48 = vadd.f32 0.2548296, %v4043_v29  ;;  %6150 = vrcp.f32 %v3955_v27 }
 0x77b   : > { %v4179_v33 = vmul.f32 %v4169_v63, %v9639_v51  ;;  %v4122_v21 = vsub.f32 1.0, %v4112_v43  ;;  %v4054_v25 = vadd.f32 0.2548296, %v4044_v23  ;;  %v3926_v16 = vand.u32 2147483647, %v9671_v3 }
 0x77c   : > { %v4180_v47 = vmul.f32 %v4170_v13, %v9642_v15  ;;  %v4141_v6 = vsub.f32 0.0, %v4121_v39  ;;  %v4063_v44 = vmul.f32 %v9687_v62, %v4053_v48  ;;  %v4161_v51 = vmul.f32 0.5, %v9617_v17 }
 0x77d   : > { %4190 = vst [vmem:[%s9723_s19 + $0x10] sm:$0xff] %v4179_v33  ;;  %v4142_v56 = vsub.f32 0.0, %v4122_v21  ;;  %v4064_v15 = vmul.f32 %v9696_v59, %v4054_v25  ;;  %v3936_v46 = vmul.f32 0.70710677, %v3926_v16  ;;  %v4162_v22 = vmul.f32 0.5, %v9620_v36 }
 0x77e   : > { %4191 = vst.msk [vmem:[%s9723_s19 + $0x18] sm:$0xff] %vm4188_vm11, %v4180_v47  ;;  %v4151_v52 = vsel %vm4131_vm14, %v4121_v39, %v4141_v6  ;;  %v4113_v57 = vmul.f32 %v6147_v10, %v4063_v44  ;;  %v4075_v14 = vsub.f32 0.0, %v9684_v11  ;;  %vm4134_vm5 = vcmp.ge.f32.partialorder %v9636_v35, 0.0 }
 0x77f   : > { %v4171_v26 = vadd.f32 1.0, %v4151_v52  ;;  %v4152_v49 = vsel %vm4132_vm15, %v4122_v21, %v4142_v56  ;;  %v4114_v62 = vmul.f32 %v6149_v31, %v4064_v15  ;;  %v3946_v17 = vmul.f32 0.3275911, %v3936_v46 }
 0x780   : > { %v4172_v54 = vadd.f32 1.0, %v4152_v49  ;;  %v4123_v40 = vsub.f32 1.0, %v4113_v57  ;;  %v4085_v5 = vmul.f32 %v4075_v14, %v9684_v11  ;;  %v4163_v31 = vmul.f32 0.5, %v9633_v32 }
 0x781   : > { %v4181_v20 = vmul.f32 %v4171_v26, %v4161_v51  ;;  %v4124_v59 = vsub.f32 1.0, %v4114_v62  ;;  %v3956_v42 = vadd.f32 1.0, %v3946_v17  ;;  %v4164_v41 = vmul.f32 0.5, %v9636_v35 }
 0x782   : > { %v4182_v34 = vmul.f32 %v4172_v54, %v4162_v22  ;;  %v4143_v4 = vsub.f32 0.0, %v4123_v40  ;;  %v4103_v30 = vmul.f32 1.442695, %v4085_v5  ;;  %v4076_v9 = vsub.f32 0.0, %v3936_v46 }
 0x783   : > { %4192 = vst [vmem:[%s9723_s19 + $0x20] sm:$0x1] %v4181_v20  ;;  %v4144_v10 = vsub.f32 0.0, %v4124_v59  ;;  %6152 = vrcp.f32 %v3956_v42  ;;  %v4201_v2 = vrot.slane %v4181_v20, 2  ;;  %vm4135_vm6 = vcmp.ge.f32.partialorder %v9653_v0, 0.0 }
 0x784   : > { %v6151_v12 = vpop.eup %6150  ;;  %4194 = vst.msk [vmem:[%s9723_s19 + $0x28] sm:$0x1] %vm4193_vm0, %v4182_v34  ;;  %v4153_v36 = vsel %vm4133_vm2, %v4123_v40, %v4143_v4  ;;  %v4204_v7 = vrot.slane %v4182_v34, 2  ;;  %6154 = vpow2.f32 %v4103_v30  ;;  %v4086_v58 = vmul.f32 %v4076_v9, %v3936_v46 }
 0x785   : > { %v4173_v61 = vadd.f32 1.0, %v4153_v36  ;;  %v4154_v38 = vsel %vm4134_vm5, %v4124_v59, %v4144_v10  ;;  %v3985_v55 = vmul.f32 1.0614054, %v6151_v12  ;;  %v4165_v56 = vmul.f32 0.5, %v9653_v0 }
 0x786   : > { %v4174_v28 = vadd.f32 1.0, %v4154_v38  ;;  %v4105_v29 = vmul.f32 1.442695, %v4086_v58  ;;  %vm4136_vm7 = vcmp.ge.f32.partialorder %v9671_v3, 0.0  ;;  %v4166_v14 = vmul.f32 0.5, %v9671_v3 }
 0x787   : > { %v4183_v50 = vmul.f32 %v4173_v61, %v4163_v31  ;;  %v3995_v37 = vadd.f32 -1.4531521, %v3985_v55 }
 0x788   : > { %v4184_v60 = vmul.f32 %v4174_v28, %v4164_v41  ;;  %6156 = vpow2.f32 %v4105_v29 }
 0x789   : > { %v4202_v19 = vrot.slane %v4183_v50, 2  ;;  %v4005_v45 = vmul.f32 %v6151_v12, %v3995_v37 }
 0x78a   : > { %v4205_v11 = vrot.slane %v4184_v60, 2 }
 0x78b   : > { %v4203_v32 = vsel %vm974_vm4, %v4201_v2, %v4202_v19  ;;  %v4015_v24 = vadd.f32 1.4214138, %v4005_v45 }
 0x78c   : > { %5004 = vst [vmem:[%s9723_s19 + $0x30] sm:$0xff] %v4203_v32  ;;  %v4206_v1 = vsel %vm974_vm4, %v4204_v7, %v4205_v11 }
 0x78d   : > { %5005 = vst.msk [vmem:[%s9723_s19 + $0x38] sm:$0xff] %vm4188_vm11, %v4206_v1  ;;  %v4025_v35 = vmul.f32 %v6151_v12, %v4015_v24  ;;  %v6153_v63 = vpop.eup %6152 }
 0x78e   : > { %v3986_v8 = vmul.f32 1.0614054, %v6153_v63  ;;  %v6155_v47 = vpop.eup %6154 }
 0x78f   : > { %v4035_v18 = vadd.f32 -0.28449672, %v4025_v35 }
 0x790   : > { %v3996_v53 = vadd.f32 -1.4531521, %v3986_v8 }
 0x791   : > { %v4045_v13 = vmul.f32 %v6151_v12, %v4035_v18 }
 0x792   : > { %v4006_v33 = vmul.f32 %v6153_v63, %v3996_v53  ;;  %v6157_v57 = vpop.eup %6156 }
 0x793   : > { %v4055_v27 = vadd.f32 0.2548296, %v4045_v13 }
 0x794   : > { %v4016_v23 = vadd.f32 1.4214138, %v4006_v33 }
 0x795   : > { %v4065_v43 = vmul.f32 %v6151_v12, %v4055_v27 }
 0x796   : > { %v4026_v48 = vmul.f32 %v6153_v63, %v4016_v23 }
 0x797   : > { %v4115_v39 = vmul.f32 %v6155_v47, %v4065_v43 }
 0x798   : > { %v4036_v25 = vadd.f32 -0.28449672, %v4026_v48 }
 0x799   : > { %v4125_v21 = vsub.f32 1.0, %v4115_v39 }
 0x79a   : > { %v4046_v44 = vmul.f32 %v6153_v63, %v4036_v25 }
 0x79b   : > { %v4145_v6 = vsub.f32 0.0, %v4125_v21 }
 0x79c   : > { %v4056_v51 = vadd.f32 0.2548296, %v4046_v44 }
 0x79d   : > { %v4155_v16 = vsel %vm4135_vm6, %v4125_v21, %v4145_v6 }
 0x79e   : > { %v4175_v15 = vadd.f32 1.0, %v4155_v16  ;;  %v4066_v52 = vmul.f32 %v6153_v63, %v4056_v51 }
 0x7a0   : > { %v4185_v46 = vmul.f32 %v4175_v15, %v4165_v56  ;;  %v4116_v26 = vmul.f32 %v6157_v57, %v4066_v52 }
 0x7a2   : > { %v4207_v49 = vrot.slane %v4185_v46, 2  ;;  %v4126_v22 = vsub.f32 1.0, %v4116_v26 }
 0x7a4   : > { %v4208_v62 = vsel %vm974_vm4, %v4202_v19, %v4207_v49  ;;  %5008 = vst [vmem:[%s9723_s19 + $0x50] sm:$0x1] %v4207_v49  ;;  %v4146_v54 = vsub.f32 0.0, %v4126_v22 }
 0x7a5   : > { %5006 = vst [vmem:[%s9723_s19 + $0x40] sm:$0xff] %v4208_v62 }
 0x7a6   : > { %v4156_v40 = vsel %vm4136_vm7, %v4126_v22, %v4146_v54 }
 0x7a7   : > { %v4176_v0 = vadd.f32 1.0, %v4156_v40 }
 0x7a9   : > { %v4186_v17 = vmul.f32 %v4176_v0, %v4166_v14 }
 0x7ab   : > { %v4209_v20 = vrot.slane %v4186_v17, 2 }
 0x7ad   : > { %v4210_v59 = vsel %vm974_vm4, %v4205_v11, %v4209_v20  ;;  %5009 = vst.msk [vmem:[%s9723_s19 + $0x58] sm:$0x1] %vm4193_vm0, %v4209_v20 }
 0x7ae   : > { %5007 = vst.msk [vmem:[%s9723_s19 + $0x48] sm:$0xff] %vm4188_vm11, %v4210_v59 }
 0x7af PF: > { %s14_s15 = sadd.s32 1, %s6164_s15  }
 0x7b0   : > { %p11_p4 = scmp.ge.s32.totalorder %s14_s15, 4  }
 0x7b2   :  { %13 = sbr.rel (!%p11_p4) target bundleno = 1 (0x1), region = 83 }

</bundles_post_ra>
